<compile_context>
chip_gen: v5e
topology: v5e:2x2
jax: 0.10.0
libtpu: 0.0.40
codegen_flags: <defaults>
</compile_context>

<pallas_src>
from functools import lru_cache

import numpy as np
import jax
import jax.numpy as jnp
from jax.experimental import pallas as pl
from jax.experimental.pallas import tpu as pltpu


# --------------------------------------------------------------------------
# e3nn-equivalent Wigner-D construction (plain JAX / numpy glue)
# --------------------------------------------------------------------------
def _su2_generators(j: int) -> np.ndarray:
    m = np.arange(-j, j, dtype=np.float64)
    raising = np.diag(-np.sqrt(j * (j + 1) - m * (m + 1)), k=-1).astype(np.complex128)
    m = np.arange(-j + 1, j + 1, dtype=np.float64)
    lowering = np.diag(np.sqrt(j * (j + 1) - m * (m - 1)), k=1).astype(np.complex128)
    m = np.arange(-j, j + 1, dtype=np.float64)
    return np.stack(
        [
            0.5 * (raising + lowering),       # X
            np.diag(1j * m),                  # Y
            -0.5j * (raising - lowering),     # Z
        ],
        axis=0,
    )


def _change_basis_real_to_complex(l: int) -> np.ndarray:
    q = np.zeros((2 * l + 1, 2 * l + 1), dtype=np.complex128)
    for m in range(-l, 0):
        q[l + m, l + abs(m)] = 1.0 / np.sqrt(2.0)
        q[l + m, l - abs(m)] = -1j / np.sqrt(2.0)
    q[l, l] = 1.0
    for m in range(1, l + 1):
        q[l + m, l + abs(m)] = (-1.0) ** m / np.sqrt(2.0)
        q[l + m, l - abs(m)] = 1j * (-1.0) ** m / np.sqrt(2.0)
    q = (-1j) ** l * q
    return q


@lru_cache(maxsize=None)
def _so3_generators(l: int) -> np.ndarray:
    X = _su2_generators(l)
    Q = _change_basis_real_to_complex(l)
    X = np.conj(Q.T) @ X @ Q
    assert np.max(np.abs(X.imag)) < 1e-9
    return np.real(X)  # (3, 2l+1, 2l+1), float64


def wigner_D(l: int, alpha: jax.Array, beta: jax.Array, gamma: jax.Array) -> jax.Array:
    """Real Wigner-D matrix, e3nn convention. Returns (N, 2l+1, 2l+1) float32."""
    # TODO(synk): for l >= ~6 e3nn builds this in float64; f32 expm drifts slightly.
    X = jnp.asarray(_so3_generators(l), dtype=jnp.float32)
    expm = jax.scipy.linalg.expm

    def one(a, b, g):
        return expm(a * X[1]) @ expm(b * X[0]) @ expm(g * X[1])

    return jax.vmap(one)(alpha, beta, gamma)


# --------------------------------------------------------------------------
# Fused Pallas kernel: apply every Wigner block of every irrep group in ONE call
#   out[n, off + m*k + i, c] = sum_j Dl[n, i, j] * x[n, off + m*k + j, c]
# Refs: d_refs[g]: (Nb, k*k) f32, x_ref/o_ref: (Nb, dim, Cb)
# --------------------------------------------------------------------------
def _make_fused_kernel(groups, group_d_idx, num_d, acc_dtype=jnp.float32):
    def kernel(*refs):
        d_refs = refs[:num_d]
        x_ref = refs[num_d]
        o_ref = refs[num_d + 1]
        off = 0
        for (l, mul), didx in zip(groups, group_d_idx):
            k = 2 * l + 1
            if l == 0:
                # l=0 Wigner block is exactly the 1x1 identity: pure copy.
                o_ref[:, off:off + mul, :] = x_ref[:, off:off + mul, :].astype(o_ref.dtype)
            else:
                d_ref = d_refs[didx]
                for i in range(k):
                    # Row i of the (k,k) Wigner block: k per-batch scalars, (Nb,1,1) each.
                    drow = [
                        d_ref[:, (i * k + j):(i * k + j + 1)].astype(acc_dtype)[:, :, None]
                        for j in range(k)
                    ]
                    for m in range(mul):
                        base = off + m * k
                        # Unrolled VPU broadcast-FMA over the (2l+1) contraction axis.
                        # Per-term indexing keeps vreg live ranges at ~1 plane + acc.
                        acc = drow[0] * x_ref[:, base:base + 1, :].astype(acc_dtype)
                        for j in range(1, k):
                            acc = acc + drow[j] * x_ref[:, base + j:base + j + 1, :].astype(acc_dtype)
                        row = base + i
                        o_ref[:, row:row + 1, :] = acc.astype(o_ref.dtype)
            off += mul * k
    return kernel


# --------------------------------------------------------------------------
# Tiling heuristics (generation-aware VMEM budget)
# --------------------------------------------------------------------------
def _tpu_vmem_capacity() -> int:
    try:
        return int(pltpu.get_tpu_info().vmem_capacity_bytes)
    except Exception:
        return 64 * 1024 * 1024   # unknown: assume the smallest (v7x-like), stay safe


def _pick_tiles(n_pad: int, dim: int, c_pad: int, itemsize: int):
    vmem = _tpu_vmem_capacity()
    # Double-buffered (x + out) working-set target: larger on 128 MiB chips.
    budget = 12 * 1024 * 1024 if vmem >= 96 * 1024 * 1024 else 8 * 1024 * 1024
    # Lane tile: multiple of 128 that divides c_pad, capped at 512 lanes.
    cb = c_pad
    if cb > 512:
        cb = max(d for d in range(128, 513, 128) if c_pad % d == 0)
    # Batch tile: multiple of 8 dividing n_pad, bounded by the VMEM budget.
    per_row = 4 * dim * cb * itemsize            # (x + out) x double-buffering
    nb = min(n_pad, 256, max(8, (budget // max(per_row, 1)) // 8 * 8))
    while n_pad % nb != 0:
        nb -= 8
    # Give the grid >=2 steps when possible (keeps both v7x TensorCores busy;
    # cost on single-TC v5e/v6e is one extra ~0.35us pipeline step).
    if (n_pad // nb) * (c_pad // cb) == 1 and n_pad >= 16:
        nb = max(8, (nb // 2) // 8 * 8)
        while n_pad % nb != 0:
            nb -= 8
    return nb, cb, vmem


# --------------------------------------------------------------------------
# Single fused pallas_call
# --------------------------------------------------------------------------
def _apply_fused(groups, group_d_idx, d_list, x, io_dtype):
    n, dim, c = x.shape
    itemsize = jnp.dtype(io_dtype).itemsize
    pad_n = 16 if itemsize == 2 else 8           # bf16 sublane packing prefers 16
    n_pad = -(-n // pad_n) * pad_n
    c_pad = -(-c // 128) * 128                   # keep output lanes 128-dense

    xk = x.astype(io_dtype)
    if (n_pad, c_pad) != (n, c):
        xk = jnp.pad(xk, ((0, n_pad - n), (0, 0), (0, c_pad - c)))
    if n_pad != n:
        d_list = [jnp.pad(d, ((0, n_pad - n), (0, 0))) for d in d_list]

    nb, cb, vmem = _pick_tiles(n_pad, dim, c_pad, itemsize)
    num_d = len(d_list)

    d_specs = [pl.BlockSpec((nb, int(d.shape[1])), lambda ni, ci: (ni, 0)) for d in d_list]
    x_spec = pl.BlockSpec((nb, dim, cb), lambda ni, ci: (ni, 0, ci))
    o_spec = pl.BlockSpec((nb, dim, cb), lambda ni, ci: (ni, 0, ci))

    flops = int(sum(2 * mul * (2 * l + 1) ** 2 * n_pad * c_pad for l, mul in groups if l > 0))
    bytes_io = int(2 * n_pad * dim * c_pad * itemsize + sum(int(d.size) * 4 for d in d_list))

    cp_kwargs = dict(dimension_semantics=("parallel", "parallel"))
    if vmem >= 96 * 1024 * 1024:
        # v5e/v6e (128 MiB physical): raise the scoped-VMEM limit so large tiles
        # never hit the 16/32 MiB defaults.  Not set on v7x (64 MiB physical).
        cp_kwargs["vmem_limit_bytes"] = 64 * 1024 * 1024

    out = pl.pallas_call(
        _make_fused_kernel(groups, group_d_idx, num_d),
        out_shape=jax.ShapeDtypeStruct((n_pad, dim, c_pad), io_dtype),
        grid=(n_pad // nb, c_pad // cb),
        in_specs=d_specs + [x_spec],
        out_specs=o_spec,
        compiler_params=pltpu.CompilerParams(**cp_kwargs),
        cost_estimate=pl.CostEstimate(flops=flops, transcendentals=0,
                                      bytes_accessed=bytes_io),
    )(*d_list, xk)

    return out[:n, :, :c]


# --------------------------------------------------------------------------
# Forward pass of RefWignerRotation:  D_from_angles(a, b, g) @ x
# --------------------------------------------------------------------------
def ref_wigner_rotation(irreps, x, alpha, beta, gamma, io_dtype=None):
    """irreps: iterable of (l, mul).  x: (N, dim, C) or (dim, C).

    io_dtype=jnp.bfloat16 halves HBM traffic of this bandwidth-bound kernel
    (D and the accumulator stay float32); default keeps x.dtype for exact
    reference semantics.
    """
    groups = tuple((int(l), int(mul)) for l, mul in irreps)
    squeeze = (x.ndim == 2)
    if squeeze:
        x = x[None]
    n, dim, c = x.shape
    assert dim == sum(mul * (2 * l + 1) for l, mul in groups), "irreps dim mismatch"
    io_dtype = x.dtype if io_dtype is None else io_dtype

    f32 = jnp.float32
    alpha = jnp.broadcast_to(jnp.atleast_1d(jnp.asarray(alpha, f32)), (n,))
    beta = jnp.broadcast_to(jnp.atleast_1d(jnp.asarray(beta, f32)), (n,))
    gamma = jnp.broadcast_to(jnp.atleast_1d(jnp.asarray(gamma, f32)), (n,))

    # One flattened (N, k*k) Wigner block per unique l>0, shared across groups.
    d_cache = {}
    d_list = []
    group_d_idx = []
    for l, mul in groups:
        if l == 0:
            group_d_idx.append(None)
            continue
        if l not in d_cache:
            k = 2 * l + 1
            dl = wigner_D(l, alpha, beta, gamma)           # (N, k, k)
            d_cache[l] = len(d_list)
            d_list.append(dl.reshape(n, k * k))            # contiguous reshape only
        group_d_idx.append(d_cache[l])

    out = _apply_fused(groups, tuple(group_d_idx), d_list, x, io_dtype)
    out = out.astype(x.dtype)
    return out[0] if squeeze else out


# --------------------------------------------------------------------------
# Dense block-diagonal D (verification only -- NOT the hot path)
# --------------------------------------------------------------------------
def build_block_diag_D(irreps, alpha, beta, gamma) -> jax.Array:
    n = alpha.shape[0]
    dim = sum(mul * (2 * l + 1) for l, mul in irreps)
    D = jnp.zeros((n, dim, dim), dtype=jnp.float32)
    off = 0
    for l, mul in irreps:
        dl = wigner_D(l, alpha, beta, gamma)
        k = 2 * l + 1
        for _ in range(mul):
            D = D.at[:, off:off + k, off:off + k].set(dl)
            off += k
    return D


# --------------------------------------------------------------------------
if __name__ == "__main__":
    # irreps "2x0e + 2x1o + 1x2e"  ->  dim = 2*1 + 2*3 + 1*5 = 13
    irreps = ((0, 2), (1, 2), (2, 1))
    dim = sum(mul * (2 * l + 1) for l, mul in irreps)
    N, C = 16, 128

    key = jax.random.PRNGKey(0)
    k1, k2, k3, k4 = jax.random.split(key, 4)
    x = jax.random.normal(k1, (N, dim, C), dtype=jnp.float32)
    alpha = jax.random.uniform(k2, (N,), minval=0.0, maxval=2.0 * np.pi)
    beta = jax.random.uniform(k3, (N,), minval=0.0, maxval=np.pi)
    gamma = jax.random.uniform(k4, (N,), minval=0.0, maxval=2.0 * np.pi)

    out = ref_wigner_rotation(irreps, x, alpha, beta, gamma)
    out = jax.block_until_ready(out)

    # Sanity checks against the dense reference (verification only).
    D = build_block_diag_D(irreps, alpha, beta, gamma)
    eye = jnp.eye(dim, dtype=jnp.float32)[None]
    assert jnp.allclose(jnp.einsum("nij,nkj->nik", D, D),
                        jnp.broadcast_to(eye, D.shape), atol=1e-4)
    ref = jnp.einsum("nij,njc->nic", D, x)
    assert out.shape == (N, dim, C) and out.dtype == jnp.float32
    assert jnp.allclose(out, ref, atol=1e-5, rtol=1e-5)

    # Ragged shapes (exercise the N->8 / C->128 padding path).
    N2, C2 = 10, 100
    x2 = jax.random.normal(k1, (N2, dim, C2), dtype=jnp.float32)
    a2, b2, g2 = alpha[:N2], beta[:N2], gamma[:N2]
    out2 = jax.block_until_ready(ref_wigner_rotation(irreps, x2, a2, b2, g2))
    D2 = build_block_diag_D(irreps, a2, b2, g2)
    ref2 = jnp.einsum("nij,njc->nic", D2, x2)
    assert out2.shape == (N2, dim, C2)
    assert jnp.allclose(out2, ref2, atol=1e-5, rtol=1e-5)

    print("KERNEL_OK")
</pallas_src>

<mosaic_0001>
module attributes {stable_mosaic.version = 11 : i64} {
  func.func @kernel(%arg0: i32, %arg1: i32, %arg2: memref<8x9xf32, #tpu.memory_space<vmem>>, %arg3: memref<8x25xf32, #tpu.memory_space<vmem>>, %arg4: memref<8x13x128xf32, #tpu.memory_space<vmem>>, %arg5: memref<8x13x128xf32, #tpu.memory_space<vmem>>) attributes {dimension_semantics = [#tpu.dimension_semantics<parallel>, #tpu.dimension_semantics<parallel>], iteration_bounds = array<i64: 2, 1>, scalar_prefetch = 0 : i64, scratch_operands = 0 : i64, tpu.core_type = #tpu.core_type<tc>, window_params = [{transform_indices = @transform_0, window_bounds = array<i64: 8, 9>}, {transform_indices = @transform_1, window_bounds = array<i64: 8, 25>}, {transform_indices = @transform_2, window_bounds = array<i64: 8, 13, 128>}, {transform_indices = @transform_3, window_bounds = array<i64: 8, 13, 128>}]} {
    %c0 = arith.constant 0 : index
    %c0_0 = arith.constant 0 : index
    %c0_1 = arith.constant 0 : index
    %0 = vector.load %arg4[%c0, %c0_0, %c0_1] : memref<8x13x128xf32, #tpu.memory_space<vmem>>, vector<8x2x128xf32>
    %c0_2 = arith.constant 0 : index
    %c0_3 = arith.constant 0 : index
    %c0_4 = arith.constant 0 : index
    %1 = vector.load %arg5[%c0_2, %c0_3, %c0_4] : memref<8x13x128xf32, #tpu.memory_space<vmem>>, vector<8x2x128xf32>
    tpu.vector_store %arg5[%c0_2, %c0_3, %c0_4], %0 {strides = array<i32>} : memref<8x13x128xf32, #tpu.memory_space<vmem>>, vector<8x2x128xf32>,
    %c0_5 = arith.constant 0 : index
    %c0_6 = arith.constant 0 : index
    %2 = vector.load %arg2[%c0_5, %c0_6] : memref<8x9xf32, #tpu.memory_space<vmem>>, vector<8x1xf32>
    %3 = vector.shape_cast %2 : vector<8x1xf32> to vector<8x1x1xf32>
    %c0_7 = arith.constant 0 : index
    %c1 = arith.constant 1 : index
    %4 = vector.load %arg2[%c0_7, %c1] : memref<8x9xf32, #tpu.memory_space<vmem>>, vector<8x1xf32>
    %5 = vector.shape_cast %4 : vector<8x1xf32> to vector<8x1x1xf32>
    %c0_8 = arith.constant 0 : index
    %c2 = arith.constant 2 : index
    %6 = vector.load %arg2[%c0_8, %c2] : memref<8x9xf32, #tpu.memory_space<vmem>>, vector<8x1xf32>
    %7 = vector.shape_cast %6 : vector<8x1xf32> to vector<8x1x1xf32>
    %c0_9 = arith.constant 0 : index
    %c2_10 = arith.constant 2 : index
    %c0_11 = arith.constant 0 : index
    %8 = vector.load %arg4[%c0_9, %c2_10, %c0_11] : memref<8x13x128xf32, #tpu.memory_space<vmem>>, vector<8x1x128xf32>
    %9 = vector.broadcast %3 : vector<8x1x1xf32> to vector<8x1x128xf32>
    %10 = arith.mulf %9, %8 : vector<8x1x128xf32>
    %c0_12 = arith.constant 0 : index
    %c3 = arith.constant 3 : index
    %c0_13 = arith.constant 0 : index
    %11 = vector.load %arg4[%c0_12, %c3, %c0_13] : memref<8x13x128xf32, #tpu.memory_space<vmem>>, vector<8x1x128xf32>
    %12 = vector.broadcast %5 : vector<8x1x1xf32> to vector<8x1x128xf32>
    %13 = arith.mulf %12, %11 : vector<8x1x128xf32>
    %14 = arith.addf %10, %13 : vector<8x1x128xf32>
    %c0_14 = arith.constant 0 : index
    %c4 = arith.constant 4 : index
    %c0_15 = arith.constant 0 : index
    %15 = vector.load %arg4[%c0_14, %c4, %c0_15] : memref<8x13x128xf32, #tpu.memory_space<vmem>>, vector<8x1x128xf32>
    %16 = vector.broadcast %7 : vector<8x1x1xf32> to vector<8x1x128xf32>
    %17 = arith.mulf %16, %15 : vector<8x1x128xf32>
    %18 = arith.addf %14, %17 : vector<8x1x128xf32>
    %c0_16 = arith.constant 0 : index
    %c2_17 = arith.constant 2 : index
    %c0_18 = arith.constant 0 : index
    %19 = vector.load %arg5[%c0_16, %c2_17, %c0_18] : memref<8x13x128xf32, #tpu.memory_space<vmem>>, vector<8x1x128xf32>
    tpu.vector_store %arg5[%c0_16, %c2_17, %c0_18], %18 {strides = array<i32>} : memref<8x13x128xf32, #tpu.memory_space<vmem>>, vector<8x1x128xf32>,
    %c0_19 = arith.constant 0 : index
    %c5 = arith.constant 5 : index
    %c0_20 = arith.constant 0 : index
    %20 = vector.load %arg4[%c0_19, %c5, %c0_20] : memref<8x13x128xf32, #tpu.memory_space<vmem>>, vector<8x1x128xf32>
    %21 = vector.broadcast %3 : vector<8x1x1xf32> to vector<8x1x128xf32>
    %22 = arith.mulf %21, %20 : vector<8x1x128xf32>
    %c0_21 = arith.constant 0 : index
    %c6 = arith.constant 6 : index
    %c0_22 = arith.constant 0 : index
    %23 = vector.load %arg4[%c0_21, %c6, %c0_22] : memref<8x13x128xf32, #tpu.memory_space<vmem>>, vector<8x1x128xf32>
    %24 = vector.broadcast %5 : vector<8x1x1xf32> to vector<8x1x128xf32>
    %25 = arith.mulf %24, %23 : vector<8x1x128xf32>
    %26 = arith.addf %22, %25 : vector<8x1x128xf32>
    %c0_23 = arith.constant 0 : index
    %c7 = arith.constant 7 : index
    %c0_24 = arith.constant 0 : index
    %27 = vector.load %arg4[%c0_23, %c7, %c0_24] : memref<8x13x128xf32, #tpu.memory_space<vmem>>, vector<8x1x128xf32>
    %28 = vector.broadcast %7 : vector<8x1x1xf32> to vector<8x1x128xf32>
    %29 = arith.mulf %28, %27 : vector<8x1x128xf32>
    %30 = arith.addf %26, %29 : vector<8x1x128xf32>
    %c0_25 = arith.constant 0 : index
    %c5_26 = arith.constant 5 : index
    %c0_27 = arith.constant 0 : index
    %31 = vector.load %arg5[%c0_25, %c5_26, %c0_27] : memref<8x13x128xf32, #tpu.memory_space<vmem>>, vector<8x1x128xf32>
    tpu.vector_store %arg5[%c0_25, %c5_26, %c0_27], %30 {strides = array<i32>} : memref<8x13x128xf32, #tpu.memory_space<vmem>>, vector<8x1x128xf32>,
    %c0_28 = arith.constant 0 : index
    %c3_29 = arith.constant 3 : index
    %32 = vector.load %arg2[%c0_28, %c3_29] : memref<8x9xf32, #tpu.memory_space<vmem>>, vector<8x1xf32>
    %33 = vector.shape_cast %32 : vector<8x1xf32> to vector<8x1x1xf32>
    %c0_30 = arith.constant 0 : index
    %c4_31 = arith.constant 4 : index
    %34 = vector.load %arg2[%c0_30, %c4_31] : memref<8x9xf32, #tpu.memory_space<vmem>>, vector<8x1xf32>
    %35 = vector.shape_cast %34 : vector<8x1xf32> to vector<8x1x1xf32>
    %c0_32 = arith.constant 0 : index
    %c5_33 = arith.constant 5 : index
    %36 = vector.load %arg2[%c0_32, %c5_33] : memref<8x9xf32, #tpu.memory_space<vmem>>, vector<8x1xf32>
    %37 = vector.shape_cast %36 : vector<8x1xf32> to vector<8x1x1xf32>
    %c0_34 = arith.constant 0 : index
    %c2_35 = arith.constant 2 : index
    %c0_36 = arith.constant 0 : index
    %38 = vector.load %arg4[%c0_34, %c2_35, %c0_36] : memref<8x13x128xf32, #tpu.memory_space<vmem>>, vector<8x1x128xf32>
    %39 = vector.broadcast %33 : vector<8x1x1xf32> to vector<8x1x128xf32>
    %40 = arith.mulf %39, %38 : vector<8x1x128xf32>
    %c0_37 = arith.constant 0 : index
    %c3_38 = arith.constant 3 : index
    %c0_39 = arith.constant 0 : index
    %41 = vector.load %arg4[%c0_37, %c3_38, %c0_39] : memref<8x13x128xf32, #tpu.memory_space<vmem>>, vector<8x1x128xf32>
    %42 = vector.broadcast %35 : vector<8x1x1xf32> to vector<8x1x128xf32>
    %43 = arith.mulf %42, %41 : vector<8x1x128xf32>
    %44 = arith.addf %40, %43 : vector<8x1x128xf32>
    %c0_40 = arith.constant 0 : index
    %c4_41 = arith.constant 4 : index
    %c0_42 = arith.constant 0 : index
    %45 = vector.load %arg4[%c0_40, %c4_41, %c0_42] : memref<8x13x128xf32, #tpu.memory_space<vmem>>, vector<8x1x128xf32>
    %46 = vector.broadcast %37 : vector<8x1x1xf32> to vector<8x1x128xf32>
    %47 = arith.mulf %46, %45 : vector<8x1x128xf32>
    %48 = arith.addf %44, %47 : vector<8x1x128xf32>
    %c0_43 = arith.constant 0 : index
    %c3_44 = arith.constant 3 : index
    %c0_45 = arith.constant 0 : index
    %49 = vector.load %arg5[%c0_43, %c3_44, %c0_45] : memref<8x13x128xf32, #tpu.memory_space<vmem>>, vector<8x1x128xf32>
    tpu.vector_store %arg5[%c0_43, %c3_44, %c0_45], %48 {strides = array<i32>} : memref<8x13x128xf32, #tpu.memory_space<vmem>>, vector<8x1x128xf32>,
    %c0_46 = arith.constant 0 : index
    %c5_47 = arith.constant 5 : index
    %c0_48 = arith.constant 0 : index
    %50 = vector.load %arg4[%c0_46, %c5_47, %c0_48] : memref<8x13x128xf32, #tpu.memory_space<vmem>>, vector<8x1x128xf32>
    %51 = vector.broadcast %33 : vector<8x1x1xf32> to vector<8x1x128xf32>
    %52 = arith.mulf %51, %50 : vector<8x1x128xf32>
    %c0_49 = arith.constant 0 : index
    %c6_50 = arith.constant 6 : index
    %c0_51 = arith.constant 0 : index
    %53 = vector.load %arg4[%c0_49, %c6_50, %c0_51] : memref<8x13x128xf32, #tpu.memory_space<vmem>>, vector<8x1x128xf32>
    %54 = vector.broadcast %35 : vector<8x1x1xf32> to vector<8x1x128xf32>
    %55 = arith.mulf %54, %53 : vector<8x1x128xf32>
    %56 = arith.addf %52, %55 : vector<8x1x128xf32>
    %c0_52 = arith.constant 0 : index
    %c7_53 = arith.constant 7 : index
    %c0_54 = arith.constant 0 : index
    %57 = vector.load %arg4[%c0_52, %c7_53, %c0_54] : memref<8x13x128xf32, #tpu.memory_space<vmem>>, vector<8x1x128xf32>
    %58 = vector.broadcast %37 : vector<8x1x1xf32> to vector<8x1x128xf32>
    %59 = arith.mulf %58, %57 : vector<8x1x128xf32>
    %60 = arith.addf %56, %59 : vector<8x1x128xf32>
    %c0_55 = arith.constant 0 : index
    %c6_56 = arith.constant 6 : index
    %c0_57 = arith.constant 0 : index
    %61 = vector.load %arg5[%c0_55, %c6_56, %c0_57] : memref<8x13x128xf32, #tpu.memory_space<vmem>>, vector<8x1x128xf32>
    tpu.vector_store %arg5[%c0_55, %c6_56, %c0_57], %60 {strides = array<i32>} : memref<8x13x128xf32, #tpu.memory_space<vmem>>, vector<8x1x128xf32>,
    %c0_58 = arith.constant 0 : index
    %c6_59 = arith.constant 6 : index
    %62 = vector.load %arg2[%c0_58, %c6_59] : memref<8x9xf32, #tpu.memory_space<vmem>>, vector<8x1xf32>
    %63 = vector.shape_cast %62 : vector<8x1xf32> to vector<8x1x1xf32>
    %c0_60 = arith.constant 0 : index
    %c7_61 = arith.constant 7 : index
    %64 = vector.load %arg2[%c0_60, %c7_61] : memref<8x9xf32, #tpu.memory_space<vmem>>, vector<8x1xf32>
    %65 = vector.shape_cast %64 : vector<8x1xf32> to vector<8x1x1xf32>
    %c0_62 = arith.constant 0 : index
    %c8 = arith.constant 8 : index
    %66 = vector.load %arg2[%c0_62, %c8] : memref<8x9xf32, #tpu.memory_space<vmem>>, vector<8x1xf32>
    %67 = vector.shape_cast %66 : vector<8x1xf32> to vector<8x1x1xf32>
    %c0_63 = arith.constant 0 : index
    %c2_64 = arith.constant 2 : index
    %c0_65 = arith.constant 0 : index
    %68 = vector.load %arg4[%c0_63, %c2_64, %c0_65] : memref<8x13x128xf32, #tpu.memory_space<vmem>>, vector<8x1x128xf32>
    %69 = vector.broadcast %63 : vector<8x1x1xf32> to vector<8x1x128xf32>
    %70 = arith.mulf %69, %68 : vector<8x1x128xf32>
    %c0_66 = arith.constant 0 : index
    %c3_67 = arith.constant 3 : index
    %c0_68 = arith.constant 0 : index
    %71 = vector.load %arg4[%c0_66, %c3_67, %c0_68] : memref<8x13x128xf32, #tpu.memory_space<vmem>>, vector<8x1x128xf32>
    %72 = vector.broadcast %65 : vector<8x1x1xf32> to vector<8x1x128xf32>
    %73 = arith.mulf %72, %71 : vector<8x1x128xf32>
    %74 = arith.addf %70, %73 : vector<8x1x128xf32>
    %c0_69 = arith.constant 0 : index
    %c4_70 = arith.constant 4 : index
    %c0_71 = arith.constant 0 : index
    %75 = vector.load %arg4[%c0_69, %c4_70, %c0_71] : memref<8x13x128xf32, #tpu.memory_space<vmem>>, vector<8x1x128xf32>
    %76 = vector.broadcast %67 : vector<8x1x1xf32> to vector<8x1x128xf32>
    %77 = arith.mulf %76, %75 : vector<8x1x128xf32>
    %78 = arith.addf %74, %77 : vector<8x1x128xf32>
    %c0_72 = arith.constant 0 : index
    %c4_73 = arith.constant 4 : index
    %c0_74 = arith.constant 0 : index
    %79 = vector.load %arg5[%c0_72, %c4_73, %c0_74] : memref<8x13x128xf32, #tpu.memory_space<vmem>>, vector<8x1x128xf32>
    tpu.vector_store %arg5[%c0_72, %c4_73, %c0_74], %78 {strides = array<i32>} : memref<8x13x128xf32, #tpu.memory_space<vmem>>, vector<8x1x128xf32>,
    %c0_75 = arith.constant 0 : index
    %c5_76 = arith.constant 5 : index
    %c0_77 = arith.constant 0 : index
    %80 = vector.load %arg4[%c0_75, %c5_76, %c0_77] : memref<8x13x128xf32, #tpu.memory_space<vmem>>, vector<8x1x128xf32>
    %81 = vector.broadcast %63 : vector<8x1x1xf32> to vector<8x1x128xf32>
    %82 = arith.mulf %81, %80 : vector<8x1x128xf32>
    %c0_78 = arith.constant 0 : index
    %c6_79 = arith.constant 6 : index
    %c0_80 = arith.constant 0 : index
    %83 = vector.load %arg4[%c0_78, %c6_79, %c0_80] : memref<8x13x128xf32, #tpu.memory_space<vmem>>, vector<8x1x128xf32>
    %84 = vector.broadcast %65 : vector<8x1x1xf32> to vector<8x1x128xf32>
    %85 = arith.mulf %84, %83 : vector<8x1x128xf32>
    %86 = arith.addf %82, %85 : vector<8x1x128xf32>
    %c0_81 = arith.constant 0 : index
    %c7_82 = arith.constant 7 : index
    %c0_83 = arith.constant 0 : index
    %87 = vector.load %arg4[%c0_81, %c7_82, %c0_83] : memref<8x13x128xf32, #tpu.memory_space<vmem>>, vector<8x1x128xf32>
    %88 = vector.broadcast %67 : vector<8x1x1xf32> to vector<8x1x128xf32>
    %89 = arith.mulf %88, %87 : vector<8x1x128xf32>
    %90 = arith.addf %86, %89 : vector<8x1x128xf32>
    %c0_84 = arith.constant 0 : index
    %c7_85 = arith.constant 7 : index
    %c0_86 = arith.constant 0 : index
    %91 = vector.load %arg5[%c0_84, %c7_85, %c0_86] : memref<8x13x128xf32, #tpu.memory_space<vmem>>, vector<8x1x128xf32>
    tpu.vector_store %arg5[%c0_84, %c7_85, %c0_86], %90 {strides = array<i32>} : memref<8x13x128xf32, #tpu.memory_space<vmem>>, vector<8x1x128xf32>,
    %c0_87 = arith.constant 0 : index
    %c0_88 = arith.constant 0 : index
    %92 = vector.load %arg3[%c0_87, %c0_88] : memref<8x25xf32, #tpu.memory_space<vmem>>, vector<8x1xf32>
    %93 = vector.shape_cast %92 : vector<8x1xf32> to vector<8x1x1xf32>
    %c0_89 = arith.constant 0 : index
    %c1_90 = arith.constant 1 : index
    %94 = vector.load %arg3[%c0_89, %c1_90] : memref<8x25xf32, #tpu.memory_space<vmem>>, vector<8x1xf32>
    %95 = vector.shape_cast %94 : vector<8x1xf32> to vector<8x1x1xf32>
    %c0_91 = arith.constant 0 : index
    %c2_92 = arith.constant 2 : index
    %96 = vector.load %arg3[%c0_91, %c2_92] : memref<8x25xf32, #tpu.memory_space<vmem>>, vector<8x1xf32>
    %97 = vector.shape_cast %96 : vector<8x1xf32> to vector<8x1x1xf32>
    %c0_93 = arith.constant 0 : index
    %c3_94 = arith.constant 3 : index
    %98 = vector.load %arg3[%c0_93, %c3_94] : memref<8x25xf32, #tpu.memory_space<vmem>>, vector<8x1xf32>
    %99 = vector.shape_cast %98 : vector<8x1xf32> to vector<8x1x1xf32>
    %c0_95 = arith.constant 0 : index
    %c4_96 = arith.constant 4 : index
    %100 = vector.load %arg3[%c0_95, %c4_96] : memref<8x25xf32, #tpu.memory_space<vmem>>, vector<8x1xf32>
    %101 = vector.shape_cast %100 : vector<8x1xf32> to vector<8x1x1xf32>
    %c0_97 = arith.constant 0 : index
    %c8_98 = arith.constant 8 : index
    %c0_99 = arith.constant 0 : index
    %102 = vector.load %arg4[%c0_97, %c8_98, %c0_99] : memref<8x13x128xf32, #tpu.memory_space<vmem>>, vector<8x1x128xf32>
    %103 = vector.broadcast %93 : vector<8x1x1xf32> to vector<8x1x128xf32>
    %104 = arith.mulf %103, %102 : vector<8x1x128xf32>
    %c0_100 = arith.constant 0 : index
    %c9 = arith.constant 9 : index
    %c0_101 = arith.constant 0 : index
    %105 = vector.load %arg4[%c0_100, %c9, %c0_101] : memref<8x13x128xf32, #tpu.memory_space<vmem>>, vector<8x1x128xf32>
    %106 = vector.broadcast %95 : vector<8x1x1xf32> to vector<8x1x128xf32>
    %107 = arith.mulf %106, %105 : vector<8x1x128xf32>
    %108 = arith.addf %104, %107 : vector<8x1x128xf32>
    %c0_102 = arith.constant 0 : index
    %c10 = arith.constant 10 : index
    %c0_103 = arith.constant 0 : index
    %109 = vector.load %arg4[%c0_102, %c10, %c0_103] : memref<8x13x128xf32, #tpu.memory_space<vmem>>, vector<8x1x128xf32>
    %110 = vector.broadcast %97 : vector<8x1x1xf32> to vector<8x1x128xf32>
    %111 = arith.mulf %110, %109 : vector<8x1x128xf32>
    %112 = arith.addf %108, %111 : vector<8x1x128xf32>
    %c0_104 = arith.constant 0 : index
    %c11 = arith.constant 11 : index
    %c0_105 = arith.constant 0 : index
    %113 = vector.load %arg4[%c0_104, %c11, %c0_105] : memref<8x13x128xf32, #tpu.memory_space<vmem>>, vector<8x1x128xf32>
    %114 = vector.broadcast %99 : vector<8x1x1xf32> to vector<8x1x128xf32>
    %115 = arith.mulf %114, %113 : vector<8x1x128xf32>
    %116 = arith.addf %112, %115 : vector<8x1x128xf32>
    %c0_106 = arith.constant 0 : index
    %c12 = arith.constant 12 : index
    %c0_107 = arith.constant 0 : index
    %117 = vector.load %arg4[%c0_106, %c12, %c0_107] : memref<8x13x128xf32, #tpu.memory_space<vmem>>, vector<8x1x128xf32>
    %118 = vector.broadcast %101 : vector<8x1x1xf32> to vector<8x1x128xf32>
    %119 = arith.mulf %118, %117 : vector<8x1x128xf32>
    %120 = arith.addf %116, %119 : vector<8x1x128xf32>
    %c0_108 = arith.constant 0 : index
    %c8_109 = arith.constant 8 : index
    %c0_110 = arith.constant 0 : index
    %121 = vector.load %arg5[%c0_108, %c8_109, %c0_110] : memref<8x13x128xf32, #tpu.memory_space<vmem>>, vector<8x1x128xf32>
    tpu.vector_store %arg5[%c0_108, %c8_109, %c0_110], %120 {strides = array<i32>} : memref<8x13x128xf32, #tpu.memory_space<vmem>>, vector<8x1x128xf32>,
    %c0_111 = arith.constant 0 : index
    %c5_112 = arith.constant 5 : index
    %122 = vector.load %arg3[%c0_111, %c5_112] : memref<8x25xf32, #tpu.memory_space<vmem>>, vector<8x1xf32>
    %123 = vector.shape_cast %122 : vector<8x1xf32> to vector<8x1x1xf32>
    %c0_113 = arith.constant 0 : index
    %c6_114 = arith.constant 6 : index
    %124 = vector.load %arg3[%c0_113, %c6_114] : memref<8x25xf32, #tpu.memory_space<vmem>>, vector<8x1xf32>
    %125 = vector.shape_cast %124 : vector<8x1xf32> to vector<8x1x1xf32>
    %c0_115 = arith.constant 0 : index
    %c7_116 = arith.constant 7 : index
    %126 = vector.load %arg3[%c0_115, %c7_116] : memref<8x25xf32, #tpu.memory_space<vmem>>, vector<8x1xf32>
    %127 = vector.shape_cast %126 : vector<8x1xf32> to vector<8x1x1xf32>
    %c0_117 = arith.constant 0 : index
    %c8_118 = arith.constant 8 : index
    %128 = vector.load %arg3[%c0_117, %c8_118] : memref<8x25xf32, #tpu.memory_space<vmem>>, vector<8x1xf32>
    %129 = vector.shape_cast %128 : vector<8x1xf32> to vector<8x1x1xf32>
    %c0_119 = arith.constant 0 : index
    %c9_120 = arith.constant 9 : index
    %130 = vector.load %arg3[%c0_119, %c9_120] : memref<8x25xf32, #tpu.memory_space<vmem>>, vector<8x1xf32>
    %131 = vector.shape_cast %130 : vector<8x1xf32> to vector<8x1x1xf32>
    %c0_121 = arith.constant 0 : index
    %c8_122 = arith.constant 8 : index
    %c0_123 = arith.constant 0 : index
    %132 = vector.load %arg4[%c0_121, %c8_122, %c0_123] : memref<8x13x128xf32, #tpu.memory_space<vmem>>, vector<8x1x128xf32>
    %133 = vector.broadcast %123 : vector<8x1x1xf32> to vector<8x1x128xf32>
    %134 = arith.mulf %133, %132 : vector<8x1x128xf32>
    %c0_124 = arith.constant 0 : index
    %c9_125 = arith.constant 9 : index
    %c0_126 = arith.constant 0 : index
    %135 = vector.load %arg4[%c0_124, %c9_125, %c0_126] : memref<8x13x128xf32, #tpu.memory_space<vmem>>, vector<8x1x128xf32>
    %136 = vector.broadcast %125 : vector<8x1x1xf32> to vector<8x1x128xf32>
    %137 = arith.mulf %136, %135 : vector<8x1x128xf32>
    %138 = arith.addf %134, %137 : vector<8x1x128xf32>
    %c0_127 = arith.constant 0 : index
    %c10_128 = arith.constant 10 : index
    %c0_129 = arith.constant 0 : index
    %139 = vector.load %arg4[%c0_127, %c10_128, %c0_129] : memref<8x13x128xf32, #tpu.memory_space<vmem>>, vector<8x1x128xf32>
    %140 = vector.broadcast %127 : vector<8x1x1xf32> to vector<8x1x128xf32>
    %141 = arith.mulf %140, %139 : vector<8x1x128xf32>
    %142 = arith.addf %138, %141 : vector<8x1x128xf32>
    %c0_130 = arith.constant 0 : index
    %c11_131 = arith.constant 11 : index
    %c0_132 = arith.constant 0 : index
    %143 = vector.load %arg4[%c0_130, %c11_131, %c0_132] : memref<8x13x128xf32, #tpu.memory_space<vmem>>, vector<8x1x128xf32>
    %144 = vector.broadcast %129 : vector<8x1x1xf32> to vector<8x1x128xf32>
    %145 = arith.mulf %144, %143 : vector<8x1x128xf32>
    %146 = arith.addf %142, %145 : vector<8x1x128xf32>
    %c0_133 = arith.constant 0 : index
    %c12_134 = arith.constant 12 : index
    %c0_135 = arith.constant 0 : index
    %147 = vector.load %arg4[%c0_133, %c12_134, %c0_135] : memref<8x13x128xf32, #tpu.memory_space<vmem>>, vector<8x1x128xf32>
    %148 = vector.broadcast %131 : vector<8x1x1xf32> to vector<8x1x128xf32>
    %149 = arith.mulf %148, %147 : vector<8x1x128xf32>
    %150 = arith.addf %146, %149 : vector<8x1x128xf32>
    %c0_136 = arith.constant 0 : index
    %c9_137 = arith.constant 9 : index
    %c0_138 = arith.constant 0 : index
    %151 = vector.load %arg5[%c0_136, %c9_137, %c0_138] : memref<8x13x128xf32, #tpu.memory_space<vmem>>, vector<8x1x128xf32>
    tpu.vector_store %arg5[%c0_136, %c9_137, %c0_138], %150 {strides = array<i32>} : memref<8x13x128xf32, #tpu.memory_space<vmem>>, vector<8x1x128xf32>,
    %c0_139 = arith.constant 0 : index
    %c10_140 = arith.constant 10 : index
    %152 = vector.load %arg3[%c0_139, %c10_140] : memref<8x25xf32, #tpu.memory_space<vmem>>, vector<8x1xf32>
    %153 = vector.shape_cast %152 : vector<8x1xf32> to vector<8x1x1xf32>
    %c0_141 = arith.constant 0 : index
    %c11_142 = arith.constant 11 : index
    %154 = vector.load %arg3[%c0_141, %c11_142] : memref<8x25xf32, #tpu.memory_space<vmem>>, vector<8x1xf32>
    %155 = vector.shape_cast %154 : vector<8x1xf32> to vector<8x1x1xf32>
    %c0_143 = arith.constant 0 : index
    %c12_144 = arith.constant 12 : index
    %156 = vector.load %arg3[%c0_143, %c12_144] : memref<8x25xf32, #tpu.memory_space<vmem>>, vector<8x1xf32>
    %157 = vector.shape_cast %156 : vector<8x1xf32> to vector<8x1x1xf32>
    %c0_145 = arith.constant 0 : index
    %c13 = arith.constant 13 : index
    %158 = vector.load %arg3[%c0_145, %c13] : memref<8x25xf32, #tpu.memory_space<vmem>>, vector<8x1xf32>
    %159 = vector.shape_cast %158 : vector<8x1xf32> to vector<8x1x1xf32>
    %c0_146 = arith.constant 0 : index
    %c14 = arith.constant 14 : index
    %160 = vector.load %arg3[%c0_146, %c14] : memref<8x25xf32, #tpu.memory_space<vmem>>, vector<8x1xf32>
    %161 = vector.shape_cast %160 : vector<8x1xf32> to vector<8x1x1xf32>
    %c0_147 = arith.constant 0 : index
    %c8_148 = arith.constant 8 : index
    %c0_149 = arith.constant 0 : index
    %162 = vector.load %arg4[%c0_147, %c8_148, %c0_149] : memref<8x13x128xf32, #tpu.memory_space<vmem>>, vector<8x1x128xf32>
    %163 = vector.broadcast %153 : vector<8x1x1xf32> to vector<8x1x128xf32>
    %164 = arith.mulf %163, %162 : vector<8x1x128xf32>
    %c0_150 = arith.constant 0 : index
    %c9_151 = arith.constant 9 : index
    %c0_152 = arith.constant 0 : index
    %165 = vector.load %arg4[%c0_150, %c9_151, %c0_152] : memref<8x13x128xf32, #tpu.memory_space<vmem>>, vector<8x1x128xf32>
    %166 = vector.broadcast %155 : vector<8x1x1xf32> to vector<8x1x128xf32>
    %167 = arith.mulf %166, %165 : vector<8x1x128xf32>
    %168 = arith.addf %164, %167 : vector<8x1x128xf32>
    %c0_153 = arith.constant 0 : index
    %c10_154 = arith.constant 10 : index
    %c0_155 = arith.constant 0 : index
    %169 = vector.load %arg4[%c0_153, %c10_154, %c0_155] : memref<8x13x128xf32, #tpu.memory_space<vmem>>, vector<8x1x128xf32>
    %170 = vector.broadcast %157 : vector<8x1x1xf32> to vector<8x1x128xf32>
    %171 = arith.mulf %170, %169 : vector<8x1x128xf32>
    %172 = arith.addf %168, %171 : vector<8x1x128xf32>
    %c0_156 = arith.constant 0 : index
    %c11_157 = arith.constant 11 : index
    %c0_158 = arith.constant 0 : index
    %173 = vector.load %arg4[%c0_156, %c11_157, %c0_158] : memref<8x13x128xf32, #tpu.memory_space<vmem>>, vector<8x1x128xf32>
    %174 = vector.broadcast %159 : vector<8x1x1xf32> to vector<8x1x128xf32>
    %175 = arith.mulf %174, %173 : vector<8x1x128xf32>
    %176 = arith.addf %172, %175 : vector<8x1x128xf32>
    %c0_159 = arith.constant 0 : index
    %c12_160 = arith.constant 12 : index
    %c0_161 = arith.constant 0 : index
    %177 = vector.load %arg4[%c0_159, %c12_160, %c0_161] : memref<8x13x128xf32, #tpu.memory_space<vmem>>, vector<8x1x128xf32>
    %178 = vector.broadcast %161 : vector<8x1x1xf32> to vector<8x1x128xf32>
    %179 = arith.mulf %178, %177 : vector<8x1x128xf32>
    %180 = arith.addf %176, %179 : vector<8x1x128xf32>
    %c0_162 = arith.constant 0 : index
    %c10_163 = arith.constant 10 : index
    %c0_164 = arith.constant 0 : index
    %181 = vector.load %arg5[%c0_162, %c10_163, %c0_164] : memref<8x13x128xf32, #tpu.memory_space<vmem>>, vector<8x1x128xf32>
    tpu.vector_store %arg5[%c0_162, %c10_163, %c0_164], %180 {strides = array<i32>} : memref<8x13x128xf32, #tpu.memory_space<vmem>>, vector<8x1x128xf32>,
    %c0_165 = arith.constant 0 : index
    %c15 = arith.constant 15 : index
    %182 = vector.load %arg3[%c0_165, %c15] : memref<8x25xf32, #tpu.memory_space<vmem>>, vector<8x1xf32>
    %183 = vector.shape_cast %182 : vector<8x1xf32> to vector<8x1x1xf32>
    %c0_166 = arith.constant 0 : index
    %c16 = arith.constant 16 : index
    %184 = vector.load %arg3[%c0_166, %c16] : memref<8x25xf32, #tpu.memory_space<vmem>>, vector<8x1xf32>
    %185 = vector.shape_cast %184 : vector<8x1xf32> to vector<8x1x1xf32>
    %c0_167 = arith.constant 0 : index
    %c17 = arith.constant 17 : index
    %186 = vector.load %arg3[%c0_167, %c17] : memref<8x25xf32, #tpu.memory_space<vmem>>, vector<8x1xf32>
    %187 = vector.shape_cast %186 : vector<8x1xf32> to vector<8x1x1xf32>
    %c0_168 = arith.constant 0 : index
    %c18 = arith.constant 18 : index
    %188 = vector.load %arg3[%c0_168, %c18] : memref<8x25xf32, #tpu.memory_space<vmem>>, vector<8x1xf32>
    %189 = vector.shape_cast %188 : vector<8x1xf32> to vector<8x1x1xf32>
    %c0_169 = arith.constant 0 : index
    %c19 = arith.constant 19 : index
    %190 = vector.load %arg3[%c0_169, %c19] : memref<8x25xf32, #tpu.memory_space<vmem>>, vector<8x1xf32>
    %191 = vector.shape_cast %190 : vector<8x1xf32> to vector<8x1x1xf32>
    %c0_170 = arith.constant 0 : index
    %c8_171 = arith.constant 8 : index
    %c0_172 = arith.constant 0 : index
    %192 = vector.load %arg4[%c0_170, %c8_171, %c0_172] : memref<8x13x128xf32, #tpu.memory_space<vmem>>, vector<8x1x128xf32>
    %193 = vector.broadcast %183 : vector<8x1x1xf32> to vector<8x1x128xf32>
    %194 = arith.mulf %193, %192 : vector<8x1x128xf32>
    %c0_173 = arith.constant 0 : index
    %c9_174 = arith.constant 9 : index
    %c0_175 = arith.constant 0 : index
    %195 = vector.load %arg4[%c0_173, %c9_174, %c0_175] : memref<8x13x128xf32, #tpu.memory_space<vmem>>, vector<8x1x128xf32>
    %196 = vector.broadcast %185 : vector<8x1x1xf32> to vector<8x1x128xf32>
    %197 = arith.mulf %196, %195 : vector<8x1x128xf32>
    %198 = arith.addf %194, %197 : vector<8x1x128xf32>
    %c0_176 = arith.constant 0 : index
    %c10_177 = arith.constant 10 : index
    %c0_178 = arith.constant 0 : index
    %199 = vector.load %arg4[%c0_176, %c10_177, %c0_178] : memref<8x13x128xf32, #tpu.memory_space<vmem>>, vector<8x1x128xf32>
    %200 = vector.broadcast %187 : vector<8x1x1xf32> to vector<8x1x128xf32>
    %201 = arith.mulf %200, %199 : vector<8x1x128xf32>
    %202 = arith.addf %198, %201 : vector<8x1x128xf32>
    %c0_179 = arith.constant 0 : index
    %c11_180 = arith.constant 11 : index
    %c0_181 = arith.constant 0 : index
    %203 = vector.load %arg4[%c0_179, %c11_180, %c0_181] : memref<8x13x128xf32, #tpu.memory_space<vmem>>, vector<8x1x128xf32>
    %204 = vector.broadcast %189 : vector<8x1x1xf32> to vector<8x1x128xf32>
    %205 = arith.mulf %204, %203 : vector<8x1x128xf32>
    %206 = arith.addf %202, %205 : vector<8x1x128xf32>
    %c0_182 = arith.constant 0 : index
    %c12_183 = arith.constant 12 : index
    %c0_184 = arith.constant 0 : index
    %207 = vector.load %arg4[%c0_182, %c12_183, %c0_184] : memref<8x13x128xf32, #tpu.memory_space<vmem>>, vector<8x1x128xf32>
    %208 = vector.broadcast %191 : vector<8x1x1xf32> to vector<8x1x128xf32>
    %209 = arith.mulf %208, %207 : vector<8x1x128xf32>
    %210 = arith.addf %206, %209 : vector<8x1x128xf32>
    %c0_185 = arith.constant 0 : index
    %c11_186 = arith.constant 11 : index
    %c0_187 = arith.constant 0 : index
    %211 = vector.load %arg5[%c0_185, %c11_186, %c0_187] : memref<8x13x128xf32, #tpu.memory_space<vmem>>, vector<8x1x128xf32>
    tpu.vector_store %arg5[%c0_185, %c11_186, %c0_187], %210 {strides = array<i32>} : memref<8x13x128xf32, #tpu.memory_space<vmem>>, vector<8x1x128xf32>,
    %c0_188 = arith.constant 0 : index
    %c20 = arith.constant 20 : index
    %212 = vector.load %arg3[%c0_188, %c20] : memref<8x25xf32, #tpu.memory_space<vmem>>, vector<8x1xf32>
    %213 = vector.shape_cast %212 : vector<8x1xf32> to vector<8x1x1xf32>
    %c0_189 = arith.constant 0 : index
    %c21 = arith.constant 21 : index
    %214 = vector.load %arg3[%c0_189, %c21] : memref<8x25xf32, #tpu.memory_space<vmem>>, vector<8x1xf32>
    %215 = vector.shape_cast %214 : vector<8x1xf32> to vector<8x1x1xf32>
    %c0_190 = arith.constant 0 : index
    %c22 = arith.constant 22 : index
    %216 = vector.load %arg3[%c0_190, %c22] : memref<8x25xf32, #tpu.memory_space<vmem>>, vector<8x1xf32>
    %217 = vector.shape_cast %216 : vector<8x1xf32> to vector<8x1x1xf32>
    %c0_191 = arith.constant 0 : index
    %c23 = arith.constant 23 : index
    %218 = vector.load %arg3[%c0_191, %c23] : memref<8x25xf32, #tpu.memory_space<vmem>>, vector<8x1xf32>
    %219 = vector.shape_cast %218 : vector<8x1xf32> to vector<8x1x1xf32>
    %c0_192 = arith.constant 0 : index
    %c24 = arith.constant 24 : index
    %220 = vector.load %arg3[%c0_192, %c24] : memref<8x25xf32, #tpu.memory_space<vmem>>, vector<8x1xf32>
    %221 = vector.shape_cast %220 : vector<8x1xf32> to vector<8x1x1xf32>
    %c0_193 = arith.constant 0 : index
    %c8_194 = arith.constant 8 : index
    %c0_195 = arith.constant 0 : index
    %222 = vector.load %arg4[%c0_193, %c8_194, %c0_195] : memref<8x13x128xf32, #tpu.memory_space<vmem>>, vector<8x1x128xf32>
    %223 = vector.broadcast %213 : vector<8x1x1xf32> to vector<8x1x128xf32>
    %224 = arith.mulf %223, %222 : vector<8x1x128xf32>
    %c0_196 = arith.constant 0 : index
    %c9_197 = arith.constant 9 : index
    %c0_198 = arith.constant 0 : index
    %225 = vector.load %arg4[%c0_196, %c9_197, %c0_198] : memref<8x13x128xf32, #tpu.memory_space<vmem>>, vector<8x1x128xf32>
    %226 = vector.broadcast %215 : vector<8x1x1xf32> to vector<8x1x128xf32>
    %227 = arith.mulf %226, %225 : vector<8x1x128xf32>
    %228 = arith.addf %224, %227 : vector<8x1x128xf32>
    %c0_199 = arith.constant 0 : index
    %c10_200 = arith.constant 10 : index
    %c0_201 = arith.constant 0 : index
    %229 = vector.load %arg4[%c0_199, %c10_200, %c0_201] : memref<8x13x128xf32, #tpu.memory_space<vmem>>, vector<8x1x128xf32>
    %230 = vector.broadcast %217 : vector<8x1x1xf32> to vector<8x1x128xf32>
    %231 = arith.mulf %230, %229 : vector<8x1x128xf32>
    %232 = arith.addf %228, %231 : vector<8x1x128xf32>
    %c0_202 = arith.constant 0 : index
    %c11_203 = arith.constant 11 : index
    %c0_204 = arith.constant 0 : index
    %233 = vector.load %arg4[%c0_202, %c11_203, %c0_204] : memref<8x13x128xf32, #tpu.memory_space<vmem>>, vector<8x1x128xf32>
    %234 = vector.broadcast %219 : vector<8x1x1xf32> to vector<8x1x128xf32>
    %235 = arith.mulf %234, %233 : vector<8x1x128xf32>
    %236 = arith.addf %232, %235 : vector<8x1x128xf32>
    %c0_205 = arith.constant 0 : index
    %c12_206 = arith.constant 12 : index
    %c0_207 = arith.constant 0 : index
    %237 = vector.load %arg4[%c0_205, %c12_206, %c0_207] : memref<8x13x128xf32, #tpu.memory_space<vmem>>, vector<8x1x128xf32>
    %238 = vector.broadcast %221 : vector<8x1x1xf32> to vector<8x1x128xf32>
    %239 = arith.mulf %238, %237 : vector<8x1x128xf32>
    %240 = arith.addf %236, %239 : vector<8x1x128xf32>
    %c0_208 = arith.constant 0 : index
    %c12_209 = arith.constant 12 : index
    %c0_210 = arith.constant 0 : index
    %241 = vector.load %arg5[%c0_208, %c12_209, %c0_210] : memref<8x13x128xf32, #tpu.memory_space<vmem>>, vector<8x1x128xf32>
    tpu.vector_store %arg5[%c0_208, %c12_209, %c0_210], %240 {strides = array<i32>} : memref<8x13x128xf32, #tpu.memory_space<vmem>>, vector<8x1x128xf32>,
    return
  }
  func.func @transform_0(%arg0: i32, %arg1: i32) -> (i32, i32) {
    %c0_i32 = arith.constant 0 : i32
    %c0_i32_0 = arith.constant 0 : i32
    return %arg0, %c0_i32 : i32, i32
  }
  func.func @transform_1(%arg0: i32, %arg1: i32) -> (i32, i32) {
    %c0_i32 = arith.constant 0 : i32
    %c0_i32_0 = arith.constant 0 : i32
    return %arg0, %c0_i32 : i32, i32
  }
  func.func @transform_2(%arg0: i32, %arg1: i32) -> (i32, i32, i32) {
    %c0_i32 = arith.constant 0 : i32
    %c0_i32_0 = arith.constant 0 : i32
    return %arg0, %c0_i32, %arg1 : i32, i32, i32
  }
  func.func @transform_3(%arg0: i32, %arg1: i32) -> (i32, i32, i32) {
    %c0_i32 = arith.constant 0 : i32
    %c0_i32_0 = arith.constant 0 : i32
    return %arg0, %c0_i32, %arg1 : i32, i32, i32
  }
}

</mosaic_0001>

<bundles_post_ra>
// kernel: tpu_custom_call.1
= control target key start
LH: loop header
LB: loop body
LE: loop exit
PB: predicated region body
PF: predicated region fallthrough
CT: control target
= control target key end

     0   :  { %s3067_s12 = smov 0   ;;  %s3069_s13 = smov 0   ;;  %s4509_s0 = inlined_call_operand.vmem [shape: f32[16,9], index: 0, kind: input, shape index: {}]   ;;  %s4510_s1 = inlined_call_operand.vmem [shape: f32[16,25], index: 1, kind: input, shape index: {}]   ;;  %s4511_s2 = inlined_call_operand.vmem [shape: f32[16,13,128], index: 2, kind: input, shape index: {}]   ;;  %s4512_s3 = inlined_call_operand.vmem [shape: f32[16,13,128], index: 3, kind: output, shape index: {}]  }
   0x1   :  { %s3071_s14 = smov 0  }
   0x2 LB: > { %s25_s15 = sadd.s32 1, %s3016_s13  ;;  %p2839_p0 = scmp.ge.s32.totalorder %s3020_s14, 1  ;;  %s3020_s14 = sphi %s3071_s14, %s13_s14   ;;  %s3016_s13 = sphi %s3069_s13, %s4514_s13   ;;  %s3012_s12 = sphi %s3067_s12, %s4513_s12  }
   0x3   : > { %p27_p1 = scmp.ge.s32.totalorder %s25_s15, 2  ;;  %p176_p2 = scmp.lt.s32.totalorder %s3020_s14, 3 }
   0x5   : > { %s4516_s15 = smov (%p27_p1, %s25_s15), 0  ;;  %p177_p3 = pnand %p2839_p0, %p176_p2 }
   0x6   : > { %p216_p4 = scmp.lt.s32.totalorder (!%p177_p3), %s3012_s12, 1  ;;  %s2842_s24 = sshll.u32 (!%p177_p3), %s3012_s12, 3 }
   0x7   : > { %180 = sbr.rel (%p177_p3) target bundleno = 982 (0x3d6), region = 32  ;;  %p225_p5 = scmp.lt.s32.totalorder (!%p177_p3), %s2842_s24, 15 }
   0xc   : > { %v3022_v0 = vmov 0   ;;  %s3091_s16 = scalar_select %p216_p4, %s3012_s12, 1  ;;  %v3023_v7 = vmov 1   ;;  %v3024_v8 = vmov 2   ;;  %v3025_v9 = vmov 3  }
   0xd   : > { %2903 = vset.pattern.permute.xlu2 %v3022_v0  ;;  %2902 = vset.pattern.permute.xlu1 %v3022_v0  ;;  %v3026_v12 = vmov 4   ;;  %v3027_v21 = vmov 5   ;;  %s4518_s24 = smov (!%p225_p5, %s2842_s24), 15  ;;  %v3028_v61 = vmov 6  }
   0xe   : > { %2901 = vset.pattern.permute.xlu0 %v3022_v0  ;;  %s2840_s17 = sshll.u32 %s3091_s16, 3  ;;  %s2850_s25 = sshll.u32 %s4518_s24, 4 }
   0xf   : > { %s3100_s20 = scalar_lea.vmem %s4509_s0, %s2840_s17  ;;  %s3168_s23 = scalar_lea.vmem %s4510_s1, %s2840_s17 }
  0x10   : > { %v3103_v1 = vld [vmem:[%s3100_s20] sm:$0xff]  ;;  %s3203_s28 = scalar_lea.vmem %s4511_s2, %s2850_s25  ;;  %s3230_s4 = scalar_lea.vmem %s4512_s3, %s2850_s25 }
  0x11   : > { %v3106_v2 = vrot.slane %v3103_v1, 4  ;;  %v3109_v3 = vrot.slane %v3103_v1, 2  ;;  %278 = vperm.xlu0 %2901, %v3103_v1   ;;  %v3115_v4 = vrot.slane %v3103_v1, 5  ;;  %v3118_v5 = vrot.slane %v3103_v1, 3  ;;  %v3175_v15 = vld [vmem:[%s3168_s23] sm:$0xff] }
  0x12   : > { %v3123_v6 = vrot.slane %v3103_v1, 7  ;;  %v3150_v10 = vrot.slane %v3103_v1, 1  ;;  %v3159_v13 = vrot.slane %v3103_v1, 6  ;;  %v3178_v16 = vrot.slane %v3175_v15, 1  ;;  %v325_v25 = vld [vmem:[%s3203_s28 + $0x3] sm:$0x1] }
  0x13   : > { %298 = vperm.xlu2 %2903, %v3106_v2   ;;  %288 = vperm.xlu1 %2902, %v3109_v3   ;;  %v3187_v19 = vrot.slane %v3175_v15, 6  ;;  %v477_v28 = vld [vmem:[%s3203_s28 + $0x6] sm:$0x1]  ;;  %v269_v29 = vld [vmem:[%s3203_s28 + $0x2] sm:$0x1] }
  0x14   : > { %v461_v30 = vld [vmem:[%s3203_s28 + $0x5] sm:$0x1]  ;;  %v389_v36 = vld [vmem:[%s3203_s28 + $0x4] sm:$0x1]  ;;  %v501_v37 = vld [vmem:[%s3203_s28 + $0x7] sm:$0x1] }
  0x15   : > { %v328_v42 = vld [vmem:[%s3203_s28 + $0x33] sm:$0x1]  ;;  %v480_v47 = vld [vmem:[%s3203_s28 + $0x36] sm:$0x1]  ;;  %v272_v48 = vld [vmem:[%s3203_s28 + $0x32] sm:$0x1] }
  0x16   : > { %v464_v49 = vld [vmem:[%s3203_s28 + $0x35] sm:$0x1]  ;;  %v392_v57 = vld [vmem:[%s3203_s28 + $0x34] sm:$0x1]  ;;  %v504_v58 = vld [vmem:[%s3203_s28 + $0x37] sm:$0x1] }
  0x19   : > { %283 = vperm.xlu0 %2901, %v3150_v10  }
  0x1b   : > { %303 = vperm.xlu2 %2903, %v3115_v4   ;;  %293 = vperm.xlu1 %2902, %v3118_v5  }
  0x21   : > { %308 = vperm.xlu0 %2901, %v3159_v13  }
  0x23   : > { %2904 = vset.pattern.permute.xlu2 %v3023_v7  ;;  %313 = vperm.xlu1 %2902, %v3123_v6  }
  0x24   : > { %334 = vperm.xlu2 %2904, %v3103_v1  }
  0x29   : > { %1102 = vperm.xlu0 %2901, %v3178_v16  }
  0x2b   : > { %2905 = vset.pattern.permute.xlu1 %v3023_v7 }
  0x2c   : > { %349 = vperm.xlu2 %2904, %v3118_v5   ;;  %344 = vperm.xlu1 %2905, %v3109_v3  }
  0x31   : > { %1127 = vperm.xlu0 %2901, %v3187_v19  }
  0x34   : > { %359 = vperm.xlu2 %2904, %v3115_v4   ;;  %354 = vperm.xlu1 %2905, %v3106_v2  }
  0x39   : > { %2922 = vset.pattern.permute.xlu0 %v3023_v7 }
  0x3a   : > { %339 = vperm.xlu0 %2922, %v3150_v10  }
  0x3c   : > { %2906 = vset.pattern.permute.xlu2 %v3024_v8  ;;  %369 = vperm.xlu1 %2905, %v3123_v6  }
  0x3d   : > { %398 = vperm.xlu2 %2906, %v3103_v1  }
  0x42   : > { %364 = vperm.xlu0 %2922, %v3159_v13  }
  0x44   : > { %2907 = vset.pattern.permute.xlu1 %v3024_v8 }
  0x45   : > { %413 = vperm.xlu2 %2906, %v3118_v5   ;;  %408 = vperm.xlu1 %2907, %v3109_v3  }
  0x4a   : > { %1158 = vperm.xlu0 %2922, %v3178_v16  }
  0x4d   : > { %423 = vperm.xlu2 %2906, %v3115_v4   ;;  %418 = vperm.xlu1 %2907, %v3106_v2  }
  0x52   : > { %1183 = vperm.xlu0 %2922, %v3187_v19  }
  0x55   : > { %2908 = vset.pattern.permute.xlu2 %v3025_v9  ;;  %433 = vperm.xlu1 %2907, %v3123_v6  }
  0x56   : > { %551 = vperm.xlu2 %2908, %v3103_v1  }
  0x5a   : > { %2925 = vset.pattern.permute.xlu0 %v3024_v8 }
  0x5b   : > { %403 = vperm.xlu0 %2925, %v3150_v10  }
  0x5d   : > { %2909 = vset.pattern.permute.xlu1 %v3025_v9 }
  0x5e   : > { %566 = vperm.xlu2 %2908, %v3118_v5   ;;  %561 = vperm.xlu1 %2909, %v3109_v3  }
  0x63   : > { %428 = vperm.xlu0 %2925, %v3159_v13  }
  0x66   : > { %576 = vperm.xlu2 %2908, %v3115_v4   ;;  %571 = vperm.xlu1 %2909, %v3106_v2  }
  0x6b   : > { %1222 = vperm.xlu0 %2925, %v3178_v16  }
  0x6d   : > { %v3152_v11 = vpop.permute.xlu2 %298 }
  0x6e   : > { %2910 = vset.pattern.permute.xlu2 %v3026_v12  ;;  %586 = vperm.xlu1 %2909, %v3123_v6  }
  0x6f   : > { %607 = vperm.xlu2 %2910, %v3103_v1  }
  0x73   : > { %1247 = vperm.xlu0 %2925, %v3187_v19  }
  0x75   : > { %v3161_v14 = vpop.permute.xlu2 %303 }
  0x76   : > { %2911 = vset.pattern.permute.xlu1 %v3026_v12  ;;  %v306_v62 = vperm.slane %v3161_v14, 0 }
  0x77   : > { %622 = vperm.xlu2 %2910, %v3118_v5   ;;  %617 = vperm.xlu1 %2911, %v3109_v3  }
  0x7b   : > { %2928 = vset.pattern.permute.xlu0 %v3025_v9 }
  0x7c   : > { %556 = vperm.xlu0 %2928, %v3150_v10  }
  0x7e   : > { %v335_v17 = vpop.permute.xlu2 %334 }
  0x7f   : > { %632 = vperm.xlu2 %2910, %v3115_v4   ;;  %627 = vperm.xlu1 %2911, %v3106_v2   ;;  %v337_v26 = vperm.slane %v335_v17, 0  ;;  %v274_v17 = vld [vmem:[%s3203_s28 + $0x52] sm:$0x1] }
  0x81   : > { %v373_v31 = vmul.f32 %v337_v26, %v325_v25  ;;  %v485_v32 = vmul.f32 %v477_v28, %v337_v26  ;;  %v466_v26 = vld [vmem:[%s3203_s28 + $0x55] sm:$0x1]  ;;  %v482_v28 = vld [vmem:[%s3203_s28 + $0x56] sm:$0x1] }
  0x83   : > { %v279_v23 = vpop.permute.xlu0 %278 }
  0x84   : > { %v281_v27 = vperm.slane %v279_v23, 0  ;;  %581 = vperm.xlu0 %2928, %v3159_v13  }
  0x85   : > { %v3184_v18 = vpop.permute.xlu1 %288 }
  0x86   : > { %v350_v20 = vpop.permute.xlu2 %349  ;;  %v317_v33 = vmul.f32 %v281_v27, %v269_v29  ;;  %v469_v34 = vmul.f32 %v461_v30, %v281_v27  ;;  %v330_v27 = vld [vmem:[%s3203_s28 + $0x53] sm:$0x1]  ;;  %v322_v30 = vmul.f32 %v306_v62, %v274_v17  ;;  %v3029_v17 = vmov 7  }
  0x87   : > { %2912 = vset.pattern.permute.xlu2 %v3027_v21  ;;  %642 = vperm.xlu1 %2911, %v3123_v6   ;;  %v352_v43 = vperm.slane %v350_v20, 0 }
  0x88   : > { %671 = vperm.xlu2 %2912, %v3103_v1   ;;  %v381_v40 = vadd.f32 %v373_v31, %v317_v33  ;;  %v493_v41 = vadd.f32 %v485_v32, %v469_v34  ;;  %v394_v34 = vld [vmem:[%s3203_s28 + $0x54] sm:$0x1] }
  0x89   : > { %v376_v52 = vmul.f32 %v352_v43, %v328_v42  ;;  %v488_v53 = vmul.f32 %v480_v47, %v352_v43 }
  0x8c   : > { %1286 = vperm.xlu0 %2928, %v3178_v16  }
  0x8d   : > { %v294_v22 = vpop.permute.xlu1 %293 }
  0x8e   : > { %v3196_v24 = vpop.permute.xlu2 %359  ;;  %v296_v44 = vperm.slane %v294_v22, 0 }
  0x8f   : > { %2913 = vset.pattern.permute.xlu1 %v3027_v21  ;;  %v362_v63 = vperm.slane %v3196_v24, 0  ;;  %v474_v24 = vmul.f32 %v466_v26, %v306_v62  ;;  %v301_v26 = vperm.slane %v3152_v11, 0 }
  0x90   : > { %686 = vperm.xlu2 %2912, %v3118_v5   ;;  %681 = vperm.xlu1 %2913, %v3109_v3   ;;  %v320_v54 = vmul.f32 %v296_v44, %v272_v48  ;;  %v472_v55 = vmul.f32 %v464_v49, %v296_v44  ;;  %v327_v48 = vld [vmem:[%s3203_s28 + $0x23] sm:$0x1]  ;;  %v479_v49 = vld [vmem:[%s3203_s28 + $0x26] sm:$0x1] }
  0x91   : > { %v378_v31 = vmul.f32 %v362_v63, %v330_v27  ;;  %v490_v32 = vmul.f32 %v482_v28, %v362_v63  ;;  %v481_v27 = vld [vmem:[%s3203_s28 + $0x46] sm:$0x1]  ;;  %v273_v28 = vld [vmem:[%s3203_s28 + $0x42] sm:$0x1] }
  0x92   : > { %v384_v20 = vadd.f32 %v376_v52, %v320_v54  ;;  %v496_v22 = vadd.f32 %v488_v53, %v472_v55  ;;  %v463_v52 = vld [vmem:[%s3203_s28 + $0x25] sm:$0x1]  ;;  %v391_v55 = vld [vmem:[%s3203_s28 + $0x24] sm:$0x1] }
  0x94   : > { %1311 = vperm.xlu0 %2928, %v3187_v19  }
  0x95   : > { %v3214_v35 = vpop.permute.xlu1 %313 }
  0x97   : > { %v399_v38 = vpop.permute.xlu2 %398 }
  0x98   : > { %v401_v39 = vperm.slane %v399_v38, 0  ;;  %696 = vperm.xlu2 %2912, %v3115_v4   ;;  %691 = vperm.xlu1 %2913, %v3106_v2  }
  0x9a   : > { %v437_v45 = vmul.f32 %v401_v39, %v389_v36  ;;  %v509_v46 = vmul.f32 %v501_v37, %v401_v39  ;;  %v506_v36 = vld [vmem:[%s3203_s28 + $0x57] sm:$0x1]  ;;  %v386_v39 = vadd.f32 %v378_v31, %v322_v30  ;;  %v465_v30 = vld [vmem:[%s3203_s28 + $0x45] sm:$0x1] }
  0x9c   : > { %v445_v50 = vadd.f32 %v437_v45, %v381_v40  ;;  %v517_v51 = vadd.f32 %v509_v46, %v493_v41  ;;  %v498_v40 = vadd.f32 %v490_v32, %v474_v24  ;;  %v321_v32 = vmul.f32 %v301_v26, %v273_v28  ;;  %2931 = vset.pattern.permute.xlu0 %v3026_v12 }
  0x9d   : > { %612 = vperm.xlu0 %2931, %v3150_v10  }
  0x9e   : > { %453 = vst [vmem:[%s3230_s4 + $0x2] sm:$0x1] %v445_v50  ;;  %v345_v56 = vpop.permute.xlu1 %344  ;;  %v291_v50 = vperm.slane %v3184_v18, 0 }
  0x9f   : > { %525 = vst [vmem:[%s3230_s4 + $0x5] sm:$0x1] %v517_v51  ;;  %v414_v59 = vpop.permute.xlu2 %413  ;;  %v347_v47 = vperm.slane %v345_v56, 0  ;;  %v271_v51 = vld [vmem:[%s3203_s28 + $0x22] sm:$0x1] }
  0xa0   : > { %v416_v60 = vperm.slane %v414_v59, 0  ;;  %2914 = vset.pattern.permute.xlu2 %v3028_v61  ;;  %706 = vperm.xlu1 %2913, %v3123_v6   ;;  %v319_v59 = vmul.f32 %v291_v50, %v271_v51  ;;  %v468_v51 = vld [vmem:[%s3203_s28 + $0x75] sm:$0x1] }
  0xa1   : > { %824 = vperm.xlu2 %2914, %v3103_v1   ;;  %v375_v53 = vmul.f32 %v347_v47, %v327_v48  ;;  %v487_v54 = vmul.f32 %v479_v49, %v347_v47  ;;  %v316_v47 = vperm.slane %v3214_v35, 0  ;;  %v484_v48 = vld [vmem:[%s3203_s28 + $0x76] sm:$0x1] }
  0xa2   : > { %v440_v23 = vmul.f32 %v416_v60, %v392_v57  ;;  %v512_v25 = vmul.f32 %v504_v58, %v416_v60  ;;  %v503_v57 = vld [vmem:[%s3203_s28 + $0x27] sm:$0x1]  ;;  %v471_v60 = vmul.f32 %v463_v52, %v291_v50 }
  0xa3   : > { %v383_v18 = vadd.f32 %v375_v53, %v319_v59  ;;  %v476_v59 = vmul.f32 %v468_v51, %v316_v47 }
  0xa4   : > { %v448_v29 = vadd.f32 %v440_v23, %v384_v20  ;;  %v520_v14 = vadd.f32 %v512_v25, %v496_v22  ;;  %v495_v20 = vadd.f32 %v487_v54, %v471_v60  ;;  %v329_v22 = vld [vmem:[%s3203_s28 + $0x43] sm:$0x1] }
  0xa5   : > { %637 = vperm.xlu0 %2931, %v3159_v13  }
  0xa6   : > { %456 = vst [vmem:[%s3230_s4 + $0x32] sm:$0x1] %v448_v29  ;;  %v355_v33 = vpop.permute.xlu1 %354 }
  0xa7   : > { %528 = vst [vmem:[%s3230_s4 + $0x35] sm:$0x1] %v520_v14  ;;  %v424_v37 = vpop.permute.xlu2 %423  ;;  %v357_v63 = vperm.slane %v355_v33, 0  ;;  %v393_v33 = vld [vmem:[%s3203_s28 + $0x44] sm:$0x1] }
  0xa8   : > { %v426_v38 = vperm.slane %v424_v37, 0  ;;  %2915 = vset.pattern.permute.xlu1 %v3028_v61  ;;  %v473_v37 = vmul.f32 %v465_v30, %v301_v26 }
  0xa9   : > { %839 = vperm.xlu2 %2914, %v3118_v5   ;;  %834 = vperm.xlu1 %2915, %v3109_v3   ;;  %v377_v24 = vmul.f32 %v357_v63, %v329_v22  ;;  %v489_v31 = vmul.f32 %v481_v27, %v357_v63  ;;  %v3030_v27 = vmov 8  }
  0xaa   : > { %v442_v41 = vmul.f32 %v426_v38, %v394_v34  ;;  %v514_v42 = vmul.f32 %v506_v36, %v426_v38  ;;  %v505_v34 = vld [vmem:[%s3203_s28 + $0x47] sm:$0x1] }
  0xac   : > { %v450_v43 = vadd.f32 %v442_v41, %v386_v39  ;;  %v522_v44 = vadd.f32 %v514_v42, %v498_v40  ;;  %v385_v39 = vadd.f32 %v377_v24, %v321_v32  ;;  %v497_v41 = vadd.f32 %v489_v31, %v473_v37  ;;  %v332_v42 = vld [vmem:[%s3203_s28 + $0x73] sm:$0x1]  ;;  %v734_v24 = vld [vmem:[%s3203_s28 + $0x5] sm:$0x1]  ;;  %v598_v31 = vld [vmem:[%s3203_s28 + $0x3] sm:$0x1] }
  0xad   : > { %v750_v32 = vld [vmem:[%s3203_s28 + $0x6] sm:$0x1]  ;;  %1350 = vperm.xlu0 %2931, %v3178_v16  }
  0xae   : > { %458 = vst [vmem:[%s3230_s4 + $0x52] sm:$0x1] %v450_v43  ;;  %v3255_v45 = vpop.permute.xlu1 %369 }
  0xaf   : > { %530 = vst [vmem:[%s3230_s4 + $0x55] sm:$0x1] %v522_v44  ;;  %v372_v40 = vperm.slane %v3255_v45, 0  ;;  %v276_v45 = vld [vmem:[%s3203_s28 + $0x72] sm:$0x1] }
  0xb0   : > { %v3258_v46 = vpop.permute.xlu2 %551  ;;  %v324_v54 = vmul.f32 %v316_v47, %v276_v45  ;;  %v601_v47 = vld [vmem:[%s3203_s28 + $0x33] sm:$0x1] }
  0xb1   : > { %849 = vperm.xlu2 %2914, %v3115_v4   ;;  %844 = vperm.xlu1 %2915, %v3106_v2   ;;  %v380_v52 = vmul.f32 %v372_v40, %v332_v42  ;;  %v492_v53 = vmul.f32 %v484_v48, %v372_v40  ;;  %v545_v42 = vld [vmem:[%s3203_s28 + $0x32] sm:$0x1] }
  0xb3   : > { %v388_v35 = vadd.f32 %v380_v52, %v324_v54  ;;  %v500_v63 = vadd.f32 %v492_v53, %v476_v59 }
  0xb5   : > { %1375 = vperm.xlu0 %2931, %v3187_v19  }
  0xb7   : > { %v409_v58 = vpop.permute.xlu1 %408 }
  0xb8   : > { %v411_v56 = vperm.slane %v409_v58, 0  ;;  %v3271_v62 = vpop.permute.xlu2 %566 }
  0xb9   : > { %2916 = vset.pattern.permute.xlu2 %v3029_v17  ;;  %859 = vperm.xlu1 %2915, %v3123_v6  }
  0xba   : > { %v439_v23 = vmul.f32 %v411_v56, %v391_v55  ;;  %v511_v25 = vmul.f32 %v503_v57, %v411_v56  ;;  %880 = vperm.xlu2 %2916, %v3103_v1   ;;  %v396_v55 = vld [vmem:[%s3203_s28 + $0x74] sm:$0x1]  ;;  %v508_v57 = vld [vmem:[%s3203_s28 + $0x77] sm:$0x1] }
  0xbc   : > { %v447_v29 = vadd.f32 %v439_v23, %v383_v18  ;;  %v519_v14 = vadd.f32 %v511_v25, %v495_v20 }
  0xbd   : > { %2934 = vset.pattern.permute.xlu0 %v3027_v21 }
  0xbe   : > { %455 = vst [vmem:[%s3230_s4 + $0x22] sm:$0x1] %v447_v29  ;;  %676 = vperm.xlu0 %2934, %v3150_v10  }
  0xbf   : > { %527 = vst [vmem:[%s3230_s4 + $0x25] sm:$0x1] %v519_v14  ;;  %v419_v36 = vpop.permute.xlu1 %418  ;;  %v542_v14 = vld [vmem:[%s3203_s28 + $0x2] sm:$0x1] }
  0xc0   : > { %v421_v11 = vperm.slane %v419_v36, 0  ;;  %v3286_v38 = vpop.permute.xlu2 %576 }
  0xc1   : > { %2917 = vset.pattern.permute.xlu1 %v3029_v17 }
  0xc2   : > { %v441_v43 = vmul.f32 %v421_v11, %v393_v33  ;;  %v513_v44 = vmul.f32 %v505_v34, %v421_v11  ;;  %895 = vperm.xlu2 %2916, %v3118_v5   ;;  %890 = vperm.xlu1 %2917, %v3109_v3  }
  0xc4   : > { %v449_v49 = vadd.f32 %v441_v43, %v385_v39  ;;  %v521_v50 = vadd.f32 %v513_v44, %v497_v41 }
  0xc6   : > { %457 = vst [vmem:[%s3230_s4 + $0x42] sm:$0x1] %v449_v49  ;;  %v3337_v49 = vpop.permute.xlu0 %283  ;;  %701 = vperm.xlu0 %2934, %v3159_v13  }
  0xc7   : > { %529 = vst [vmem:[%s3230_s4 + $0x45] sm:$0x1] %v521_v50  ;;  %v434_v58 = vpop.permute.xlu1 %433  ;;  %v753_v50 = vld [vmem:[%s3203_s28 + $0x36] sm:$0x1]  ;;  %v286_v10 = vperm.slane %v3337_v49, 0 }
  0xc8   : > { %v436_v60 = vperm.slane %v434_v58, 0  ;;  %v777_v58 = vld [vmem:[%s3203_s28 + $0x37] sm:$0x1]  ;;  %v275_v49 = vld [vmem:[%s3203_s28 + $0x62] sm:$0x1] }
  0xc9   : > { %v608_v56 = vpop.permute.xlu2 %607 }
  0xca   : > { %v444_v18 = vmul.f32 %v436_v60, %v396_v55  ;;  %v516_v20 = vmul.f32 %v508_v57, %v436_v60  ;;  %905 = vperm.xlu2 %2916, %v3115_v4   ;;  %900 = vperm.xlu1 %2917, %v3106_v2   ;;  %v610_v30 = vperm.slane %v608_v56, 0  ;;  %v665_v57 = vld [vmem:[%s3203_s28 + $0x34] sm:$0x1] }
  0xcc   : > { %v452_v22 = vadd.f32 %v444_v18, %v388_v35  ;;  %v524_v23 = vadd.f32 %v516_v20, %v500_v63  ;;  %v646_v37 = vmul.f32 %v610_v30, %v598_v31  ;;  %v758_v11 = vmul.f32 %v750_v32, %v610_v30  ;;  %v547_v30 = vld [vmem:[%s3203_s28 + $0x52] sm:$0x1] }
  0xcd   : > { %v3360_v31 = vrot.slane %v3175_v15, 3 }
  0xce   : > { %460 = vst [vmem:[%s3230_s4 + $0x72] sm:$0x1] %v452_v22  ;;  %v3352_v22 = vpop.permute.xlu0 %308  ;;  %1431 = vperm.xlu0 %2934, %v3178_v16  }
  0xcf   : > { %532 = vst [vmem:[%s3230_s4 + $0x75] sm:$0x1] %v524_v23  ;;  %v603_v23 = vld [vmem:[%s3203_s28 + $0x53] sm:$0x1] }
  0xd0   : > { %v3307_v25 = vpop.permute.xlu1 %561 }
  0xd1   : > { %v623_v26 = vpop.permute.xlu2 %622 }
  0xd2   : > { %2918 = vset.pattern.permute.xlu2 %v3030_v27  ;;  %915 = vperm.xlu1 %2917, %v3123_v6   ;;  %v625_v41 = vperm.slane %v623_v26, 0  ;;  %v755_v26 = vld [vmem:[%s3203_s28 + $0x56] sm:$0x1] }
  0xd3   : > { %944 = vperm.xlu2 %2918, %v3103_v1   ;;  %v554_v1 = vperm.slane %v3258_v46, 0  ;;  %v569_v46 = vperm.slane %v3271_v62, 0 }
  0xd4   : > { %v649_v52 = vmul.f32 %v625_v41, %v601_v47  ;;  %v761_v54 = vmul.f32 %v753_v50, %v625_v41  ;;  %v3379_v47 = vrot.slane %v3175_v15, 5 }
  0xd5   : > { %v590_v34 = vmul.f32 %v554_v1, %v542_v14  ;;  %v742_v36 = vmul.f32 %v734_v24, %v554_v1  ;;  %v593_v62 = vmul.f32 %v569_v46, %v545_v42  ;;  %v739_v24 = vld [vmem:[%s3203_s28 + $0x55] sm:$0x1] }
  0xd7   : > { %v654_v43 = vadd.f32 %v646_v37, %v590_v34  ;;  %v766_v44 = vadd.f32 %v758_v11, %v742_v36  ;;  %v657_v35 = vadd.f32 %v649_v52, %v593_v62  ;;  %v667_v37 = vld [vmem:[%s3203_s28 + $0x54] sm:$0x1]  ;;  %v779_v11 = vld [vmem:[%s3203_s28 + $0x57] sm:$0x1]  ;;  %v752_v62 = vld [vmem:[%s3203_s28 + $0x26] sm:$0x1] }
  0xd8   : > { %v3314_v28 = vpop.permute.xlu1 %571  ;;  %v564_v52 = vperm.slane %v3307_v25, 0 }
  0xd9   : > { %v3316_v29 = vpop.permute.xlu2 %632 }
  0xda   : > { %2919 = vset.pattern.permute.xlu1 %v3030_v27  ;;  %v635_v63 = vperm.slane %v3316_v29, 0  ;;  %v3363_v29 = vrot.slane %v3175_v15, 2 }
  0xdb   : > { %959 = vperm.xlu2 %2918, %v3118_v5   ;;  %954 = vperm.xlu1 %2919, %v3109_v3   ;;  %v662_v5 = vld [vmem:[%s3203_s28 + $0x4] sm:$0x1]  ;;  %v774_v3 = vld [vmem:[%s3203_s28 + $0x7] sm:$0x1] }
  0xdc   : > { %v651_v32 = vmul.f32 %v635_v63, %v603_v23  ;;  %v763_v34 = vmul.f32 %v755_v26, %v635_v63 }
  0xe0   : > { %v3327_v33 = vpop.permute.xlu1 %586 }
  0xe2   : > { %v672_v39 = vpop.permute.xlu2 %671 }
  0xe3   : > { %v674_v40 = vperm.slane %v672_v39, 0  ;;  %969 = vperm.xlu2 %2918, %v3115_v4   ;;  %964 = vperm.xlu1 %2919, %v3106_v2   ;;  %v737_v4 = vld [vmem:[%s3203_s28 + $0x35] sm:$0x1] }
  0xe4   : > { %v745_v53 = vmul.f32 %v737_v4, %v569_v46 }
  0xe5   : > { %v710_v48 = vmul.f32 %v674_v40, %v662_v5  ;;  %v782_v45 = vmul.f32 %v774_v3, %v674_v40 }
  0xe6   : > { %v769_v56 = vadd.f32 %v761_v54, %v745_v53  ;;  %v544_v53 = vld [vmem:[%s3203_s28 + $0x22] sm:$0x1]  ;;  %v736_v54 = vld [vmem:[%s3203_s28 + $0x25] sm:$0x1] }
  0xe7   : > { %v718_v2 = vadd.f32 %v710_v48, %v654_v43  ;;  %v790_v51 = vadd.f32 %v782_v45, %v766_v44  ;;  %v3375_v43 = vpop.permute.xlu0 %1102  ;;  %v3382_v48 = vrot.slane %v3175_v15, 4  ;;  %v744_v63 = vmul.f32 %v736_v54, %v564_v52 }
  0xe8   : > { %v589_v54 = vperm.slane %v3327_v33, 0 }
  0xe9   : > { %726 = vst [vmem:[%s3230_s4 + $0x3] sm:$0x1] %v718_v2  ;;  %v3342_v55 = vpop.permute.xlu1 %617 }
  0xea   : > { %798 = vst [vmem:[%s3230_s4 + $0x6] sm:$0x1] %v790_v51  ;;  %v687_v59 = vpop.permute.xlu2 %686  ;;  %v620_v50 = vperm.slane %v3342_v55, 0  ;;  %v600_v51 = vld [vmem:[%s3203_s28 + $0x23] sm:$0x1]  ;;  %v592_v55 = vmul.f32 %v564_v52, %v544_v53 }
  0xeb   : > { %v689_v60 = vperm.slane %v687_v59, 0  ;;  %2920 = vset.pattern.permute.xlu2 %v3022_v0  ;;  %979 = vperm.xlu1 %2919, %v3123_v6   ;;  %v579_v6 = vperm.slane %v3286_v38, 0 }
  0xec   : > { %1097 = vperm.xlu2 %2920, %v3175_v15   ;;  %v760_v59 = vmul.f32 %v752_v62, %v620_v50 }
  0xed   : > { %v713_v18 = vmul.f32 %v689_v60, %v665_v57  ;;  %v785_v20 = vmul.f32 %v777_v58, %v689_v60  ;;  %v595_v38 = vmul.f32 %v579_v6, %v547_v30  ;;  %v747_v3 = vmul.f32 %v739_v24, %v579_v6  ;;  %v664_v60 = vld [vmem:[%s3203_s28 + $0x24] sm:$0x1]  ;;  %v602_v6 = vld [vmem:[%s3203_s28 + $0x43] sm:$0x1] }
  0xee   : > { %v3402_v57 = vrot.slane %v3175_v15, 7  ;;  %v648_v58 = vmul.f32 %v620_v50, %v600_v51  ;;  %v768_v26 = vadd.f32 %v760_v59, %v744_v63  ;;  %v574_v24 = vperm.slane %v3314_v28, 0  ;;  %v605_v51 = vld [vmem:[%s3203_s28 + $0x73] sm:$0x1]  ;;  %v669_v63 = vld [vmem:[%s3203_s28 + $0x74] sm:$0x1] }
  0xef   : > { %v721_v14 = vadd.f32 %v713_v18, %v657_v35  ;;  %v793_v1 = vadd.f32 %v785_v20, %v769_v56  ;;  %v659_v40 = vadd.f32 %v651_v32, %v595_v38  ;;  %v771_v46 = vadd.f32 %v763_v34, %v747_v3  ;;  %v3393_v2 = vpop.permute.xlu0 %1127  ;;  %v776_v35 = vld [vmem:[%s3203_s28 + $0x27] sm:$0x1]  ;;  %v754_v32 = vld [vmem:[%s3203_s28 + $0x46] sm:$0x1]  ;;  %v546_v34 = vld [vmem:[%s3203_s28 + $0x42] sm:$0x1] }
  0xf0   : > { %v656_v23 = vadd.f32 %v648_v58, %v592_v55  ;;  %v594_v3 = vmul.f32 %v574_v24, %v546_v34  ;;  %v757_v58 = vld [vmem:[%s3203_s28 + $0x76] sm:$0x1] }
  0xf1   : > { %729 = vst [vmem:[%s3230_s4 + $0x33] sm:$0x1] %v721_v14  ;;  %v3366_v36 = vpop.permute.xlu1 %627 }
  0xf2   : > { %801 = vst [vmem:[%s3230_s4 + $0x36] sm:$0x1] %v793_v1  ;;  %v697_v5 = vpop.permute.xlu2 %696  ;;  %v630_v25 = vperm.slane %v3366_v36, 0 }
  0xf3   : > { %v699_v39 = vperm.slane %v697_v5, 0  ;;  %2921 = vset.pattern.permute.xlu1 %v3022_v0 }
  0xf4   : > { %1112 = vperm.xlu2 %2920, %v3360_v31   ;;  %1107 = vperm.xlu1 %2921, %v3363_v29   ;;  %v650_v5 = vmul.f32 %v630_v25, %v602_v6  ;;  %v762_v38 = vmul.f32 %v754_v32, %v630_v25 }
  0xf5   : > { %v715_v41 = vmul.f32 %v699_v39, %v667_v37  ;;  %v787_v42 = vmul.f32 %v779_v11, %v699_v39  ;;  %v738_v11 = vld [vmem:[%s3203_s28 + $0x45] sm:$0x1]  ;;  %v666_v39 = vld [vmem:[%s3203_s28 + $0x44] sm:$0x1] }
  0xf7   : > { %v723_v44 = vadd.f32 %v715_v41, %v659_v40  ;;  %v795_v0 = vadd.f32 %v787_v42, %v771_v46  ;;  %v3413_v30 = vpop.permute.xlu0 %339  ;;  %v778_v40 = vld [vmem:[%s3203_s28 + $0x47] sm:$0x1]  ;;  %v746_v41 = vmul.f32 %v738_v11, %v574_v24 }
  0xf9   : > { %731 = vst [vmem:[%s3230_s4 + $0x53] sm:$0x1] %v723_v44  ;;  %v3385_v45 = vpop.permute.xlu1 %642  ;;  %v658_v44 = vadd.f32 %v650_v5, %v594_v3  ;;  %v770_v50 = vadd.f32 %v762_v38, %v746_v41  ;;  %v270_v5 = vld [vmem:[%s3203_s28 + $0x12] sm:$0x1]  ;;  %v342_v38 = vperm.slane %v3413_v30, 0  ;;  %v311_v41 = vperm.slane %v3352_v22, 0 }
  0xfa   : > { %803 = vst [vmem:[%s3230_s4 + $0x56] sm:$0x1] %v795_v0  ;;  %v645_v0 = vperm.slane %v3385_v45, 0  ;;  %v462_v3 = vld [vmem:[%s3203_s28 + $0x15] sm:$0x1]  ;;  %v318_v13 = vmul.f32 %v286_v10, %v270_v5 }
  0xfb   : > { %v3388_v4 = vpop.permute.xlu2 %824 }
  0xfc   : > { %1122 = vperm.xlu2 %2920, %v3379_v47   ;;  %1117 = vperm.xlu1 %2921, %v3382_v48   ;;  %v827_v22 = vperm.slane %v3388_v4, 0  ;;  %v502_v4 = vld [vmem:[%s3203_s28 + $0x17] sm:$0x1] }
  0xff   : > { %v3431_v53 = vpop.permute.xlu0 %364 }
 0x102   : > { %v682_v56 = vpop.permute.xlu1 %681 }
 0x103   : > { %v684_v18 = vperm.slane %v682_v56, 0  ;;  %v3406_v20 = vpop.permute.xlu2 %839  ;;  %v765_v56 = vmul.f32 %v757_v58, %v645_v0 }
 0x104   : > { %2923 = vset.pattern.permute.xlu2 %v3023_v7  ;;  %1132 = vperm.xlu1 %2921, %v3402_v57  }
 0x105   : > { %v712_v14 = vmul.f32 %v684_v18, %v664_v60  ;;  %v784_v1 = vmul.f32 %v776_v35, %v684_v18  ;;  %1153 = vperm.xlu2 %2923, %v3175_v15   ;;  %v741_v60 = vld [vmem:[%s3203_s28 + $0x75] sm:$0x1]  ;;  %v653_v35 = vmul.f32 %v645_v0, %v605_v51  ;;  %v781_v18 = vld [vmem:[%s3203_s28 + $0x77] sm:$0x1]  ;;  %v470_v0 = vmul.f32 %v462_v3, %v286_v10  ;;  %v395_v3 = vld [vmem:[%s3203_s28 + $0x64] sm:$0x1] }
 0x107   : > { %v720_v36 = vadd.f32 %v712_v14, %v656_v23  ;;  %v792_v37 = vadd.f32 %v784_v1, %v768_v26  ;;  %v749_v23 = vmul.f32 %v741_v60, %v589_v54  ;;  %v3444_v24 = vpop.permute.xlu0 %1158  ;;  %v871_v60 = vld [vmem:[%s3203_s28 + $0x3] sm:$0x1] }
 0x109   : > { %728 = vst [vmem:[%s3230_s4 + $0x23] sm:$0x1] %v720_v36  ;;  %v773_v14 = vadd.f32 %v765_v56, %v749_v23 }
 0x10a   : > { %800 = vst [vmem:[%s3230_s4 + $0x26] sm:$0x1] %v792_v37  ;;  %v692_v46 = vpop.permute.xlu1 %691 }
 0x10b   : > { %v694_v28 = vperm.slane %v692_v46, 0  ;;  %v3424_v42 = vpop.permute.xlu2 %849 }
 0x10c   : > { %2924 = vset.pattern.permute.xlu1 %v3023_v7  ;;  %v549_v7 = vld [vmem:[%s3203_s28 + $0x72] sm:$0x1] }
 0x10d   : > { %v714_v62 = vmul.f32 %v694_v28, %v666_v39  ;;  %v786_v52 = vmul.f32 %v778_v40, %v694_v28  ;;  %1168 = vperm.xlu2 %2923, %v3360_v31   ;;  %1163 = vperm.xlu1 %2924, %v3363_v29   ;;  %v597_v55 = vmul.f32 %v589_v54, %v549_v7  ;;  %v326_v39 = vld [vmem:[%s3203_s28 + $0x13] sm:$0x1]  ;;  %v478_v40 = vld [vmem:[%s3203_s28 + $0x16] sm:$0x1]  ;;  %v367_v54 = vperm.slane %v3431_v53, 0 }
 0x10e   : > { %v486_v30 = vmul.f32 %v478_v40, %v342_v38  ;;  %v331_v7 = vld [vmem:[%s3203_s28 + $0x63] sm:$0x1] }
 0x10f   : > { %v722_v45 = vadd.f32 %v714_v62, %v658_v44  ;;  %v794_v59 = vadd.f32 %v786_v52, %v770_v50  ;;  %v661_v33 = vadd.f32 %v653_v35, %v597_v55  ;;  %v3456_v11 = vpop.permute.xlu0 %1183  ;;  %v815_v44 = vld [vmem:[%s3203_s28 + $0x2] sm:$0x1]  ;;  %v374_v50 = vmul.f32 %v342_v38, %v326_v39  ;;  %v1007_v62 = vld [vmem:[%s3203_s28 + $0x5] sm:$0x1]  ;;  %v1023_v35 = vld [vmem:[%s3203_s28 + $0x6] sm:$0x1] }
 0x110   : > { %v467_v52 = vld [vmem:[%s3203_s28 + $0x65] sm:$0x1]  ;;  %v494_v55 = vadd.f32 %v486_v30, %v470_v0  ;;  %v1015_v23 = vmul.f32 %v1007_v62, %v827_v22  ;;  %v507_v39 = vld [vmem:[%s3203_s28 + $0x67] sm:$0x1]  ;;  %v818_v62 = vld [vmem:[%s3203_s28 + $0x32] sm:$0x1] }
 0x111   : > { %730 = vst [vmem:[%s3230_s4 + $0x43] sm:$0x1] %v722_v45  ;;  %v483_v45 = vld [vmem:[%s3203_s28 + $0x66] sm:$0x1]  ;;  %v382_v56 = vadd.f32 %v374_v50, %v318_v13 }
 0x112   : > { %802 = vst [vmem:[%s3230_s4 + $0x46] sm:$0x1] %v794_v59  ;;  %v707_v25 = vpop.permute.xlu1 %706  ;;  %v323_v59 = vmul.f32 %v311_v41, %v275_v49  ;;  %v491_v53 = vmul.f32 %v483_v45, %v367_v54  ;;  %v1026_v45 = vld [vmem:[%s3203_s28 + $0x36] sm:$0x1] }
 0x113   : > { %v709_v26 = vperm.slane %v707_v25, 0  ;;  %v863_v25 = vmul.f32 %v827_v22, %v815_v44  ;;  %v874_v22 = vld [vmem:[%s3203_s28 + $0x33] sm:$0x1] }
 0x114   : > { %v881_v6 = vpop.permute.xlu2 %880 }
 0x115   : > { %v717_v19 = vmul.f32 %v709_v26, %v669_v63  ;;  %v789_v1 = vmul.f32 %v781_v18, %v709_v26  ;;  %1178 = vperm.xlu2 %2923, %v3379_v47   ;;  %1173 = vperm.xlu1 %2924, %v3382_v48   ;;  %v883_v58 = vperm.slane %v881_v6, 0  ;;  %v390_v63 = vld [vmem:[%s3203_s28 + $0x14] sm:$0x1]  ;;  %v379_v26 = vmul.f32 %v367_v54, %v331_v7  ;;  %v1010_v7 = vld [vmem:[%s3203_s28 + $0x35] sm:$0x1] }
 0x117   : > { %v725_v32 = vadd.f32 %v717_v19, %v661_v33  ;;  %v797_v34 = vadd.f32 %v789_v1, %v773_v14  ;;  %v404_v51 = vpop.permute.xlu0 %403  ;;  %v919_v33 = vmul.f32 %v883_v58, %v871_v60  ;;  %v1031_v6 = vmul.f32 %v1023_v35, %v883_v58 }
 0x118   : > { %v406_v18 = vperm.slane %v404_v51, 0  ;;  %v387_v44 = vadd.f32 %v379_v26, %v323_v59 }
 0x119   : > { %733 = vst [vmem:[%s3230_s4 + $0x73] sm:$0x1] %v725_v32  ;;  %v935_v32 = vld [vmem:[%s3203_s28 + $0x4] sm:$0x1]  ;;  %v927_v49 = vadd.f32 %v919_v33, %v863_v25  ;;  %v1039_v50 = vadd.f32 %v1031_v6, %v1015_v23  ;;  %v1050_v25 = vld [vmem:[%s3203_s28 + $0x37] sm:$0x1] }
 0x11a   : > { %805 = vst [vmem:[%s3230_s4 + $0x76] sm:$0x1] %v797_v34  ;;  %v438_v19 = vmul.f32 %v406_v18, %v390_v63  ;;  %v510_v1 = vmul.f32 %v502_v4, %v406_v18  ;;  %v1047_v34 = vld [vmem:[%s3203_s28 + $0x7] sm:$0x1]  ;;  %v938_v18 = vld [vmem:[%s3203_s28 + $0x34] sm:$0x1] }
 0x11b   : > { %v3450_v36 = vpop.permute.xlu1 %834 }
 0x11c   : > { %v3452_v37 = vpop.permute.xlu2 %895  ;;  %v446_v10 = vadd.f32 %v438_v19, %v382_v56  ;;  %v518_v38 = vadd.f32 %v510_v1, %v494_v55 }
 0x11d   : > { %2926 = vset.pattern.permute.xlu2 %v3024_v8  ;;  %1188 = vperm.xlu1 %2924, %v3402_v57   ;;  %v898_v30 = vperm.slane %v3452_v37, 0 }
 0x11e   : > { %1217 = vperm.xlu2 %2926, %v3175_v15   ;;  %454 = vst [vmem:[%s3230_s4 + $0x12] sm:$0x1] %v446_v10  ;;  %v852_v10 = vperm.slane %v3424_v42, 0 }
 0x11f   : > { %v429_v40 = vpop.permute.xlu0 %428  ;;  %526 = vst [vmem:[%s3230_s4 + $0x15] sm:$0x1] %v518_v38  ;;  %v1034_v63 = vmul.f32 %v1026_v45, %v898_v30 }
 0x120   : > { %v431_v0 = vperm.slane %v429_v40, 0  ;;  %v1012_v40 = vld [vmem:[%s3203_s28 + $0x55] sm:$0x1] }
 0x122   : > { %v443_v54 = vmul.f32 %v431_v0, %v395_v3  ;;  %v515_v58 = vmul.f32 %v507_v39, %v431_v0  ;;  %v820_v39 = vld [vmem:[%s3203_s28 + $0x52] sm:$0x1] }
 0x123   : > { %v3466_v46 = vpop.permute.xlu1 %844  ;;  %v868_v42 = vmul.f32 %v852_v10, %v820_v39 }
 0x124   : > { %v3469_v28 = vpop.permute.xlu2 %905  ;;  %v451_v35 = vadd.f32 %v443_v54, %v387_v44 }
 0x125   : > { %2927 = vset.pattern.permute.xlu1 %v3024_v8  ;;  %v475_v8 = vmul.f32 %v467_v52, %v311_v41  ;;  %v842_v41 = vperm.slane %v3406_v20, 0  ;;  %v908_v19 = vperm.slane %v3469_v28, 0  ;;  %v940_v28 = vld [vmem:[%s3203_s28 + $0x54] sm:$0x1] }
 0x126   : > { %1232 = vperm.xlu2 %2926, %v3360_v31   ;;  %1227 = vperm.xlu1 %2927, %v3363_v29   ;;  %459 = vst [vmem:[%s3230_s4 + $0x62] sm:$0x1] %v451_v35  ;;  %v873_v35 = vld [vmem:[%s3203_s28 + $0x23] sm:$0x1] }
 0x127   : > { %v499_v51 = vadd.f32 %v491_v53, %v475_v8  ;;  %v866_v37 = vmul.f32 %v842_v41, %v818_v62  ;;  %v922_v8 = vmul.f32 %v898_v30, %v874_v22  ;;  %v1018_v55 = vmul.f32 %v1010_v7, %v842_v41  ;;  %v3508_v26 = vpop.permute.xlu0 %1222 }
 0x129   : > { %v523_v56 = vadd.f32 %v515_v58, %v499_v51  ;;  %v930_v33 = vadd.f32 %v922_v8, %v866_v37  ;;  %v1042_v6 = vadd.f32 %v1034_v63, %v1018_v55  ;;  %v3534_v58 = vld [vmem:[%s3168_s23] sm:$0xff]  ;;  %v837_v8 = vperm.slane %v3450_v36, 0 }
 0x12a   : > { %v3537_v7 = vrot.slane %v3534_v58, 6  ;;  %v1025_v37 = vld [vmem:[%s3203_s28 + $0x26] sm:$0x1]  ;;  %v1009_v55 = vld [vmem:[%s3203_s28 + $0x25] sm:$0x1] }
 0x12b   : > { %v3486_v14 = vpop.permute.xlu1 %859  ;;  %531 = vst [vmem:[%s3230_s4 + $0x65] sm:$0x1] %v523_v56  ;;  %v817_v56 = vld [vmem:[%s3203_s28 + $0x22] sm:$0x1] }
 0x12c   : > { %1456 = vperm.xlu0 %2934, %v3537_v7   ;;  %v2995_v63 = vld [vmem:[%s3100_s20] sm:$0xff] }
 0x12d   : > { %v945_v5 = vpop.permute.xlu2 %944 }
 0x12e   : > { %v947_v13 = vperm.slane %v945_v5, 0  ;;  %1242 = vperm.xlu2 %2926, %v3379_v47   ;;  %1237 = vperm.xlu1 %2927, %v3382_v48   ;;  %v1028_v5 = vld [vmem:[%s3203_s28 + $0x56] sm:$0x1] }
 0x12f   : > { %v1036_v44 = vmul.f32 %v1028_v5, %v908_v19 }
 0x130   : > { %v983_v52 = vmul.f32 %v947_v13, %v935_v32  ;;  %v1055_v20 = vmul.f32 %v1047_v34, %v947_v13  ;;  %v876_v34 = vld [vmem:[%s3203_s28 + $0x53] sm:$0x1]  ;;  %v1052_v13 = vld [vmem:[%s3203_s28 + $0x57] sm:$0x1] }
 0x131   : > { %v924_v41 = vmul.f32 %v908_v19, %v876_v34  ;;  %v1017_v19 = vmul.f32 %v1009_v55, %v837_v8 }
 0x132   : > { %v991_v59 = vadd.f32 %v983_v52, %v927_v49  ;;  %v1063_v60 = vadd.f32 %v1055_v20, %v1039_v50  ;;  %v3528_v49 = vpop.permute.xlu0 %1247  ;;  %v1020_v50 = vmul.f32 %v1012_v40, %v852_v10  ;;  %v847_v40 = vperm.slane %v3466_v46, 0 }
 0x133   : > { %v932_v51 = vadd.f32 %v924_v41, %v868_v42  ;;  %v1027_v41 = vld [vmem:[%s3203_s28 + $0x46] sm:$0x1]  ;;  %v3576_v42 = vrot.slane %v2995_v63, 6 }
 0x134   : > { %999 = vst [vmem:[%s3230_s4 + $0x4] sm:$0x1] %v991_v59  ;;  %v3503_v4 = vpop.permute.xlu1 %890  ;;  %v1044_v62 = vadd.f32 %v1036_v44, %v1020_v50  ;;  %2937 = vset.pattern.permute.xlu0 %v3028_v61  ;;  %v819_v44 = vld [vmem:[%s3203_s28 + $0x42] sm:$0x1] }
 0x135   : > { %1071 = vst [vmem:[%s3230_s4 + $0x7] sm:$0x1] %v1063_v60  ;;  %v960_v23 = vpop.permute.xlu2 %959  ;;  %v893_v60 = vperm.slane %v3503_v4, 0  ;;  %v865_v4 = vmul.f32 %v837_v8, %v817_v56  ;;  %v878_v8 = vld [vmem:[%s3203_s28 + $0x73] sm:$0x1] }
 0x136   : > { %v962_v53 = vperm.slane %v960_v23, 0  ;;  %2929 = vset.pattern.permute.xlu2 %v3025_v9  ;;  %1252 = vperm.xlu1 %2927, %v3402_v57  }
 0x137   : > { %1281 = vperm.xlu2 %2929, %v3175_v15   ;;  %v1033_v23 = vmul.f32 %v1025_v37, %v893_v60 }
 0x138   : > { %v986_v1 = vmul.f32 %v962_v53, %v938_v18  ;;  %v1058_v32 = vmul.f32 %v1050_v25, %v962_v53  ;;  %v3557_v18 = vrot.slane %v2995_v63, 1  ;;  %v921_v25 = vmul.f32 %v893_v60, %v873_v35  ;;  %v937_v53 = vld [vmem:[%s3203_s28 + $0x24] sm:$0x1] }
 0x139   : > { %v1041_v10 = vadd.f32 %v1033_v23, %v1017_v19  ;;  %v862_v63 = vperm.slane %v3486_v14, 0  ;;  %v822_v23 = vld [vmem:[%s3203_s28 + $0x72] sm:$0x1]  ;;  %v942_v19 = vld [vmem:[%s3203_s28 + $0x74] sm:$0x1] }
 0x13a   : > { %v994_v38 = vadd.f32 %v986_v1, %v930_v33  ;;  %v1066_v3 = vadd.f32 %v1058_v32, %v1042_v6  ;;  %v3546_v59 = vpop.permute.xlu0 %556  ;;  %v1049_v33 = vld [vmem:[%s3203_s28 + $0x27] sm:$0x1]  ;;  %829 = vperm.xlu0 %2937, %v3557_v18   ;;  %v929_v5 = vadd.f32 %v921_v25, %v865_v4  ;;  %v1030_v25 = vld [vmem:[%s3203_s28 + $0x76] sm:$0x1] }
 0x13b   : > { %v870_v4 = vmul.f32 %v862_v63, %v822_v23  ;;  %v1273_v23 = vld [vmem:[%s3203_s28 + $0x1b] sm:$0x1] }
 0x13c   : > { %1002 = vst [vmem:[%s3230_s4 + $0x34] sm:$0x1] %v994_v38  ;;  %v3522_v15 = vpop.permute.xlu1 %900  ;;  %v875_v38 = vld [vmem:[%s3203_s28 + $0x43] sm:$0x1] }
 0x13d   : > { %1074 = vst [vmem:[%s3230_s4 + $0x37] sm:$0x1] %v1066_v3  ;;  %v970_v0 = vpop.permute.xlu2 %969  ;;  %v903_v34 = vperm.slane %v3522_v15, 0 }
 0x13e   : > { %v972_v30 = vperm.slane %v970_v0, 0  ;;  %2930 = vset.pattern.permute.xlu1 %v3025_v9 }
 0x13f   : > { %1296 = vperm.xlu2 %2929, %v3360_v31   ;;  %1291 = vperm.xlu1 %2930, %v3363_v29   ;;  %v923_v0 = vmul.f32 %v903_v34, %v875_v38  ;;  %v1035_v50 = vmul.f32 %v1027_v41, %v903_v34 }
 0x140   : > { %v988_v22 = vmul.f32 %v972_v30, %v940_v28  ;;  %v1060_v52 = vmul.f32 %v1052_v13, %v972_v30  ;;  %v1011_v13 = vld [vmem:[%s3203_s28 + $0x45] sm:$0x1]  ;;  %v867_v30 = vmul.f32 %v847_v40, %v819_v44 }
 0x141   : > { %v1019_v46 = vmul.f32 %v1011_v13, %v847_v40 }
 0x142   : > { %v996_v20 = vadd.f32 %v988_v22, %v932_v51  ;;  %v1068_v54 = vadd.f32 %v1060_v52, %v1044_v62  ;;  %v3565_v32 = vpop.permute.xlu0 %581  ;;  %v939_v51 = vld [vmem:[%s3203_s28 + $0x44] sm:$0x1]  ;;  %v1051_v62 = vld [vmem:[%s3203_s28 + $0x47] sm:$0x1]  ;;  %854 = vperm.xlu0 %2937, %v3576_v42   ;;  %v931_v60 = vadd.f32 %v923_v0, %v867_v30  ;;  %v1161_v30 = vperm.slane %v3444_v24, 0 }
 0x143   : > { %v1043_v37 = vadd.f32 %v1035_v50, %v1019_v46  ;;  %v1105_v50 = vperm.slane %v3375_v43, 0  ;;  %v1130_v24 = vperm.slane %v3393_v2, 0 }
 0x144   : > { %1004 = vst [vmem:[%s3230_s4 + $0x54] sm:$0x1] %v996_v20  ;;  %v3540_v9 = vpop.permute.xlu1 %915 }
 0x145   : > { %1076 = vst [vmem:[%s3230_s4 + $0x57] sm:$0x1] %v1068_v54  ;;  %v918_v35 = vperm.slane %v3540_v9, 0 }
 0x146   : > { %v3544_v45 = vpop.permute.xlu2 %1097 }
 0x147   : > { %1306 = vperm.xlu2 %2929, %v3379_v47   ;;  %1301 = vperm.xlu1 %2930, %v3382_v48  }
 0x14a   : > { %v3585_v54 = vpop.permute.xlu0 %1286  ;;  %1487 = vperm.xlu0 %2937, %v3178_v16  }
 0x14d   : > { %v955_v6 = vpop.permute.xlu1 %954 }
 0x14e   : > { %v957_v36 = vperm.slane %v955_v6, 0  ;;  %v3563_v1 = vpop.permute.xlu2 %1112  ;;  %v926_v6 = vmul.f32 %v918_v35, %v878_v8 }
 0x14f   : > { %2932 = vset.pattern.permute.xlu2 %v3026_v12  ;;  %1316 = vperm.xlu1 %2930, %v3402_v57  }
 0x150   : > { %v985_v3 = vmul.f32 %v957_v36, %v937_v53  ;;  %v1057_v39 = vmul.f32 %v1049_v33, %v957_v36  ;;  %1345 = vperm.xlu2 %2932, %v3534_v58   ;;  %v1014_v33 = vld [vmem:[%s3203_s28 + $0x75] sm:$0x1]  ;;  %v1054_v36 = vld [vmem:[%s3203_s28 + $0x77] sm:$0x1]  ;;  %v934_v38 = vadd.f32 %v926_v6, %v870_v4 }
 0x152   : > { %v993_v15 = vadd.f32 %v985_v3, %v929_v5  ;;  %v1065_v28 = vadd.f32 %v1057_v39, %v1041_v10  ;;  %v1022_v5 = vmul.f32 %v1014_v33, %v862_v63  ;;  %v3601_v14 = vpop.permute.xlu0 %1311  ;;  %1512 = vperm.xlu0 %2937, %v3537_v7   ;;  %v1214_v33 = vld [vmem:[%s3203_s28 + $0x6a] sm:$0x1] }
 0x154   : > { %1001 = vst [vmem:[%s3230_s4 + $0x24] sm:$0x1] %v993_v15 }
 0x155   : > { %1073 = vst [vmem:[%s3230_s4 + $0x27] sm:$0x1] %v1065_v28  ;;  %v965_v22 = vpop.permute.xlu1 %964 }
 0x156   : > { %v967_v52 = vperm.slane %v965_v22, 0  ;;  %v3583_v20 = vpop.permute.xlu2 %1122 }
 0x157   : > { %2933 = vset.pattern.permute.xlu1 %v3026_v12  ;;  %v1038_v12 = vmul.f32 %v1030_v25, %v918_v35  ;;  %v1289_v25 = vperm.slane %v3585_v54, 0 }
 0x158   : > { %v987_v56 = vmul.f32 %v967_v52, %v939_v51  ;;  %v1059_v55 = vmul.f32 %v1051_v62, %v967_v52  ;;  %1360 = vperm.xlu2 %2932, %v3360_v31   ;;  %1355 = vperm.xlu1 %2933, %v3363_v29   ;;  %v1089_v51 = vld [vmem:[%s3203_s28 + $0x18] sm:$0x1]  ;;  %v1145_v62 = vld [vmem:[%s3203_s28 + $0x19] sm:$0x1]  ;;  %v1225_v52 = vperm.slane %v3508_v26, 0 }
 0x159   : > { %v1046_v39 = vadd.f32 %v1038_v12, %v1022_v5  ;;  %v1137_v22 = vmul.f32 %v1105_v50, %v1089_v51  ;;  %v1193_v46 = vmul.f32 %v1161_v30, %v1145_v62  ;;  %v1094_v26 = vld [vmem:[%s3203_s28 + $0x68] sm:$0x1]  ;;  %v1342_v50 = vld [vmem:[%s3203_s28 + $0x6c] sm:$0x1] }
 0x15a   : > { %v995_v53 = vadd.f32 %v987_v56, %v931_v60  ;;  %v1067_v9 = vadd.f32 %v1059_v55, %v1043_v37  ;;  %v3616_v0 = vpop.permute.xlu0 %612  ;;  %2940 = vset.pattern.permute.xlu0 %v3029_v17  ;;  %v1209_v60 = vld [vmem:[%s3203_s28 + $0x1a] sm:$0x1]  ;;  %v1186_v37 = vperm.slane %v3456_v11, 0  ;;  %v1150_v55 = vld [vmem:[%s3203_s28 + $0x69] sm:$0x1]  ;;  %v1142_v2 = vmul.f32 %v1130_v24, %v1094_v26 }
 0x15b   : > { %885 = vperm.xlu0 %2940, %v3557_v18   ;;  %v1201_v56 = vadd.f32 %v1193_v46, %v1137_v22  ;;  %v1257_v63 = vmul.f32 %v1225_v52, %v1209_v60  ;;  %v615_v26 = vperm.slane %v3616_v0, 0  ;;  %v584_v0 = vperm.slane %v3565_v32, 0 }
 0x15c   : > { %1003 = vst [vmem:[%s3230_s4 + $0x44] sm:$0x1] %v995_v53  ;;  %v1198_v53 = vmul.f32 %v1186_v37, %v1150_v55  ;;  %v599_v55 = vld [vmem:[%s3203_s28 + $0x13] sm:$0x1] }
 0x15d   : > { %1075 = vst [vmem:[%s3230_s4 + $0x47] sm:$0x1] %v1067_v9  ;;  %v980_v34 = vpop.permute.xlu1 %979  ;;  %v1265_v11 = vadd.f32 %v1257_v63, %v1201_v56  ;;  %v1321_v9 = vmul.f32 %v1289_v25, %v1273_v23  ;;  %v543_v56 = vld [vmem:[%s3203_s28 + $0x12] sm:$0x1]  ;;  %v735_v25 = vld [vmem:[%s3203_s28 + $0x15] sm:$0x1] }
 0x15e   : > { %v982_v10 = vperm.slane %v980_v34, 0  ;;  %v1206_v12 = vadd.f32 %v1198_v53, %v1142_v2  ;;  %v751_v23 = vld [vmem:[%s3203_s28 + $0x16] sm:$0x1]  ;;  %v1088_v2 = vld [vmem:[%s3203_s28 + $0x8] sm:$0x1] }
 0x15f   : > { %v3603_v3 = vpop.permute.xlu2 %1153  ;;  %v1329_v34 = vadd.f32 %v1321_v9, %v1265_v11  ;;  %v1144_v53 = vld [vmem:[%s3203_s28 + $0x9] sm:$0x1] }
 0x160   : > { %v990_v40 = vmul.f32 %v982_v10, %v942_v19  ;;  %v1062_v41 = vmul.f32 %v1054_v36, %v982_v10  ;;  %1370 = vperm.xlu2 %2932, %v3379_v47   ;;  %1365 = vperm.xlu1 %2933, %v3382_v48   ;;  %v1337_v19 = vld [vmem:[%s3203_s28 + $0x1c] sm:$0x1]  ;;  %v1278_v10 = vld [vmem:[%s3203_s28 + $0x6b] sm:$0x1]  ;;  %v1156_v63 = vperm.slane %v3603_v3, 0 }
 0x161   : > { %v548_v3 = vld [vmem:[%s3203_s28 + $0x62] sm:$0x1] }
 0x162   : > { %v998_v44 = vadd.f32 %v990_v40, %v934_v38  ;;  %v1070_v15 = vadd.f32 %v1062_v41, %v1046_v39  ;;  %v3634_v8 = vpop.permute.xlu0 %637  ;;  %v1192_v32 = vmul.f32 %v1156_v63, %v1144_v53  ;;  %v1091_v63 = vld [vmem:[%s3203_s28 + $0x38] sm:$0x1] }
 0x163   : > { %910 = vperm.xlu0 %2940, %v3576_v42  }
 0x164   : > { %1006 = vst [vmem:[%s3230_s4 + $0x74] sm:$0x1] %v998_v44 }
 0x165   : > { %1078 = vst [vmem:[%s3230_s4 + $0x77] sm:$0x1] %v1070_v15 }
 0x166   : > { %v3610_v28 = vpop.permute.xlu1 %1107 }
 0x167   : > { %v3612_v13 = vpop.permute.xlu2 %1168 }
 0x168   : > { %2935 = vset.pattern.permute.xlu2 %v3027_v21  ;;  %1380 = vperm.xlu1 %2933, %v3402_v57  }
 0x169   : > { %1426 = vperm.xlu2 %2935, %v3534_v58  }
 0x16a   : > { %v1351_v36 = vpop.permute.xlu0 %1350 }
 0x16b   : > { %v1353_v5 = vperm.slane %v1351_v36, 0  ;;  %1551 = vperm.xlu0 %2940, %v3178_v16  }
 0x16d   : > { %v1385_v38 = vmul.f32 %v1353_v5, %v1337_v19  ;;  %v640_v19 = vperm.slane %v3634_v8, 0  ;;  %v740_v5 = vld [vmem:[%s3203_s28 + $0x65] sm:$0x1] }
 0x16e   : > { %v3626_v35 = vpop.permute.xlu1 %1117 }
 0x16f   : > { %v3629_v43 = vpop.permute.xlu2 %1178  ;;  %v1393_v41 = vadd.f32 %v1385_v38, %v1329_v34  ;;  %v1208_v34 = vld [vmem:[%s3203_s28 + $0xa] sm:$0x1]  ;;  %v596_v38 = vmul.f32 %v584_v0, %v548_v3 }
 0x170   : > { %2936 = vset.pattern.permute.xlu1 %v3027_v21  ;;  %v1250_v21 = vperm.slane %v3528_v49, 0  ;;  %v1314_v49 = vperm.slane %v3601_v14, 0 }
 0x171   : > { %1441 = vperm.xlu2 %2935, %v3360_v31   ;;  %1436 = vperm.xlu1 %2936, %v3363_v29   ;;  %1401 = vst [vmem:[%s3230_s4 + $0x18] sm:$0x1] %v1393_v41 }
 0x172   : > { %v1262_v54 = vmul.f32 %v1250_v21, %v1214_v33  ;;  %v1326_v40 = vmul.f32 %v1314_v49, %v1278_v10  ;;  %v1376_v30 = vpop.permute.xlu0 %1375  ;;  %v647_v21 = vmul.f32 %v615_v26, %v599_v55  ;;  %v604_v49 = vld [vmem:[%s3203_s28 + $0x63] sm:$0x1]  ;;  %v756_v10 = vld [vmem:[%s3203_s28 + $0x66] sm:$0x1] }
 0x173   : > { %v1378_v14 = vperm.slane %v1376_v30, 0  ;;  %1576 = vperm.xlu0 %2940, %v3537_v7   ;;  %v652_v41 = vmul.f32 %v640_v19, %v604_v49  ;;  %v775_v30 = vld [vmem:[%s3203_s28 + $0x17] sm:$0x1] }
 0x174   : > { %v1270_v39 = vadd.f32 %v1262_v54, %v1206_v12  ;;  %v759_v12 = vmul.f32 %v751_v23, %v615_v26 }
 0x175   : > { %v1390_v62 = vmul.f32 %v1378_v14, %v1342_v50  ;;  %v663_v50 = vld [vmem:[%s3203_s28 + $0x14] sm:$0x1]  ;;  %v1115_v14 = vperm.slane %v3563_v1, 0  ;;  %v1336_v1 = vld [vmem:[%s3203_s28 + $0xc] sm:$0x1] }
 0x176   : > { %v3644_v6 = vpop.permute.xlu1 %1132  ;;  %v1334_v51 = vadd.f32 %v1326_v40, %v1270_v39  ;;  %v1272_v40 = vld [vmem:[%s3203_s28 + $0xb] sm:$0x1] }
 0x178   : > { %v3647_v4 = vpop.permute.xlu2 %1217  ;;  %v1398_v22 = vadd.f32 %v1390_v62, %v1334_v51 }
 0x179   : > { %1451 = vperm.xlu2 %2935, %v3379_v47   ;;  %1446 = vperm.xlu1 %2936, %v3382_v48   ;;  %v1220_v33 = vperm.slane %v3647_v4, 0 }
 0x17a   : > { %1406 = vst [vmem:[%s3230_s4 + $0x68] sm:$0x1] %v1398_v22  ;;  %v677_v36 = vpop.permute.xlu0 %676  ;;  %v748_v22 = vmul.f32 %v740_v5, %v584_v0 }
 0x17b   : > { %2943 = vset.pattern.permute.xlu0 %v3030_v27  ;;  %v1256_v8 = vmul.f32 %v1220_v33, %v1208_v34  ;;  %v679_v51 = vperm.slane %v677_v36, 0  ;;  %v1139_v36 = vmul.f32 %v1115_v14, %v1091_v63  ;;  %v1339_v14 = vld [vmem:[%s3203_s28 + $0x3c] sm:$0x1] }
 0x17c   : > { %949 = vperm.xlu0 %2943, %v3557_v18   ;;  %v559_v18 = vperm.slane %v3546_v59, 0 }
 0x17d   : > { %v711_v55 = vmul.f32 %v679_v51, %v663_v50 }
 0x17e   : > { %v591_v59 = vmul.f32 %v559_v18, %v543_v56 }
 0x17f   : > { %v3655_v44 = vpop.permute.xlu1 %1163 }
 0x180   : > { %v3658_v15 = vpop.permute.xlu2 %1232  ;;  %v655_v39 = vadd.f32 %v647_v21, %v591_v59  ;;  %v668_v21 = vld [vmem:[%s3203_s28 + $0x64] sm:$0x1] }
 0x181   : > { %2938 = vset.pattern.permute.xlu2 %v3028_v61  ;;  %1461 = vperm.xlu1 %2936, %v3402_v57  }
 0x182   : > { %1482 = vperm.xlu2 %2938, %v3534_v58   ;;  %v719_v59 = vadd.f32 %v711_v55, %v655_v39  ;;  %v702_v3 = vpop.permute.xlu0 %701  ;;  %v1213_v55 = vld [vmem:[%s3203_s28 + $0x5a] sm:$0x1] }
 0x184   : > { %974 = vperm.xlu0 %2943, %v3576_v42   ;;  %v1100_v42 = vperm.slane %v3544_v45, 0  ;;  %v743_v45 = vmul.f32 %v735_v25, %v559_v18  ;;  %v764_v18 = vmul.f32 %v756_v10, %v640_v19  ;;  %v1147_v25 = vld [vmem:[%s3203_s28 + $0x39] sm:$0x1]  ;;  %v704_v19 = vperm.slane %v702_v3, 0  ;;  %727 = vst [vmem:[%s3230_s4 + $0x13] sm:$0x1] %v719_v59 }
 0x186   : > { %v1136_v54 = vmul.f32 %v1100_v42, %v1088_v2  ;;  %v783_v42 = vmul.f32 %v775_v30, %v679_v51  ;;  %v660_v2 = vadd.f32 %v652_v41, %v596_v38  ;;  %v772_v33 = vadd.f32 %v764_v18, %v748_v22  ;;  %v1149_v51 = vld [vmem:[%s3203_s28 + $0x59] sm:$0x1] }
 0x187   : > { %v3665_v46 = vpop.permute.xlu1 %1173  ;;  %v1125_v18 = vperm.slane %v3583_v20, 0 }
 0x188   : > { %v3668_v52 = vpop.permute.xlu2 %1242  ;;  %v1200_v62 = vadd.f32 %v1192_v32, %v1136_v54  ;;  %v1211_v32 = vld [vmem:[%s3203_s28 + $0x3a] sm:$0x1] }
 0x189   : > { %2939 = vset.pattern.permute.xlu1 %v3028_v61 }
 0x18a   : > { %1497 = vperm.xlu2 %2938, %v3360_v31   ;;  %1492 = vperm.xlu1 %2939, %v3363_v29   ;;  %v1264_v23 = vadd.f32 %v1256_v8, %v1200_v62  ;;  %v3743_v22 = vpop.permute.xlu0 %1431 }
 0x18c   : > { %1615 = vperm.xlu0 %2943, %v3178_v16  }
 0x18f   : > { %v3674_v60 = vpop.permute.xlu1 %1188 }
 0x191   : > { %v1282_v24 = vpop.permute.xlu2 %1281 }
 0x192   : > { %1507 = vperm.xlu2 %2938, %v3379_v47   ;;  %1502 = vperm.xlu1 %2939, %v3382_v48   ;;  %v1284_v4 = vperm.slane %v1282_v24, 0  ;;  %v1171_v24 = vperm.slane %v3612_v13, 0  ;;  %v1235_v13 = vperm.slane %v3658_v15, 0  ;;  %v716_v15 = vmul.f32 %v704_v19, %v668_v21  ;;  %v1341_v21 = vld [vmem:[%s3203_s28 + $0x5c] sm:$0x1] }
 0x194   : > { %1640 = vperm.xlu0 %2943, %v3537_v7   ;;  %v1320_v26 = vmul.f32 %v1284_v4, %v1272_v40  ;;  %v1195_v54 = vmul.f32 %v1171_v24, %v1147_v25  ;;  %v1275_v4 = vld [vmem:[%s3203_s28 + $0x3b] sm:$0x1]  ;;  %v1259_v38 = vmul.f32 %v1235_v13, %v1211_v32  ;;  %v724_v40 = vadd.f32 %v716_v15, %v660_v2  ;;  %v1210_v15 = vld [vmem:[%s3203_s28 + $0x2a] sm:$0x1] }
 0x195   : > { %v1245_v24 = vperm.slane %v3668_v52, 0 }
 0x196   : > { %v1328_v34 = vadd.f32 %v1320_v26, %v1264_v23  ;;  %v1203_v41 = vadd.f32 %v1195_v54, %v1139_v36  ;;  %732 = vst [vmem:[%s3230_s4 + $0x63] sm:$0x1] %v724_v40  ;;  %v1277_v23 = vld [vmem:[%s3203_s28 + $0x5b] sm:$0x1]  ;;  %v1146_v54 = vld [vmem:[%s3203_s28 + $0x29] sm:$0x1] }
 0x197   : > { %v1261_v52 = vmul.f32 %v1245_v24, %v1213_v55 }
 0x198   : > { %v3680_v61 = vpop.permute.xlu1 %1227 }
 0x199   : > { %v3682_v37 = vpop.permute.xlu2 %1296 }
 0x19a   : > { %2941 = vset.pattern.permute.xlu2 %v3029_v17  ;;  %1517 = vperm.xlu1 %2939, %v3402_v57   ;;  %v1299_v49 = vperm.slane %v3682_v37, 0  ;;  %v1181_v37 = vperm.slane %v3629_v43, 0  ;;  %v1093_v43 = vld [vmem:[%s3203_s28 + $0x58] sm:$0x1] }
 0x19b   : > { %1546 = vperm.xlu2 %2941, %v3534_v58   ;;  %v1141_v2 = vmul.f32 %v1125_v18, %v1093_v43 }
 0x19c   : > { %v1323_v50 = vmul.f32 %v1299_v49, %v1275_v4  ;;  %v1274_v4 = vld [vmem:[%s3203_s28 + $0x2b] sm:$0x1] }
 0x19e   : > { %v3758_v3 = vpop.permute.xlu0 %1456 }
 0x1a0   : > { %v3698_v11 = vpop.permute.xlu1 %1237 }
 0x1a1   : > { %v3701_v9 = vpop.permute.xlu2 %1306 }
 0x1a2   : > { %2942 = vset.pattern.permute.xlu1 %v3029_v17  ;;  %v767_v17 = vadd.f32 %v759_v12, %v743_v45  ;;  %v780_v45 = vld [vmem:[%s3203_s28 + $0x67] sm:$0x1]  ;;  %v1309_v25 = vperm.slane %v3701_v9, 0 }
 0x1a3   : > { %1561 = vperm.xlu2 %2941, %v3360_v31   ;;  %1556 = vperm.xlu1 %2942, %v3363_v29   ;;  %v788_v10 = vmul.f32 %v780_v45, %v704_v19  ;;  %v1166_v19 = vperm.slane %v3655_v44, 0 }
 0x1a4   : > { %v791_v0 = vadd.f32 %v783_v42, %v767_v17  ;;  %v3031_v17 = vmov 9   ;;  %v1197_v42 = vmul.f32 %v1181_v37, %v1149_v51  ;;  %v1325_v59 = vmul.f32 %v1309_v25, %v1277_v23  ;;  %v1338_v51 = vld [vmem:[%s3203_s28 + $0x2c] sm:$0x1] }
 0x1a5   : > { %v796_v8 = vadd.f32 %v788_v10, %v772_v33  ;;  %2947 = vset.pattern.permute.xlu0 %v3031_v17  ;;  %v1194_v44 = vmul.f32 %v1166_v19, %v1146_v54  ;;  %v1120_v37 = vperm.slane %v3626_v35, 0  ;;  %v1215_v54 = vld [vmem:[%s3203_s28 + $0x7a] sm:$0x1] }
 0x1a6   : > { %799 = vst [vmem:[%s3230_s4 + $0x16] sm:$0x1] %v791_v0  ;;  %1679 = vperm.xlu0 %2947, %v3178_v16   ;;  %v1267_v16 = vadd.f32 %v1259_v38, %v1203_v41  ;;  %v3032_v38 = vmov 10  }
 0x1a7   : > { %804 = vst [vmem:[%s3230_s4 + $0x66] sm:$0x1] %v796_v8  ;;  %v1148_v8 = vld [vmem:[%s3203_s28 + $0x49] sm:$0x1] }
 0x1a8   : > { %v3719_v56 = vpop.permute.xlu1 %1252  ;;  %v1331_v63 = vadd.f32 %v1323_v50, %v1267_v16  ;;  %v1240_v50 = vperm.slane %v3698_v11, 0  ;;  %v1212_v16 = vld [vmem:[%s3203_s28 + $0x4a] sm:$0x1] }
 0x1aa   : > { %v1346_v53 = vpop.permute.xlu2 %1345 }
 0x1ab   : > { %v1348_v12 = vperm.slane %v1346_v53, 0  ;;  %1571 = vperm.xlu2 %2941, %v3379_v47   ;;  %1566 = vperm.xlu1 %2942, %v3382_v48   ;;  %v1205_v53 = vadd.f32 %v1197_v42, %v1141_v2  ;;  %v1260_v42 = vmul.f32 %v1240_v50, %v1212_v16  ;;  %v1191_v2 = vperm.slane %v3674_v60, 0 }
 0x1ac   : > { %v3768_v32 = vpop.permute.xlu0 %829 }
 0x1ad   : > { %v1384_v5 = vmul.f32 %v1348_v12, %v1336_v1  ;;  %v1269_v13 = vadd.f32 %v1261_v52, %v1205_v53  ;;  %v1418_v52 = vld [vmem:[%s3203_s28 + $0x18] sm:$0x1] }
 0x1ae   : > { %1704 = vperm.xlu0 %2947, %v3537_v7  }
 0x1af   : > { %v1392_v39 = vadd.f32 %v1384_v5, %v1328_v34  ;;  %v1333_v7 = vadd.f32 %v1325_v59, %v1269_v13  ;;  %v1110_v34 = vperm.slane %v3610_v28, 0  ;;  %v1090_v5 = vld [vmem:[%s3203_s28 + $0x28] sm:$0x1]  ;;  %v1135_v59 = vperm.slane %v3644_v6, 0 }
 0x1b1   : > { %1400 = vst [vmem:[%s3230_s4 + $0x8] sm:$0x1] %v1392_v39  ;;  %v3738_v30 = vpop.permute.xlu1 %1291  ;;  %v1138_v28 = vmul.f32 %v1110_v34, %v1090_v5  ;;  %v1176_v39 = vperm.slane %v3665_v46, 0 }
 0x1b2   : > { %v1361_v62 = vpop.permute.xlu2 %1360  ;;  %v1294_v10 = vperm.slane %v3738_v30, 0 }
 0x1b3   : > { %v1363_v26 = vperm.slane %v1361_v62, 0  ;;  %2944 = vset.pattern.permute.xlu2 %v3030_v27  ;;  %1581 = vperm.xlu1 %2942, %v3402_v57   ;;  %v1202_v40 = vadd.f32 %v1194_v44, %v1138_v28  ;;  %v1092_v62 = vld [vmem:[%s3203_s28 + $0x48] sm:$0x1]  ;;  %v1196_v46 = vmul.f32 %v1176_v39, %v1148_v8  ;;  %v1479_v8 = vld [vmem:[%s3203_s28 + $0x69] sm:$0x1] }
 0x1b4   : > { %1610 = vperm.xlu2 %2944, %v3534_v58   ;;  %v1322_v41 = vmul.f32 %v1294_v10, %v1274_v4  ;;  %v3786_v30 = vpop.permute.xlu0 %854  ;;  %v1140_v55 = vmul.f32 %v1120_v37, %v1092_v62  ;;  %v1459_v4 = vperm.slane %v3758_v3, 0 }
 0x1b5   : > { %v1387_v20 = vmul.f32 %v1363_v26, %v1339_v14 }
 0x1b6   : > { %2950 = vset.pattern.permute.xlu0 %v3032_v38  ;;  %v1204_v23 = vadd.f32 %v1196_v46, %v1140_v55 }
 0x1b7   : > { %v1395_v1 = vadd.f32 %v1387_v20, %v1331_v63  ;;  %v1276_v63 = vld [vmem:[%s3203_s28 + $0x4b] sm:$0x1]  ;;  %v1434_v20 = vperm.slane %v3743_v22, 0 }
 0x1b9   : > { %1403 = vst [vmem:[%s3230_s4 + $0x38] sm:$0x1] %v1395_v1  ;;  %v1302_v0 = vpop.permute.xlu1 %1301  ;;  %v1151_v1 = vld [vmem:[%s3203_s28 + $0x79] sm:$0x1]  ;;  %v1466_v22 = vmul.f32 %v1434_v20, %v1418_v52 }
 0x1ba   : > { %v1371_v45 = vpop.permute.xlu2 %1370  ;;  %v1304_v11 = vperm.slane %v1302_v0, 0  ;;  %v1268_v0 = vadd.f32 %v1260_v42, %v1204_v23  ;;  %v1199_v19 = vmul.f32 %v1191_v2, %v1151_v1  ;;  %v816_v1 = vld [vmem:[%s3203_s28 + $0x12] sm:$0x1] }
 0x1bb   : > { %v1373_v9 = vperm.slane %v1371_v45, 0  ;;  %2945 = vset.pattern.permute.xlu1 %v3030_v27  ;;  %v1230_v27 = vperm.slane %v3680_v61, 0  ;;  %v1474_v45 = vld [vmem:[%s3203_s28 + $0x19] sm:$0x1] }
 0x1bc   : > { %1625 = vperm.xlu2 %2944, %v3360_v31   ;;  %1620 = vperm.xlu1 %2945, %v3363_v29   ;;  %v1324_v53 = vmul.f32 %v1304_v11, %v1276_v63  ;;  %v1488_v13 = vpop.permute.xlu0 %1487 }
 0x1bd   : > { %v1389_v33 = vmul.f32 %v1373_v9, %v1341_v21  ;;  %v1258_v61 = vmul.f32 %v1230_v27, %v1210_v15  ;;  %v1095_v9 = vld [vmem:[%s3203_s28 + $0x78] sm:$0x1]  ;;  %v1490_v60 = vperm.slane %v1488_v13, 0  ;;  %v1279_v15 = vld [vmem:[%s3203_s28 + $0x7b] sm:$0x1] }
 0x1be   : > { %v1332_v6 = vadd.f32 %v1324_v53, %v1268_v0  ;;  %v1143_v5 = vmul.f32 %v1135_v59, %v1095_v9  ;;  %v1008_v59 = vld [vmem:[%s3203_s28 + $0x15] sm:$0x1]  ;;  %v3033_v9 = vmov 11  }
 0x1bf   : > { %v1397_v12 = vadd.f32 %v1389_v33, %v1333_v7  ;;  %v1266_v18 = vadd.f32 %v1258_v61, %v1202_v40  ;;  %v1255_v7 = vperm.slane %v3719_v56, 0  ;;  %v1522_v56 = vmul.f32 %v1490_v60, %v1474_v45 }
 0x1c0   : > { %v1207_v61 = vadd.f32 %v1199_v19, %v1143_v5 }
 0x1c1   : > { %1405 = vst [vmem:[%s3230_s4 + $0x58] sm:$0x1] %v1397_v12  ;;  %v3765_v36 = vpop.permute.xlu1 %1316  ;;  %v1330_v35 = vadd.f32 %v1322_v41, %v1266_v18  ;;  %v1263_v44 = vmul.f32 %v1255_v7, %v1215_v54  ;;  %v3815_v28 = vadd.f32 %v1522_v56, %v1466_v22 }
 0x1c2   : > { %v1319_v34 = vperm.slane %v3765_v36, 0  ;;  %v1343_v36 = vld [vmem:[%s3203_s28 + $0x7c] sm:$0x1] }
 0x1c3   : > { %v3772_v49 = vpop.permute.xlu2 %1426 }
 0x1c4   : > { %1635 = vperm.xlu2 %2944, %v3379_v47   ;;  %1630 = vperm.xlu1 %2945, %v3382_v48   ;;  %v1327_v39 = vmul.f32 %v1319_v34, %v1279_v15  ;;  %v1048_v34 = vld [vmem:[%s3203_s28 + $0x17] sm:$0x1] }
 0x1ca   : > { %v1356_v14 = vpop.permute.xlu1 %1355 }
 0x1cb   : > { %v1358_v24 = vperm.slane %v1356_v14, 0  ;;  %v3790_v26 = vpop.permute.xlu2 %1441 }
 0x1cc   : > { %2946 = vset.pattern.permute.xlu2 %v3031_v17  ;;  %1645 = vperm.xlu1 %2945, %v3402_v57  }
 0x1cd   : > { %v1386_v43 = vmul.f32 %v1358_v24, %v1338_v51  ;;  %1674 = vperm.xlu2 %2946, %v3534_v58   ;;  %v1340_v58 = vld [vmem:[%s3203_s28 + $0x4c] sm:$0x1] }
 0x1cf   : > { %v1394_v25 = vadd.f32 %v1386_v43, %v1330_v35  ;;  %v3831_v35 = vld [vmem:[%s3168_s23] sm:$0xff] }
 0x1d0   : > { %v3855_v63 = vrot.slane %v3831_v35, 4  ;;  %v3867_v2 = vrot.slane %v3831_v35, 7 }
 0x1d1   : > { %1402 = vst [vmem:[%s3230_s4 + $0x28] sm:$0x1] %v1394_v25 }
 0x1d2   : > { %v1366_v21 = vpop.permute.xlu1 %1365 }
 0x1d3   : > { %v1368_v33 = vperm.slane %v1366_v21, 0  ;;  %v3806_v12 = vpop.permute.xlu2 %1451  ;;  %v1024_v21 = vld [vmem:[%s3203_s28 + $0x16] sm:$0x1] }
 0x1d4   : > { %2948 = vset.pattern.permute.xlu1 %v3031_v17  ;;  %v1423_v17 = vld [vmem:[%s3203_s28 + $0x68] sm:$0x1] }
 0x1d5   : > { %v1388_v27 = vmul.f32 %v1368_v33, %v1340_v58  ;;  %1689 = vperm.xlu2 %2946, %v3360_v31   ;;  %1684 = vperm.xlu1 %2948, %v3363_v29   ;;  %v1513_v31 = vpop.permute.xlu0 %1512  ;;  %v1271_v29 = vadd.f32 %v1263_v44, %v1207_v61  ;;  %v1471_v41 = vmul.f32 %v1459_v4, %v1423_v17  ;;  %v872_v58 = vld [vmem:[%s3203_s28 + $0x13] sm:$0x1]  ;;  %v3882_v33 = vrot.slane %v3831_v35, 1  ;;  %v1013_v4 = vld [vmem:[%s3203_s28 + $0x65] sm:$0x1] }
 0x1d6   : > { %v1515_v50 = vperm.slane %v1513_v31, 0  ;;  %v857_v17 = vperm.slane %v3786_v30, 0  ;;  %v3899_v31 = vrot.slane %v3831_v35, 6 }
 0x1d7   : > { %v1396_v10 = vadd.f32 %v1388_v27, %v1332_v6  ;;  %v1335_v14 = vadd.f32 %v1327_v39, %v1271_v29  ;;  %1760 = vperm.xlu0 %2950, %v3882_v33   ;;  %v936_v6 = vld [vmem:[%s3203_s28 + $0x14] sm:$0x1]  ;;  %v877_v39 = vld [vmem:[%s3203_s28 + $0x63] sm:$0x1] }
 0x1d8   : > { %v1527_v62 = vmul.f32 %v1515_v50, %v1479_v8  ;;  %v1021_v29 = vmul.f32 %v1013_v4, %v857_v17 }
 0x1d9   : > { %1404 = vst [vmem:[%s3230_s4 + $0x48] sm:$0x1] %v1396_v10  ;;  %v821_v10 = vld [vmem:[%s3203_s28 + $0x62] sm:$0x1] }
 0x1da   : > { %v1381_v40 = vpop.permute.xlu1 %1380  ;;  %v3825_v16 = vadd.f32 %v1527_v62, %v1471_v41  ;;  %v869_v30 = vmul.f32 %v857_v17, %v821_v10  ;;  %v1473_v10 = vld [vmem:[%s3203_s28 + $0x9] sm:$0x1] }
 0x1db   : > { %v1383_v37 = vperm.slane %v1381_v40, 0 }
 0x1dc   : > { %v3821_v51 = vpop.permute.xlu2 %1482 }
 0x1dd   : > { %v1391_v3 = vmul.f32 %v1383_v37, %v1343_v36  ;;  %1699 = vperm.xlu2 %2946, %v3379_v47   ;;  %1694 = vperm.xlu1 %2948, %v3382_v48   ;;  %v886_v24 = vpop.permute.xlu0 %885  ;;  %v3839_v47 = vrot.slane %v3831_v35, 3  ;;  %v3842_v48 = vrot.slane %v3831_v35, 2  ;;  %v1029_v36 = vld [vmem:[%s3203_s28 + $0x66] sm:$0x1] }
 0x1de   : > { %v888_v53 = vperm.slane %v886_v24, 0  ;;  %v941_v24 = vld [vmem:[%s3203_s28 + $0x64] sm:$0x1] }
 0x1df   : > { %v1399_v18 = vadd.f32 %v1391_v3, %v1335_v14  ;;  %1785 = vperm.xlu0 %2950, %v3899_v31  }
 0x1e0   : > { %v920_v7 = vmul.f32 %v888_v53, %v872_v58  ;;  %v1032_v22 = vmul.f32 %v1024_v21, %v888_v53 }
 0x1e1   : > { %1407 = vst [vmem:[%s3230_s4 + $0x78] sm:$0x1] %v1399_v18 }
 0x1e3   : > { %v3828_v46 = vpop.permute.xlu1 %1436 }
 0x1e4   : > { %v3833_v11 = vpop.permute.xlu2 %1497 }
 0x1e5   : > { %2949 = vset.pattern.permute.xlu2 %v3032_v38  ;;  %1709 = vperm.xlu1 %2948, %v3402_v57   ;;  %v911_v43 = vpop.permute.xlu0 %910  ;;  %v3852_v57 = vrot.slane %v3831_v35, 5 }
 0x1e6   : > { %1755 = vperm.xlu2 %2949, %v3831_v35   ;;  %v913_v61 = vperm.slane %v911_v43, 0  ;;  %v1053_v43 = vld [vmem:[%s3203_s28 + $0x67] sm:$0x1] }
 0x1e7   : > { %2953 = vset.pattern.permute.xlu0 %v3033_v9 }
 0x1e8   : > { %v925_v41 = vmul.f32 %v913_v61, %v877_v39  ;;  %v1037_v37 = vmul.f32 %v1029_v36, %v913_v61  ;;  %1816 = vperm.xlu0 %2953, %v3882_v33   ;;  %v1543_v36 = vld [vmem:[%s3203_s28 + $0x6a] sm:$0x1] }
 0x1ea   : > { %v933_v3 = vadd.f32 %v925_v41, %v869_v30  ;;  %v1045_v62 = vadd.f32 %v1037_v37, %v1021_v29  ;;  %v1666_v41 = vld [vmem:[%s3203_s28 + $0x1c] sm:$0x1] }
 0x1eb   : > { %v3844_v55 = vpop.permute.xlu1 %1446 }
 0x1ec   : > { %v3846_v42 = vpop.permute.xlu2 %1507 }
 0x1ed   : > { %2951 = vset.pattern.permute.xlu1 %v3032_v38  ;;  %v3857_v25 = vpop.permute.xlu0 %1551  ;;  %v832_v38 = vperm.slane %v3768_v32, 0 }
 0x1ee   : > { %1770 = vperm.xlu2 %2949, %v3839_v47   ;;  %1765 = vperm.xlu1 %2951, %v3842_v48  }
 0x1ef   : > { %v864_v13 = vmul.f32 %v832_v38, %v816_v1  ;;  %v1016_v32 = vmul.f32 %v1008_v59, %v832_v38 }
 0x1f0   : > { %1841 = vperm.xlu0 %2953, %v3899_v31  }
 0x1f1   : > { %v928_v19 = vadd.f32 %v920_v7, %v864_v13  ;;  %v1040_v54 = vadd.f32 %v1032_v22, %v1016_v32  ;;  %v1554_v7 = vperm.slane %v3857_v25, 0  ;;  %v3034_v22 = vmov 12  }
 0x1f2   : > { %v1429_v25 = vperm.slane %v3772_v49, 0  ;;  %v1537_v49 = vld [vmem:[%s3203_s28 + $0xa] sm:$0x1] }
 0x1f3   : > { %v3859_v20 = vpop.permute.xlu1 %1461 }
 0x1f5   : > { %v3861_v23 = vpop.permute.xlu2 %1546  ;;  %v3869_v52 = vpop.permute.xlu0 %1576 }
 0x1f6   : > { %1780 = vperm.xlu2 %2949, %v3852_v57   ;;  %1775 = vperm.xlu1 %2951, %v3855_v63   ;;  %v1579_v17 = vperm.slane %v3869_v52, 0  ;;  %v1549_v39 = vperm.slane %v3861_v23, 0  ;;  %v1601_v52 = vld [vmem:[%s3203_s28 + $0xb] sm:$0x1] }
 0x1f8   : > { %2956 = vset.pattern.permute.xlu0 %v3034_v22  ;;  %v1591_v30 = vmul.f32 %v1579_v17, %v1543_v36 }
 0x1f9   : > { %1880 = vperm.xlu0 %2956, %v3882_v33  }
 0x1fc   : > { %v3873_v0 = vpop.permute.xlu1 %1492 }
 0x1fd   : > { %v3877_v45 = vpop.permute.xlu2 %1561  ;;  %v950_v60 = vpop.permute.xlu0 %949 }
 0x1fe   : > { %2952 = vset.pattern.permute.xlu2 %v3033_v9  ;;  %1790 = vperm.xlu1 %2951, %v3867_v2   ;;  %v952_v27 = vperm.slane %v950_v60, 0 }
 0x1ff   : > { %1811 = vperm.xlu2 %2952, %v3831_v35  }
 0x200   : > { %v984_v15 = vmul.f32 %v952_v27, %v936_v6  ;;  %v1056_v44 = vmul.f32 %v1048_v34, %v952_v27  ;;  %v1602_v6 = vld [vmem:[%s3203_s28 + $0x1b] sm:$0x1]  ;;  %v1485_v27 = vperm.slane %v3821_v51, 0 }
 0x201   : > { %1905 = vperm.xlu0 %2956, %v3899_v31  }
 0x202   : > { %v992_v40 = vadd.f32 %v984_v15, %v928_v19  ;;  %v1064_v8 = vadd.f32 %v1056_v44, %v1040_v54  ;;  %v1417_v44 = vld [vmem:[%s3203_s28 + $0x8] sm:$0x1] }
 0x203   : > { %v1465_v51 = vmul.f32 %v1429_v25, %v1417_v44 }
 0x204   : > { %v3887_v56 = vpop.permute.xlu1 %1502  ;;  %1000 = vst [vmem:[%s3230_s4 + $0x14] sm:$0x1] %v992_v40  ;;  %v1521_v40 = vmul.f32 %v1485_v27, %v1473_v10  ;;  %v1604_v10 = vld [vmem:[%s3203_s28 + $0x3b] sm:$0x1] }
 0x205   : > { %v3889_v5 = vpop.permute.xlu2 %1571  ;;  %1072 = vst [vmem:[%s3230_s4 + $0x17] sm:$0x1] %v1064_v8  ;;  %v975_v50 = vpop.permute.xlu0 %974 }
 0x206   : > { %2954 = vset.pattern.permute.xlu1 %v3033_v9  ;;  %v977_v38 = vperm.slane %v975_v50, 0  ;;  %v1538_v9 = vld [vmem:[%s3203_s28 + $0x1a] sm:$0x1]  ;;  %v1585_v50 = vmul.f32 %v1549_v39, %v1537_v49  ;;  %v1671_v39 = vld [vmem:[%s3203_s28 + $0x6c] sm:$0x1] }
 0x207   : > { %1826 = vperm.xlu2 %2952, %v3839_v47   ;;  %1821 = vperm.xlu1 %2954, %v3842_v48   ;;  %v1586_v19 = vmul.f32 %v1554_v7, %v1538_v9 }
 0x208   : > { %v989_v1 = vmul.f32 %v977_v38, %v941_v24  ;;  %v1061_v53 = vmul.f32 %v1053_v43, %v977_v38  ;;  %v1529_v38 = vadd.f32 %v1521_v40, %v1465_v51  ;;  %v1510_v51 = vperm.slane %v3846_v42, 0  ;;  %v1422_v42 = vld [vmem:[%s3203_s28 + $0x58] sm:$0x1] }
 0x209   : > { %v1594_v4 = vadd.f32 %v1586_v19, %v3815_v28 }
 0x20a   : > { %v997_v59 = vadd.f32 %v989_v1, %v933_v3  ;;  %v1069_v58 = vadd.f32 %v1061_v53, %v1045_v62  ;;  %v1607_v3 = vld [vmem:[%s3203_s28 + $0x6b] sm:$0x1]  ;;  %v1444_v62 = vperm.slane %v3790_v26, 0  ;;  %v1500_v1 = vperm.slane %v3833_v11, 0  ;;  %v1540_v11 = vld [vmem:[%s3203_s28 + $0x3a] sm:$0x1] }
 0x20b   : > { %v1564_v26 = vperm.slane %v3877_v45, 0 }
 0x20c   : > { %v3904_v14 = vpop.permute.xlu1 %1517  ;;  %1005 = vst [vmem:[%s3230_s4 + $0x64] sm:$0x1] %v997_v59  ;;  %v1476_v59 = vld [vmem:[%s3203_s28 + $0x39] sm:$0x1] }
 0x20d   : > { %v1616_v21 = vpop.permute.xlu0 %1615  ;;  %1077 = vst [vmem:[%s3230_s4 + $0x67] sm:$0x1] %v1069_v58  ;;  %v1599_v58 = vadd.f32 %v1591_v30, %v3825_v16  ;;  %v1588_v17 = vmul.f32 %v1564_v26, %v1540_v11 }
 0x20e   : > { %v3906_v18 = vpop.permute.xlu2 %1610  ;;  %v1618_v54 = vperm.slane %v1616_v21, 0  ;;  %v1665_v21 = vld [vmem:[%s3203_s28 + $0xc] sm:$0x1] }
 0x20f   : > { %1836 = vperm.xlu2 %2952, %v3852_v57   ;;  %1831 = vperm.xlu1 %2954, %v3855_v63   ;;  %v1613_v8 = vperm.slane %v3906_v18, 0  ;;  %v1420_v18 = vld [vmem:[%s3203_s28 + $0x38] sm:$0x1] }
 0x210   : > { %v1650_v61 = vmul.f32 %v1618_v54, %v1602_v6  ;;  %v1468_v54 = vmul.f32 %v1444_v62, %v1420_v18  ;;  %v1524_v6 = vmul.f32 %v1500_v1, %v1476_v59 }
 0x211   : > { %v1649_v53 = vmul.f32 %v1613_v8, %v1601_v52  ;;  %v1478_v8 = vld [vmem:[%s3203_s28 + $0x59] sm:$0x1] }
 0x212   : > { %v1658_v29 = vadd.f32 %v1650_v61, %v1594_v4  ;;  %v1532_v49 = vadd.f32 %v1524_v6, %v1468_v54  ;;  %v1526_v62 = vmul.f32 %v1510_v51, %v1478_v8  ;;  %v1495_v54 = vperm.slane %v3873_v0, 0  ;;  %v1475_v6 = vld [vmem:[%s3203_s28 + $0x29] sm:$0x1]  ;;  %v1667_v51 = vld [vmem:[%s3203_s28 + $0x2c] sm:$0x1] }
 0x213   : > { %v1449_v8 = vperm.slane %v3844_v55, 0  ;;  %v1605_v55 = vld [vmem:[%s3203_s28 + $0x4b] sm:$0x1] }
 0x215   : > { %v3914_v13 = vpop.permute.xlu1 %1556  ;;  %v1641_v60 = vpop.permute.xlu0 %1640 }
 0x216   : > { %v3917_v32 = vpop.permute.xlu2 %1625  ;;  %v1643_v23 = vperm.slane %v1641_v60, 0  ;;  %v1593_v60 = vadd.f32 %v1585_v50, %v1529_v38  ;;  %v3035_v50 = vmov 13   ;;  %v1606_v38 = vld [vmem:[%s3203_s28 + $0x5b] sm:$0x1] }
 0x217   : > { %2955 = vset.pattern.permute.xlu2 %v3034_v22  ;;  %1846 = vperm.xlu1 %2954, %v3867_v2   ;;  %v1628_v25 = vperm.slane %v3917_v32, 0 }
 0x218   : > { %1875 = vperm.xlu2 %2955, %v3831_v35   ;;  %v1657_v16 = vadd.f32 %v1649_v53, %v1593_v60  ;;  %2959 = vset.pattern.permute.xlu0 %v3035_v50 }
 0x219   : > { %v1652_v40 = vmul.f32 %v1628_v25, %v1604_v10  ;;  %1944 = vperm.xlu0 %2959, %v3882_v33   ;;  %v1559_v25 = vperm.slane %v3914_v13, 0  ;;  %v1539_v10 = vld [vmem:[%s3203_s28 + $0x2a] sm:$0x1] }
 0x21d   : > { %v3925_v34 = vpop.permute.xlu1 %1566  ;;  %v1680_v28 = vpop.permute.xlu0 %1679 }
 0x21e   : > { %v3929_v15 = vpop.permute.xlu2 %1635  ;;  %v1682_v37 = vperm.slane %v1680_v28, 0  ;;  %v1668_v28 = vld [vmem:[%s3203_s28 + $0x3c] sm:$0x1] }
 0x21f   : > { %2957 = vset.pattern.permute.xlu1 %v3034_v22  ;;  %v1655_v22 = vmul.f32 %v1643_v23, %v1607_v3  ;;  %v1596_v23 = vadd.f32 %v1588_v17, %v1532_v49  ;;  %v1542_v3 = vld [vmem:[%s3203_s28 + $0x5a] sm:$0x1]  ;;  %v1638_v18 = vperm.slane %v3929_v15, 0  ;;  %v1477_v49 = vld [vmem:[%s3203_s28 + $0x49] sm:$0x1] }
 0x220   : > { %1890 = vperm.xlu2 %2955, %v3839_v47   ;;  %1885 = vperm.xlu1 %2957, %v3842_v48   ;;  %v1714_v43 = vmul.f32 %v1682_v37, %v1666_v41  ;;  %v1574_v41 = vperm.slane %v3889_v5, 0 }
 0x221   : > { %v1663_v45 = vadd.f32 %v1655_v22, %v1599_v58  ;;  %v1654_v58 = vmul.f32 %v1638_v18, %v1606_v38  ;;  %1969 = vperm.xlu0 %2959, %v3899_v31   ;;  %v1669_v38 = vld [vmem:[%s3203_s28 + $0x4c] sm:$0x1] }
 0x222   : > { %v1722_v9 = vadd.f32 %v1714_v43, %v1658_v29  ;;  %v1454_v29 = vperm.slane %v3806_v12, 0  ;;  %v1660_v43 = vadd.f32 %v1652_v40, %v1596_v23  ;;  %v1590_v1 = vmul.f32 %v1574_v41, %v1542_v3  ;;  %v1541_v23 = vld [vmem:[%s3203_s28 + $0x4a] sm:$0x1] }
 0x224   : > { %1730 = vst [vmem:[%s3230_s4 + $0x19] sm:$0x1] %v1722_v9  ;;  %v1470_v5 = vmul.f32 %v1454_v29, %v1422_v42  ;;  %v1421_v29 = vld [vmem:[%s3203_s28 + $0x48] sm:$0x1] }
 0x225   : > { %v3946_v24 = vpop.permute.xlu1 %1581  ;;  %v1705_v44 = vpop.permute.xlu0 %1704  ;;  %v1469_v42 = vmul.f32 %v1449_v8, %v1421_v29 }
 0x226   : > { %v1707_v4 = vperm.slane %v1705_v44, 0  ;;  %v1534_v59 = vadd.f32 %v1526_v62, %v1470_v5  ;;  %v1419_v44 = vld [vmem:[%s3203_s28 + $0x28] sm:$0x1] }
 0x227   : > { %v1675_v7 = vpop.permute.xlu2 %1674 }
 0x228   : > { %v1677_v19 = vperm.slane %v1675_v7, 0  ;;  %1900 = vperm.xlu2 %2955, %v3852_v57   ;;  %1895 = vperm.xlu1 %2957, %v3855_v63   ;;  %v1719_v36 = vmul.f32 %v1707_v4, %v1671_v39  ;;  %v1670_v7 = vld [vmem:[%s3203_s28 + $0x5c] sm:$0x1]  ;;  %v1598_v9 = vadd.f32 %v1590_v1, %v1534_v59  ;;  %v1603_v4 = vld [vmem:[%s3203_s28 + $0x2b] sm:$0x1]  ;;  %v1505_v39 = vperm.slane %v3887_v56, 0 }
 0x229   : > { %v1464_v1 = vperm.slane %v3859_v20, 0  ;;  %v1584_v59 = vperm.slane %v3946_v24, 0  ;;  %v1608_v20 = vld [vmem:[%s3203_s28 + $0x7b] sm:$0x1] }
 0x22a   : > { %v1713_v27 = vmul.f32 %v1677_v19, %v1665_v21  ;;  %v1727_v30 = vadd.f32 %v1719_v36, %v1663_v45  ;;  %v1662_v15 = vadd.f32 %v1654_v58, %v1598_v9  ;;  %v1523_v45 = vmul.f32 %v1495_v54, %v1475_v6 }
 0x22b   : > { %v1525_v56 = vmul.f32 %v1505_v39, %v1477_v49  ;;  %v3037_v54 = vmov 15  }
 0x22c   : > { %v1721_v61 = vadd.f32 %v1713_v27, %v1657_v16  ;;  %1735 = vst [vmem:[%s3230_s4 + $0x69] sm:$0x1] %v1727_v30  ;;  %v1439_v16 = vperm.slane %v3828_v46, 0  ;;  %v3036_v46 = vmov 14  }
 0x22d   : > { %2962 = vset.pattern.permute.xlu0 %v3036_v46  ;;  %v1533_v62 = vadd.f32 %v1525_v56, %v1469_v42  ;;  %v3038_v56 = vmov 16  }
 0x22e   : > { %1729 = vst [vmem:[%s3230_s4 + $0x9] sm:$0x1] %v1721_v61  ;;  %v3964_v32 = vpop.permute.xlu1 %1620  ;;  %v1467_v17 = vmul.f32 %v1439_v16, %v1419_v44  ;;  %v1587_v61 = vmul.f32 %v1559_v25, %v1539_v10  ;;  %2008 = vperm.xlu0 %2962, %v3882_v33   ;;  %v1672_v44 = vld [vmem:[%s3203_s28 + $0x7c] sm:$0x1] }
 0x22f   : > { %v1690_v52 = vpop.permute.xlu2 %1689  ;;  %v1623_v0 = vperm.slane %v3964_v32, 0 }
 0x230   : > { %v1692_v37 = vperm.slane %v1690_v52, 0  ;;  %2958 = vset.pattern.permute.xlu2 %v3035_v50  ;;  %1910 = vperm.xlu1 %2957, %v3867_v2   ;;  %v1531_v13 = vadd.f32 %v1523_v45, %v1467_v17 }
 0x231   : > { %1939 = vperm.xlu2 %2958, %v3831_v35   ;;  %v1651_v36 = vmul.f32 %v1623_v0, %v1603_v4  ;;  %v1802_v4 = vld [vmem:[%s3203_s28 + $0x9] sm:$0x1] }
 0x232   : > { %v1716_v12 = vmul.f32 %v1692_v37, %v1668_v28  ;;  %v1595_v32 = vadd.f32 %v1587_v61, %v1531_v13  ;;  %v1569_v28 = vperm.slane %v3925_v34, 0 }
 0x234   : > { %v1724_v53 = vadd.f32 %v1716_v12, %v1660_v43  ;;  %v1659_v41 = vadd.f32 %v1651_v36, %v1595_v32  ;;  %v1589_v34 = vmul.f32 %v1569_v28, %v1541_v23  ;;  %v1520_v43 = vperm.slane %v3904_v14, 0  ;;  %v1480_v12 = vld [vmem:[%s3203_s28 + $0x79] sm:$0x1] }
 0x235   : > { %v1805_v32 = vld [vmem:[%s3203_s28 + $0x39] sm:$0x1] }
 0x236   : > { %1732 = vst [vmem:[%s3230_s4 + $0x39] sm:$0x1] %v1724_v53  ;;  %v1631_v21 = vpop.permute.xlu1 %1630  ;;  %2033 = vperm.xlu0 %2962, %v3899_v31   ;;  %v1597_v53 = vadd.f32 %v1589_v34, %v1533_v62  ;;  %v1528_v9 = vmul.f32 %v1520_v43, %v1480_v12 }
 0x237   : > { %v1700_v22 = vpop.permute.xlu2 %1699  ;;  %v1633_v37 = vperm.slane %v1631_v21, 0 }
 0x238   : > { %v1702_v60 = vperm.slane %v1700_v22, 0  ;;  %2960 = vset.pattern.permute.xlu1 %v3035_v50  ;;  %v1544_v22 = vld [vmem:[%s3203_s28 + $0x7a] sm:$0x1] }
 0x239   : > { %1954 = vperm.xlu2 %2958, %v3839_v47   ;;  %1949 = vperm.xlu1 %2960, %v3842_v48   ;;  %v1653_v18 = vmul.f32 %v1633_v37, %v1605_v55  ;;  %v1807_v55 = vld [vmem:[%s3203_s28 + $0x59] sm:$0x1] }
 0x23a   : > { %v1718_v26 = vmul.f32 %v1702_v60, %v1670_v7  ;;  %v1424_v7 = vld [vmem:[%s3203_s28 + $0x78] sm:$0x1] }
 0x23b   : > { %v1661_v14 = vadd.f32 %v1653_v18, %v1597_v53  ;;  %v1472_v24 = vmul.f32 %v1464_v1, %v1424_v7  ;;  %v1748_v53 = vld [vmem:[%s3203_s28 + $0x28] sm:$0x1] }
 0x23c   : > { %v1726_v19 = vadd.f32 %v1718_v26, %v1662_v15  ;;  %v1592_v26 = vmul.f32 %v1584_v59, %v1544_v22  ;;  %v1804_v59 = vld [vmem:[%s3203_s28 + $0x29] sm:$0x1] }
 0x23d   : > { %v1536_v6 = vadd.f32 %v1528_v9, %v1472_v24  ;;  %v1806_v24 = vld [vmem:[%s3203_s28 + $0x49] sm:$0x1] }
 0x23e   : > { %1734 = vst [vmem:[%s3230_s4 + $0x59] sm:$0x1] %v1726_v19  ;;  %v3985_v11 = vpop.permute.xlu1 %1645  ;;  %2965 = vset.pattern.permute.xlu0 %v3037_v54 }
 0x23f   : > { %v1648_v60 = vperm.slane %v3985_v11, 0  ;;  %2089 = vperm.xlu0 %2965, %v3882_v33   ;;  %v1746_v11 = vld [vmem:[%s3203_s28 + $0x8] sm:$0x1]  ;;  %v1600_v45 = vadd.f32 %v1592_v26, %v1536_v6 }
 0x240   : > { %v3990_v27 = vpop.permute.xlu2 %1755 }
 0x241   : > { %1964 = vperm.xlu2 %2958, %v3852_v57   ;;  %1959 = vperm.xlu1 %2960, %v3855_v63   ;;  %v1656_v16 = vmul.f32 %v1648_v60, %v1608_v20  ;;  %v1758_v25 = vperm.slane %v3990_v27, 0  ;;  %v1750_v20 = vld [vmem:[%s3203_s28 + $0x48] sm:$0x1] }
 0x243   : > { %v1664_v61 = vadd.f32 %v1656_v16, %v1600_v45  ;;  %v1753_v45 = vld [vmem:[%s3203_s28 + $0x78] sm:$0x1] }
 0x247   : > { %v1685_v40 = vpop.permute.xlu1 %1684  ;;  %2114 = vperm.xlu0 %2965, %v3899_v31  }
 0x248   : > { %v1687_v52 = vperm.slane %v1685_v40, 0  ;;  %v4004_v30 = vpop.permute.xlu2 %1770  ;;  %v1749_v40 = vld [vmem:[%s3203_s28 + $0x38] sm:$0x1] }
 0x249   : > { %2961 = vset.pattern.permute.xlu2 %v3036_v46  ;;  %1974 = vperm.xlu1 %2960, %v3867_v2   ;;  %v1773_v49 = vperm.slane %v4004_v30, 0 }
 0x24a   : > { %v1715_v50 = vmul.f32 %v1687_v52, %v1667_v51  ;;  %2003 = vperm.xlu2 %2961, %v3831_v35  }
 0x24b   : > { %v1797_v52 = vmul.f32 %v1773_v49, %v1749_v40 }
 0x24c   : > { %v1723_v3 = vadd.f32 %v1715_v50, %v1659_v41  ;;  %v1751_v50 = vld [vmem:[%s3203_s28 + $0x58] sm:$0x1] }
 0x24e   : > { %1731 = vst [vmem:[%s3230_s4 + $0x29] sm:$0x1] %v1723_v3 }
 0x24f   : > { %v1695_v5 = vpop.permute.xlu1 %1694  ;;  %2968 = vset.pattern.permute.xlu0 %v3038_v56 }
 0x250   : > { %v1697_v58 = vperm.slane %v1695_v5, 0  ;;  %v4018_v21 = vpop.permute.xlu2 %1780  ;;  %2145 = vperm.xlu0 %2968, %v3882_v33   ;;  %v4058_v5 = vpop.permute.xlu0 %1760 }
 0x251   : > { %2963 = vset.pattern.permute.xlu1 %v3036_v46  ;;  %v1794_v46 = vmul.f32 %v1758_v25, %v1746_v11  ;;  %v1783_v41 = vperm.slane %v4018_v21, 0 }
 0x252   : > { %v1717_v15 = vmul.f32 %v1697_v58, %v1669_v38  ;;  %2018 = vperm.xlu2 %2961, %v3839_v47   ;;  %2013 = vperm.xlu1 %2963, %v3842_v48   ;;  %v3039_v38 = vmov 17  }
 0x253   : > { %v1799_v3 = vmul.f32 %v1783_v41, %v1751_v50  ;;  %v1930_v41 = vld [vmem:[%s3203_s28 + $0xb] sm:$0x1] }
 0x254   : > { %v1725_v19 = vadd.f32 %v1717_v15, %v1661_v14 }
 0x256   : > { %1733 = vst [vmem:[%s3230_s4 + $0x49] sm:$0x1] %v1725_v19 }
 0x257   : > { %v1710_v10 = vpop.permute.xlu1 %1709 }
 0x258   : > { %v1712_v0 = vperm.slane %v1710_v10, 0  ;;  %2170 = vperm.xlu0 %2968, %v3899_v31   ;;  %v4069_v60 = vpop.permute.xlu0 %1785  ;;  %v3040_v10 = vmov 18  }
 0x259   : > { %v1812_v17 = vpop.permute.xlu2 %1811 }
 0x25a   : > { %v1720_v13 = vmul.f32 %v1712_v0, %v1672_v44  ;;  %v1814_v39 = vperm.slane %v1812_v17, 0  ;;  %2028 = vperm.xlu2 %2961, %v3852_v57   ;;  %2023 = vperm.xlu1 %2963, %v3855_v63   ;;  %v1809_v0 = vld [vmem:[%s3203_s28 + $0x79] sm:$0x1] }
 0x25c   : > { %v1728_v27 = vadd.f32 %v1720_v13, %v1664_v61  ;;  %v1850_v36 = vmul.f32 %v1814_v39, %v1802_v4 }
 0x25e   : > { %1736 = vst [vmem:[%s3230_s4 + $0x79] sm:$0x1] %v1728_v27  ;;  %v4036_v51 = vadd.f32 %v1850_v36, %v1794_v46 }
 0x260   : > { %v1766_v8 = vpop.permute.xlu1 %1765  ;;  %2971 = vset.pattern.permute.xlu0 %v3039_v38  ;;  %v4080_v11 = vpop.permute.xlu0 %1816 }
 0x261   : > { %v1827_v28 = vpop.permute.xlu2 %1826  ;;  %v1768_v1 = vperm.slane %v1766_v8, 0  ;;  %2209 = vperm.xlu0 %2971, %v3882_v33   ;;  %v3041_v8 = vmov 19  }
 0x262   : > { %v1829_v29 = vperm.slane %v1827_v28, 0  ;;  %2964 = vset.pattern.permute.xlu2 %v3037_v54  ;;  %2038 = vperm.xlu1 %2963, %v3867_v2  }
 0x263   : > { %2084 = vperm.xlu2 %2964, %v3831_v35   ;;  %v1796_v22 = vmul.f32 %v1768_v1, %v1748_v53  ;;  %v1933_v53 = vld [vmem:[%s3203_s28 + $0x3b] sm:$0x1] }
 0x264   : > { %v1853_v23 = vmul.f32 %v1829_v29, %v1805_v32  ;;  %v1866_v29 = vld [vmem:[%s3203_s28 + $0xa] sm:$0x1] }
 0x266   : > { %v4043_v30 = vadd.f32 %v1853_v23, %v1797_v52 }
 0x268   : > { %v1776_v37 = vpop.permute.xlu1 %1775  ;;  %v4090_v27 = vpop.permute.xlu0 %1841 }
 0x269   : > { %v1837_v42 = vpop.permute.xlu2 %1836  ;;  %v1778_v15 = vperm.slane %v1776_v37, 0  ;;  %2234 = vperm.xlu0 %2971, %v3899_v31  }
 0x26a   : > { %v1839_v34 = vperm.slane %v1837_v42, 0  ;;  %2966 = vset.pattern.permute.xlu1 %v3037_v54 }
 0x26b   : > { %2099 = vperm.xlu2 %2964, %v3839_v47   ;;  %2094 = vperm.xlu1 %2966, %v3842_v48   ;;  %v1798_v6 = vmul.f32 %v1778_v15, %v1750_v20  ;;  %v1763_v15 = vperm.slane %v4058_v5, 0  ;;  %v1819_v20 = vperm.slane %v4080_v11, 0  ;;  %v1788_v5 = vperm.slane %v4069_v60, 0 }
 0x26c   : > { %v1855_v62 = vmul.f32 %v1839_v34, %v1807_v55  ;;  %v1994_v55 = vld [vmem:[%s3203_s28 + $0xc] sm:$0x1] }
 0x26e   : > { %v4051_v43 = vadd.f32 %v1855_v62, %v1799_v3 }
 0x270   : > { %v1791_v18 = vpop.permute.xlu1 %1790  ;;  %v4097_v40 = vpop.permute.xlu0 %1880 }
 0x271   : > { %v1793_v44 = vperm.slane %v1791_v18, 0  ;;  %2974 = vset.pattern.permute.xlu0 %v3040_v10  ;;  %v1869_v18 = vld [vmem:[%s3203_s28 + $0x3a] sm:$0x1] }
 0x272   : > { %v4054_v12 = vpop.permute.xlu2 %1875  ;;  %2273 = vperm.xlu0 %2974, %v3882_v33  }
 0x273   : > { %2109 = vperm.xlu2 %2964, %v3852_v57   ;;  %2104 = vperm.xlu1 %2966, %v3855_v63   ;;  %v1801_v46 = vmul.f32 %v1793_v44, %v1753_v45  ;;  %v1878_v52 = vperm.slane %v4054_v12, 0  ;;  %v1803_v44 = vld [vmem:[%s3203_s28 + $0x19] sm:$0x1] }
 0x275   : > { %v1914_v37 = vmul.f32 %v1878_v52, %v1866_v29  ;;  %v1808_v52 = vld [vmem:[%s3203_s28 + $0x69] sm:$0x1]  ;;  %v1883_v29 = vperm.slane %v4097_v40, 0 }
 0x277   : > { %v1922_v34 = vadd.f32 %v1914_v37, %v4036_v51  ;;  %v4125_v51 = vld [vmem:[%s3168_s23] sm:$0xff] }
 0x279   : > { %v1822_v58 = vpop.permute.xlu1 %1821 }
 0x27a   : > { %v1824_v21 = vperm.slane %v1822_v58, 0  ;;  %v4063_v7 = vpop.permute.xlu2 %1890  ;;  %2298 = vperm.xlu0 %2974, %v3899_v31  }
 0x27b   : > { %2967 = vset.pattern.permute.xlu2 %v3038_v56  ;;  %2119 = vperm.xlu1 %2966, %v3867_v2   ;;  %v1893_v3 = vperm.slane %v4063_v7, 0  ;;  %v3042_v7 = vmov 20  }
 0x27c   : > { %v1852_v9 = vmul.f32 %v1824_v21, %v1804_v59  ;;  %2140 = vperm.xlu2 %2967, %v3831_v35   ;;  %v4128_v21 = vrot.slane %v4125_v51, 1 }
 0x27d   : > { %v1917_v59 = vmul.f32 %v1893_v3, %v1869_v18 }
 0x27e   : > { %v4067_v14 = vadd.f32 %v1852_v9, %v1796_v22 }
 0x281   : > { %v1832_v26 = vpop.permute.xlu1 %1831 }
 0x282   : > { %v1834_v19 = vperm.slane %v1832_v26, 0  ;;  %v4074_v54 = vpop.permute.xlu2 %1900  ;;  %2977 = vset.pattern.permute.xlu0 %v3041_v8 }
 0x283   : > { %2969 = vset.pattern.permute.xlu1 %v3038_v56  ;;  %2337 = vperm.xlu0 %2977, %v3882_v33   ;;  %v4109_v56 = vpop.permute.xlu0 %1905 }
 0x284   : > { %v1854_v16 = vmul.f32 %v1834_v19, %v1806_v24  ;;  %2155 = vperm.xlu2 %2967, %v3839_v47   ;;  %2150 = vperm.xlu1 %2969, %v3842_v48   ;;  %v1997_v24 = vld [vmem:[%s3203_s28 + $0x3c] sm:$0x1]  ;;  %v1925_v19 = vadd.f32 %v1917_v59, %v4043_v30  ;;  %v1908_v3 = vperm.slane %v4109_v56, 0 }
 0x286   : > { %v4078_v25 = vadd.f32 %v1854_v16, %v1798_v6  ;;  %v1903_v6 = vperm.slane %v4074_v54, 0  ;;  %v1747_v16 = vld [vmem:[%s3203_s28 + $0x18] sm:$0x1] }
 0x289   : > { %v1847_v4 = vpop.permute.xlu1 %1846 }
 0x28a   : > { %v1849_v17 = vperm.slane %v1847_v4, 0  ;;  %v1935_v4 = vld [vmem:[%s3203_s28 + $0x5b] sm:$0x1] }
 0x28b   : > { %v1940_v61 = vpop.permute.xlu2 %1939  ;;  %2362 = vperm.xlu0 %2977, %v3899_v31   ;;  %v4121_v31 = vpop.permute.xlu0 %1944 }
 0x28c   : > { %v1857_v13 = vmul.f32 %v1849_v17, %v1809_v0  ;;  %2165 = vperm.xlu2 %2967, %v3852_v57   ;;  %2160 = vperm.xlu1 %2969, %v3855_v63   ;;  %v1942_v23 = vperm.slane %v1940_v61, 0  ;;  %v1871_v0 = vld [vmem:[%s3203_s28 + $0x5a] sm:$0x1]  ;;  %v1844_v17 = vperm.slane %v4090_v27, 0 }
 0x28e   : > { %v4088_v39 = vadd.f32 %v1857_v13, %v1801_v46  ;;  %v1978_v33 = vmul.f32 %v1942_v23, %v1930_v41  ;;  %v1795_v46 = vmul.f32 %v1763_v15, %v1747_v16  ;;  %v1752_v13 = vld [vmem:[%s3203_s28 + $0x68] sm:$0x1]  ;;  %v1919_v23 = vmul.f32 %v1903_v6, %v1871_v0  ;;  %v1867_v41 = vld [vmem:[%s3203_s28 + $0x1a] sm:$0x1] }
 0x28f   : > { %v1856_v27 = vmul.f32 %v1844_v17, %v1808_v52  ;;  %v1915_v40 = vmul.f32 %v1883_v29, %v1867_v41  ;;  %v1932_v17 = vld [vmem:[%s3203_s28 + $0x2b] sm:$0x1] }
 0x290   : > { %v1986_v12 = vadd.f32 %v1978_v33, %v1922_v34  ;;  %v1927_v18 = vadd.f32 %v1919_v23, %v4051_v43  ;;  %v1996_v23 = vld [vmem:[%s3203_s28 + $0x2c] sm:$0x1] }
 0x292   : > { %v4093_v36 = vpop.permute.xlu1 %1885 }
 0x293   : > { %v1955_v49 = vpop.permute.xlu2 %1954  ;;  %2980 = vset.pattern.permute.xlu0 %v3042_v7  ;;  %v1970_v61 = vpop.permute.xlu0 %1969  ;;  %v1888_v0 = vperm.slane %v4093_v36, 0  ;;  %v2000_v36 = vld [vmem:[%s3203_s28 + $0x6c] sm:$0x1] }
 0x294   : > { %2970 = vset.pattern.permute.xlu2 %v3039_v38  ;;  %2175 = vperm.xlu1 %2969, %v3867_v2   ;;  %v1972_v43 = vperm.slane %v1970_v61, 0 }
 0x295   : > { %2204 = vperm.xlu2 %2970, %v3831_v35   ;;  %2418 = vperm.xlu0 %2980, %v4128_v21  }
 0x29a   : > { %v4100_v32 = vpop.permute.xlu1 %1895 }
 0x29b   : > { %v4103_v28 = vpop.permute.xlu2 %1964 }
 0x29c   : > { %2972 = vset.pattern.permute.xlu1 %v3039_v38  ;;  %v1957_v38 = vperm.slane %v1955_v49, 0  ;;  %v1967_v30 = vperm.slane %v4103_v28, 0  ;;  %v1851_v49 = vmul.f32 %v1819_v20, %v1803_v44  ;;  %v1800_v28 = vmul.f32 %v1788_v5, %v1752_v13 }
 0x29d   : > { %2219 = vperm.xlu2 %2970, %v3839_v47   ;;  %2214 = vperm.xlu1 %2972, %v3842_v48  }
 0x29e   : > { %v1981_v22 = vmul.f32 %v1957_v38, %v1933_v53  ;;  %v1983_v37 = vmul.f32 %v1967_v30, %v1935_v4  ;;  %v1872_v38 = vld [vmem:[%s3203_s28 + $0x6a] sm:$0x1]  ;;  %v1864_v59 = vadd.f32 %v1856_v27, %v1800_v28 }
 0x2a0   : > { %v1989_v11 = vadd.f32 %v1981_v22, %v1925_v19  ;;  %v1991_v53 = vadd.f32 %v1983_v37, %v1927_v18  ;;  %v2009_v56 = vpop.permute.xlu0 %2008  ;;  %v3043_v19 = vmov 21   ;;  %v1898_v37 = vperm.slane %v4100_v32, 0 }
 0x2a2   : > { %v4112_v50 = vpop.permute.xlu1 %1910 }
 0x2a4   : > { %v2004_v42 = vpop.permute.xlu2 %2003 }
 0x2a5   : > { %v2006_v62 = vperm.slane %v2004_v42, 0  ;;  %2229 = vperm.xlu2 %2970, %v3852_v57   ;;  %2224 = vperm.xlu1 %2972, %v3855_v63   ;;  %v1999_v42 = vld [vmem:[%s3203_s28 + $0x5c] sm:$0x1] }
 0x2a7   : > { %v2042_v1 = vmul.f32 %v2006_v62, %v1994_v55  ;;  %v1859_v55 = vadd.f32 %v1851_v49, %v1795_v46  ;;  %v1947_v62 = vperm.slane %v4121_v31, 0  ;;  %v1920_v31 = vmul.f32 %v1908_v3, %v1872_v38  ;;  %v2997_v3 = vld [vmem:[%s3168_s23] sm:$0xff]  ;;  %v1998_v38 = vld [vmem:[%s3203_s28 + $0x4c] sm:$0x1] }
 0x2a9   : > { %v2050_v58 = vadd.f32 %v2042_v1, %v1986_v12  ;;  %v1931_v1 = vld [vmem:[%s3203_s28 + $0x1b] sm:$0x1]  ;;  %v1923_v22 = vadd.f32 %v1915_v40, %v1859_v55  ;;  %v1928_v6 = vadd.f32 %v1920_v31, %v1864_v59  ;;  %v1870_v55 = vld [vmem:[%s3203_s28 + $0x4a] sm:$0x1] }
 0x2aa   : > { %v1979_v15 = vmul.f32 %v1947_v62, %v1931_v1  ;;  %v1918_v32 = vmul.f32 %v1898_v37, %v1870_v55  ;;  %v2136_v55 = vld [vmem:[%s3203_s28 + $0x59] sm:$0x1] }
 0x2ab   : > { %2058 = vst [vmem:[%s3230_s4 + $0xa] sm:$0x1] %v2050_v58  ;;  %v4132_v9 = vpop.permute.xlu1 %1949 }
 0x2ac   : > { %v2019_v26 = vpop.permute.xlu2 %2018  ;;  %v1987_v16 = vadd.f32 %v1979_v15, %v1923_v22  ;;  %v1952_v30 = vperm.slane %v4132_v9, 0  ;;  %v1926_v59 = vadd.f32 %v1918_v32, %v4078_v25  ;;  %v1873_v22 = vld [vmem:[%s3203_s28 + $0x7a] sm:$0x1]  ;;  %v1937_v25 = vld [vmem:[%s3203_s28 + $0x7b] sm:$0x1]  ;;  %v4263_v32 = vrot.slane %v4125_v51, 4 }
 0x2ad   : > { %v2021_v45 = vperm.slane %v2019_v26, 0  ;;  %2973 = vset.pattern.permute.xlu2 %v3040_v10  ;;  %2239 = vperm.xlu1 %2972, %v3867_v2   ;;  %v1995_v26 = vld [vmem:[%s3203_s28 + $0x1c] sm:$0x1] }
 0x2ae   : > { %2268 = vperm.xlu2 %2973, %v3831_v35   ;;  %v4155_v35 = vrot.slane %v4125_v51, 6  ;;  %v1980_v29 = vmul.f32 %v1952_v30, %v1932_v17 }
 0x2af   : > { %v2045_v54 = vmul.f32 %v2021_v45, %v1997_v24  ;;  %v1936_v24 = vld [vmem:[%s3203_s28 + $0x6b] sm:$0x1]  ;;  %v2011_v45 = vperm.slane %v2009_v56, 0 }
 0x2b0   : > { %2443 = vperm.xlu0 %2980, %v4155_v35   ;;  %v1984_v44 = vmul.f32 %v1972_v43, %v1936_v24 }
 0x2b1   : > { %v2053_v60 = vadd.f32 %v2045_v54, %v1989_v11  ;;  %v1868_v11 = vld [vmem:[%s3203_s28 + $0x2a] sm:$0x1]  ;;  %v2043_v4 = vmul.f32 %v2011_v45, %v1995_v26  ;;  %v2034_v54 = vpop.permute.xlu0 %2033 }
 0x2b2   : > { %v1992_v61 = vadd.f32 %v1984_v44, %v1928_v6  ;;  %v2036_v13 = vperm.slane %v2034_v54, 0  ;;  %v1916_v49 = vmul.f32 %v1888_v0, %v1868_v11  ;;  %v2075_v6 = vld [vmem:[%s3203_s28 + $0x8] sm:$0x1] }
 0x2b3   : > { %2061 = vst [vmem:[%s3230_s4 + $0x3a] sm:$0x1] %v2053_v60  ;;  %v4158_v33 = vpop.permute.xlu1 %1959  ;;  %v2051_v46 = vadd.f32 %v2043_v4, %v1987_v16  ;;  %v2001_v16 = vld [vmem:[%s3203_s28 + $0x7c] sm:$0x1] }
 0x2b4   : > { %v2029_v34 = vpop.permute.xlu2 %2028  ;;  %v2048_v52 = vmul.f32 %v2036_v13, %v2000_v36  ;;  %v1924_v9 = vadd.f32 %v1916_v49, %v4067_v14  ;;  %v1934_v14 = vld [vmem:[%s3203_s28 + $0x4b] sm:$0x1]  ;;  %v3045_v49 = vmov 23   ;;  %v2134_v36 = vld [vmem:[%s3203_s28 + $0x39] sm:$0x1] }
 0x2b5   : > { %v2031_v12 = vperm.slane %v2029_v34, 0  ;;  %2975 = vset.pattern.permute.xlu1 %v3040_v10  ;;  %2059 = vst [vmem:[%s3230_s4 + $0x1a] sm:$0x1] %v2051_v46  ;;  %v1962_v34 = vperm.slane %v4158_v33, 0  ;;  %v1913_v33 = vperm.slane %v4112_v50, 0 }
 0x2b6   : > { %2283 = vperm.xlu2 %2973, %v3839_v47   ;;  %2278 = vperm.xlu1 %2975, %v3842_v48   ;;  %v2056_v41 = vadd.f32 %v2048_v52, %v1992_v61  ;;  %v2078_v61 = vld [vmem:[%s3203_s28 + $0x38] sm:$0x1] }
 0x2b7   : > { %v2047_v58 = vmul.f32 %v2031_v12, %v1999_v42  ;;  %v1988_v42 = vadd.f32 %v1980_v29, %v1924_v9  ;;  %v1982_v18 = vmul.f32 %v1962_v34, %v1934_v14  ;;  %v1921_v50 = vmul.f32 %v1913_v33, %v1873_v22 }
 0x2b8   : > { %2983 = vset.pattern.permute.xlu0 %v3043_v19  ;;  %2064 = vst [vmem:[%s3230_s4 + $0x6a] sm:$0x1] %v2056_v41  ;;  %v4246_v41 = vrot.slane %v4125_v51, 2  ;;  %v4260_v14 = vrot.slane %v4125_v51, 5 }
 0x2b9   : > { %v2055_v20 = vadd.f32 %v2047_v58, %v1991_v53  ;;  %2474 = vperm.xlu0 %2983, %v4128_v21   ;;  %v4201_v12 = vpop.permute.xlu0 %2089  ;;  %v3044_v53 = vmov 22   ;;  %v1990_v31 = vadd.f32 %v1982_v18, %v1926_v59 }
 0x2bb   : > { %2063 = vst [vmem:[%s3230_s4 + $0x5a] sm:$0x1] %v2055_v20  ;;  %v4172_v10 = vpop.permute.xlu1 %1974 }
 0x2bc   : > { %v1977_v15 = vperm.slane %v4172_v10, 0  ;;  %v1929_v10 = vadd.f32 %v1921_v50, %v4088_v39 }
 0x2bd   : > { %v4178_v5 = vpop.permute.xlu2 %2084 }
 0x2be   : > { %2293 = vperm.xlu2 %2973, %v3852_v57   ;;  %2288 = vperm.xlu1 %2975, %v3855_v63   ;;  %v1985_v24 = vmul.f32 %v1977_v15, %v1937_v25  ;;  %v2087_v26 = vperm.slane %v4178_v5, 0 }
 0x2c0   : > { %v1993_v0 = vadd.f32 %v1985_v24, %v1929_v10  ;;  %v2123_v11 = vmul.f32 %v2087_v26, %v2075_v6  ;;  %v2079_v24 = vld [vmem:[%s3203_s28 + $0x48] sm:$0x1]  ;;  %v2135_v26 = vld [vmem:[%s3203_s28 + $0x49] sm:$0x1] }
 0x2c1   : > { %2499 = vperm.xlu0 %2983, %v4155_v35  }
 0x2c4   : > { %v2014_v60 = vpop.permute.xlu1 %2013 }
 0x2c5   : > { %v2016_v28 = vperm.slane %v2014_v60, 0  ;;  %v4191_v27 = vpop.permute.xlu2 %2099  ;;  %v4243_v60 = vrot.slane %v4125_v51, 3 }
 0x2c6   : > { %2976 = vset.pattern.permute.xlu2 %v3041_v8  ;;  %2303 = vperm.xlu1 %2975, %v3867_v2   ;;  %v2102_v17 = vperm.slane %v4191_v27, 0  ;;  %v2080_v27 = vld [vmem:[%s3203_s28 + $0x58] sm:$0x1] }
 0x2c7   : > { %v2044_v40 = vmul.f32 %v2016_v28, %v1996_v23  ;;  %2332 = vperm.xlu2 %2976, %v2997_v3  }
 0x2c9   : > { %v2052_v62 = vadd.f32 %v2044_v40, %v1988_v42  ;;  %2986 = vset.pattern.permute.xlu0 %v3044_v53 }
 0x2ca   : > { %2538 = vperm.xlu0 %2986, %v4128_v21  }
 0x2cb   : > { %2060 = vst [vmem:[%s3230_s4 + $0x2a] sm:$0x1] %v2052_v62 }
 0x2cc   : > { %v2024_v1 = vpop.permute.xlu1 %2023 }
 0x2cd   : > { %v2026_v58 = vperm.slane %v2024_v1, 0  ;;  %v4207_v56 = vpop.permute.xlu2 %2109  ;;  %v4272_v1 = vrot.slane %v4125_v51, 7 }
 0x2ce   : > { %2978 = vset.pattern.permute.xlu1 %v3041_v8  ;;  %v4220_v8 = vpop.permute.xlu0 %2114  ;;  %v2112_v37 = vperm.slane %v4207_v56, 0  ;;  %v2133_v56 = vld [vmem:[%s3203_s28 + $0x29] sm:$0x1] }
 0x2cf   : > { %v2046_v43 = vmul.f32 %v2026_v58, %v1998_v38  ;;  %2347 = vperm.xlu2 %2976, %v3839_v47   ;;  %2342 = vperm.xlu1 %2978, %v3842_v48   ;;  %v2131_v47 = vld [vmem:[%s3203_s28 + $0x9] sm:$0x1]  ;;  %v3046_v38 = vmov 24   ;;  %v2077_v58 = vld [vmem:[%s3203_s28 + $0x28] sm:$0x1] }
 0x2d0   : > { %v2128_v34 = vmul.f32 %v2112_v37, %v2080_v27 }
 0x2d1   : > { %v2054_v20 = vadd.f32 %v2046_v43, %v1990_v31 }
 0x2d2   : > { %2563 = vperm.xlu0 %2986, %v4155_v35  }
 0x2d3   : > { %2062 = vst [vmem:[%s3230_s4 + $0x4a] sm:$0x1] %v2054_v20 }
 0x2d4   : > { %v2039_v44 = vpop.permute.xlu1 %2038 }
 0x2d5   : > { %v2041_v45 = vperm.slane %v2039_v44, 0 }
 0x2d6   : > { %v2141_v48 = vpop.permute.xlu2 %2140  ;;  %v4232_v46 = vpop.permute.xlu0 %2145 }
 0x2d7   : > { %v2049_v4 = vmul.f32 %v2041_v45, %v2001_v16  ;;  %v2143_v5 = vperm.slane %v2141_v48, 0  ;;  %2357 = vperm.xlu2 %2976, %v3852_v57   ;;  %2352 = vperm.xlu1 %2978, %v3855_v63   ;;  %v2126_v63 = vmul.f32 %v2102_v17, %v2078_v61  ;;  %v2148_v10 = vperm.slane %v4232_v46, 0  ;;  %v2132_v48 = vld [vmem:[%s3203_s28 + $0x19] sm:$0x1]  ;;  %v2081_v17 = vld [vmem:[%s3203_s28 + $0x68] sm:$0x1] }
 0x2d8   : > { %v2196_v46 = vld [vmem:[%s3203_s28 + $0x1a] sm:$0x1] }
 0x2d9   : > { %v2057_v30 = vadd.f32 %v2049_v4, %v1993_v0  ;;  %v2179_v54 = vmul.f32 %v2143_v5, %v2131_v47  ;;  %v2076_v47 = vld [vmem:[%s3203_s28 + $0x18] sm:$0x1]  ;;  %v2117_v4 = vperm.slane %v4220_v8, 0  ;;  %v2180_v5 = vmul.f32 %v2148_v10, %v2132_v48  ;;  %v2329_v48 = vld [vmem:[%s3203_s28 + $0x6c] sm:$0x1] }
 0x2da   : > { %2989 = vset.pattern.permute.xlu0 %v3045_v49 }
 0x2db   : > { %2065 = vst [vmem:[%s3230_s4 + $0x7a] sm:$0x1] %v2057_v30  ;;  %v4229_v39 = vadd.f32 %v2179_v54, %v2123_v11  ;;  %2602 = vperm.xlu0 %2989, %v4128_v21  }
 0x2dd   : > { %v2095_v13 = vpop.permute.xlu1 %2094 }
 0x2de   : > { %v2156_v57 = vpop.permute.xlu2 %2155  ;;  %v4248_v9 = vpop.permute.xlu0 %2170  ;;  %v2097_v33 = vperm.slane %v2095_v13, 0  ;;  %v2082_v13 = vld [vmem:[%s3203_s28 + $0x78] sm:$0x1] }
 0x2df   : > { %v2158_v52 = vperm.slane %v2156_v57, 0  ;;  %2979 = vset.pattern.permute.xlu2 %v3042_v7  ;;  %2367 = vperm.xlu1 %2978, %v3867_v2   ;;  %v2173_v61 = vperm.slane %v4248_v9, 0  ;;  %v2138_v57 = vld [vmem:[%s3203_s28 + $0x79] sm:$0x1] }
 0x2e0   : > { %2413 = vperm.xlu2 %2979, %v4125_v51  }
 0x2e1   : > { %v2182_v29 = vmul.f32 %v2158_v52, %v2134_v36  ;;  %v2137_v36 = vld [vmem:[%s3203_s28 + $0x69] sm:$0x1] }
 0x2e3   : > { %v4240_v23 = vadd.f32 %v2182_v29, %v2126_v63  ;;  %2627 = vperm.xlu0 %2989, %v4155_v35   ;;  %v2129_v29 = vmul.f32 %v2117_v4, %v2081_v17  ;;  %v2259_v17 = vld [vmem:[%s3203_s28 + $0xb] sm:$0x1] }
 0x2e5   : > { %v2105_v28 = vpop.permute.xlu1 %2104 }
 0x2e6   : > { %v2166_v42 = vpop.permute.xlu2 %2165  ;;  %v2210_v62 = vpop.permute.xlu0 %2209  ;;  %v2107_v20 = vperm.slane %v2105_v28, 0 }
 0x2e7   : > { %v2168_v2 = vperm.slane %v2166_v42, 0  ;;  %2981 = vset.pattern.permute.xlu1 %v3042_v7  ;;  %v2212_v30 = vperm.slane %v2210_v62, 0  ;;  %v2185_v42 = vmul.f32 %v2173_v61, %v2137_v36 }
 0x2e8   : > { %2428 = vperm.xlu2 %2979, %v4243_v60   ;;  %2423 = vperm.xlu1 %2981, %v4246_v41   ;;  %v2127_v45 = vmul.f32 %v2107_v20, %v2079_v24  ;;  %v2324_v24 = vld [vmem:[%s3203_s28 + $0x1c] sm:$0x1] }
 0x2e9   : > { %v2184_v40 = vmul.f32 %v2168_v2, %v2136_v55  ;;  %v2244_v27 = vmul.f32 %v2212_v30, %v2196_v46 }
 0x2eb   : > { %v4257_v3 = vadd.f32 %v2184_v40, %v2128_v34  ;;  %2992 = vset.pattern.permute.xlu0 %v3046_v38  ;;  %v2260_v34 = vld [vmem:[%s3203_s28 + $0x1b] sm:$0x1]  ;;  %v2201_v40 = vld [vmem:[%s3203_s28 + $0x6a] sm:$0x1] }
 0x2ec   : > { %2666 = vperm.xlu0 %2992, %v4128_v21   ;;  %v2125_v21 = vmul.f32 %v2097_v33, %v2077_v58 }
 0x2ed   : > { %v2120_v18 = vpop.permute.xlu1 %2119 }
 0x2ee   : > { %v4274_v59 = vpop.permute.xlu0 %2234  ;;  %v2122_v54 = vperm.slane %v2120_v18, 0 }
 0x2ef   : > { %v4266_v7 = vpop.permute.xlu2 %2204  ;;  %v2237_v9 = vperm.slane %v4274_v59, 0 }
 0x2f0   : > { %2438 = vperm.xlu2 %2979, %v4260_v14   ;;  %2433 = vperm.xlu1 %2981, %v4263_v32   ;;  %v2130_v55 = vmul.f32 %v2122_v54, %v2082_v13  ;;  %v2207_v30 = vperm.slane %v4266_v7, 0 }
 0x2f4   : > { %2691 = vperm.xlu0 %2992, %v4155_v35   ;;  %v2092_v35 = vperm.slane %v4201_v12, 0 }
 0x2f6   : > { %v2151_v22 = vpop.permute.xlu1 %2150  ;;  %v2274_v50 = vpop.permute.xlu0 %2273  ;;  %v2124_v12 = vmul.f32 %v2092_v35, %v2076_v47 }
 0x2f7   : > { %v2153_v31 = vperm.slane %v2151_v22, 0  ;;  %v4278_v15 = vpop.permute.xlu2 %2219  ;;  %v2276_v8 = vperm.slane %v2274_v50, 0  ;;  %v2249_v22 = vmul.f32 %v2237_v9, %v2201_v40 }
 0x2f8   : > { %2982 = vset.pattern.permute.xlu2 %v3043_v19  ;;  %2448 = vperm.xlu1 %2981, %v4272_v1   ;;  %v2188_v37 = vadd.f32 %v2180_v5, %v2124_v12 }
 0x2f9   : > { %v2181_v43 = vmul.f32 %v2153_v31, %v2133_v56  ;;  %2469 = vperm.xlu2 %2982, %v4125_v51   ;;  %v2308_v33 = vmul.f32 %v2276_v8, %v2260_v34  ;;  %v2193_v56 = vadd.f32 %v2185_v42, %v2129_v29  ;;  %v2198_v29 = vld [vmem:[%s3203_s28 + $0x3a] sm:$0x1]  ;;  %v2262_v8 = vld [vmem:[%s3203_s28 + $0x3b] sm:$0x1] }
 0x2fa   : > { %v2252_v18 = vadd.f32 %v2244_v27, %v2188_v37 }
 0x2fb   : > { %v4284_v25 = vadd.f32 %v2181_v43, %v2125_v21  ;;  %v2265_v21 = vld [vmem:[%s3203_s28 + $0x6b] sm:$0x1]  ;;  %v2257_v59 = vadd.f32 %v2249_v22, %v2193_v56 }
 0x2fc   : > { %v2316_v20 = vadd.f32 %v2308_v33, %v2252_v18 }
 0x2fe   : > { %v2161_v6 = vpop.permute.xlu1 %2160 }
 0x2ff   : > { %v2163_v16 = vperm.slane %v2161_v6, 0  ;;  %v4288_v44 = vpop.permute.xlu2 %2229 }
 0x300   : > { %2984 = vset.pattern.permute.xlu1 %v3043_v19  ;;  %v2299_v19 = vpop.permute.xlu0 %2298  ;;  %v2232_v18 = vperm.slane %v4288_v44, 0 }
 0x301   : > { %v2183_v0 = vmul.f32 %v2163_v16, %v2135_v26  ;;  %2484 = vperm.xlu2 %2982, %v4243_v60   ;;  %2479 = vperm.xlu1 %2984, %v4246_v41   ;;  %v2301_v31 = vperm.slane %v2299_v19, 0  ;;  %v2195_v19 = vld [vmem:[%s3203_s28 + $0xa] sm:$0x1] }
 0x302   : > { %v2243_v61 = vmul.f32 %v2207_v30, %v2195_v19 }
 0x303   : > { %v4297_v11 = vadd.f32 %v2183_v0, %v2127_v45  ;;  %v2313_v6 = vmul.f32 %v2301_v31, %v2265_v21  ;;  %v2264_v21 = vld [vmem:[%s3203_s28 + $0x5b] sm:$0x1] }
 0x304   : > { %v2251_v7 = vadd.f32 %v2243_v61, %v4229_v39 }
 0x305   : > { %v2321_v45 = vadd.f32 %v2313_v6, %v2257_v59 }
 0x306   : > { %v2176_v63 = vpop.permute.xlu1 %2175 }
 0x307   : > { %v2178_v52 = vperm.slane %v2176_v63, 0  ;;  %v2222_v63 = vperm.slane %v4278_v15, 0  ;;  %v2326_v15 = vld [vmem:[%s3203_s28 + $0x3c] sm:$0x1] }
 0x308   : > { %v2269_v28 = vpop.permute.xlu2 %2268  ;;  %v2338_v58 = vpop.permute.xlu0 %2337 }
 0x309   : > { %v2186_v2 = vmul.f32 %v2178_v52, %v2138_v57  ;;  %2494 = vperm.xlu2 %2982, %v4260_v14   ;;  %2489 = vperm.xlu1 %2984, %v4263_v32   ;;  %v2340_v26 = vperm.slane %v2338_v58, 0  ;;  %v2271_v54 = vperm.slane %v2269_v28, 0  ;;  %v2200_v58 = vld [vmem:[%s3203_s28 + $0x5a] sm:$0x1] }
 0x30b   : > { %v4311_v62 = vadd.f32 %v2186_v2, %v2130_v55  ;;  %v2372_v16 = vmul.f32 %v2340_v26, %v2324_v24  ;;  %v2307_v36 = vmul.f32 %v2271_v54, %v2259_v17  ;;  %v2246_v55 = vmul.f32 %v2222_v63, %v2198_v29  ;;  %v2328_v26 = vld [vmem:[%s3203_s28 + $0x5c] sm:$0x1]  ;;  %v2325_v17 = vld [vmem:[%s3203_s28 + $0x2c] sm:$0x1] }
 0x30d   : > { %v2380_v35 = vadd.f32 %v2372_v16, %v2316_v20  ;;  %v2315_v37 = vadd.f32 %v2307_v36, %v2251_v7  ;;  %v2254_v40 = vadd.f32 %v2246_v55, %v4240_v23  ;;  %v2199_v7 = vld [vmem:[%s3203_s28 + $0x4a] sm:$0x1] }
 0x30f   : > { %v4314_v43 = vpop.permute.xlu1 %2214  ;;  %2388 = vst [vmem:[%s3230_s4 + $0x1b] sm:$0x1] %v2380_v35 }
 0x310   : > { %v2284_v50 = vpop.permute.xlu2 %2283  ;;  %v2363_v10 = vpop.permute.xlu0 %2362 }
 0x311   : > { %2985 = vset.pattern.permute.xlu2 %v3044_v53  ;;  %2504 = vperm.xlu1 %2984, %v4272_v1   ;;  %v2365_v47 = vperm.slane %v2363_v10, 0  ;;  %v2286_v28 = vperm.slane %v2284_v50, 0  ;;  %v2248_v50 = vmul.f32 %v2232_v18, %v2200_v58 }
 0x312   : > { %2533 = vperm.xlu2 %2985, %v4125_v51  }
 0x313   : > { %v2377_v12 = vmul.f32 %v2365_v47, %v2329_v48  ;;  %v2310_v2 = vmul.f32 %v2286_v28, %v2262_v8  ;;  %v2256_v6 = vadd.f32 %v2248_v50, %v4257_v3  ;;  %v2327_v8 = vld [vmem:[%s3203_s28 + $0x4c] sm:$0x1] }
 0x315   : > { %v2385_v5 = vadd.f32 %v2377_v12, %v2321_v45  ;;  %v2318_v56 = vadd.f32 %v2310_v2, %v2254_v40  ;;  %v2217_v12 = vperm.slane %v4314_v43, 0 }
 0x317   : > { %v4322_v0 = vpop.permute.xlu1 %2224  ;;  %2393 = vst [vmem:[%s3230_s4 + $0x6b] sm:$0x1] %v2385_v5  ;;  %v2261_v5 = vld [vmem:[%s3203_s28 + $0x2b] sm:$0x1] }
 0x318   : > { %v2294_v4 = vpop.permute.xlu2 %2293  ;;  %v4331_v46 = vpop.permute.xlu0 %2418  ;;  %v2227_v43 = vperm.slane %v4322_v0, 0 }
 0x319   : > { %2987 = vset.pattern.permute.xlu1 %v3044_v53  ;;  %v2323_v53 = vld [vmem:[%s3203_s28 + $0xc] sm:$0x1]  ;;  %v2296_v22 = vperm.slane %v2294_v4, 0  ;;  %v2197_v4 = vld [vmem:[%s3203_s28 + $0x2a] sm:$0x1] }
 0x31a   : > { %2548 = vperm.xlu2 %2985, %v4243_v60   ;;  %2543 = vperm.xlu1 %2987, %v4246_v41   ;;  %v2245_v30 = vmul.f32 %v2217_v12, %v2197_v4  ;;  %v2247_v28 = vmul.f32 %v2227_v43, %v2199_v7  ;;  %v2525_v12 = vld [vmem:[%s3203_s28 + $0x1a] sm:$0x1]  ;;  %v2463_v43 = vld [vmem:[%s3203_s28 + $0x39] sm:$0x1] }
 0x31b   : > { %v2312_v24 = vmul.f32 %v2296_v22, %v2264_v21  ;;  %v2404_v22 = vld [vmem:[%s3203_s28 + $0x8] sm:$0x1] }
 0x31c   : > { %v2253_v36 = vadd.f32 %v2245_v30, %v4284_v25  ;;  %v2410_v30 = vld [vmem:[%s3203_s28 + $0x68] sm:$0x1] }
 0x31d   : > { %v2320_v35 = vadd.f32 %v2312_v24, %v2256_v6  ;;  %v2405_v24 = vld [vmem:[%s3203_s28 + $0x18] sm:$0x1] }
 0x31f   : > { %v4333_v13 = vpop.permute.xlu1 %2239 }
 0x320   : > { %v2242_v2 = vperm.slane %v4333_v13, 0 }
 0x321   : > { %v2333_v57 = vpop.permute.xlu2 %2332 }
 0x322   : > { %v2335_v52 = vperm.slane %v2333_v57, 0  ;;  %2558 = vperm.xlu2 %2985, %v4260_v14   ;;  %2553 = vperm.xlu1 %2987, %v4263_v32   ;;  %v4343_v9 = vpop.permute.xlu0 %2443 }
 0x324   : > { %v2371_v27 = vmul.f32 %v2335_v52, %v2323_v53 }
 0x326   : > { %v2379_v42 = vadd.f32 %v2371_v27, %v2315_v37  ;;  %v2263_v37 = vld [vmem:[%s3203_s28 + $0x4b] sm:$0x1] }
 0x328   : > { %2387 = vst [vmem:[%s3230_s4 + $0xb] sm:$0x1] %v2379_v42  ;;  %v2279_v39 = vpop.permute.xlu1 %2278  ;;  %v2255_v42 = vadd.f32 %v2247_v28, %v4297_v11  ;;  %v2266_v11 = vld [vmem:[%s3203_s28 + $0x7b] sm:$0x1] }
 0x329   : > { %v2348_v34 = vpop.permute.xlu2 %2347 }
 0x32a   : > { %v2350_v33 = vperm.slane %v2348_v34, 0  ;;  %2988 = vset.pattern.permute.xlu2 %v3045_v49  ;;  %2568 = vperm.xlu1 %2987, %v4272_v1  }
 0x32b   : > { %2597 = vperm.xlu2 %2988, %v4125_v51   ;;  %v4354_v44 = vpop.permute.xlu0 %2474 }
 0x32c   : > { %v2374_v31 = vmul.f32 %v2350_v33, %v2326_v15 }
 0x32e   : > { %v2382_v20 = vadd.f32 %v2374_v31, %v2318_v56  ;;  %v2421_v31 = vperm.slane %v4331_v46, 0 }
 0x330   : > { %2390 = vst [vmem:[%s3230_s4 + $0x3b] sm:$0x1] %v2382_v20  ;;  %v2289_v23 = vpop.permute.xlu1 %2288 }
 0x331   : > { %v2358_v59 = vpop.permute.xlu2 %2357  ;;  %v2291_v52 = vperm.slane %v2289_v23, 0  ;;  %v2461_v23 = vld [vmem:[%s3203_s28 + $0x19] sm:$0x1] }
 0x332   : > { %v2360_v16 = vperm.slane %v2358_v59, 0  ;;  %2990 = vset.pattern.permute.xlu1 %v3045_v49  ;;  %v2281_v49 = vperm.slane %v2279_v39, 0 }
 0x333   : > { %2612 = vperm.xlu2 %2988, %v4243_v60   ;;  %2607 = vperm.xlu1 %2990, %v4246_v41   ;;  %v4362_v48 = vpop.permute.xlu0 %2499  ;;  %v2311_v27 = vmul.f32 %v2291_v52, %v2263_v37 }
 0x334   : > { %v2376_v10 = vmul.f32 %v2360_v16, %v2328_v26  ;;  %v2309_v19 = vmul.f32 %v2281_v49, %v2261_v5  ;;  %v2460_v26 = vld [vmem:[%s3203_s28 + $0x9] sm:$0x1]  ;;  %v2407_v49 = vld [vmem:[%s3203_s28 + $0x38] sm:$0x1] }
 0x335   : > { %v2319_v34 = vadd.f32 %v2311_v27, %v2255_v42  ;;  %v2653_v42 = vld [vmem:[%s3203_s28 + $0x1c] sm:$0x1] }
 0x336   : > { %v2384_v45 = vadd.f32 %v2376_v10, %v2320_v35  ;;  %v2317_v63 = vadd.f32 %v2309_v19, %v2253_v36 }
 0x338   : > { %2392 = vst [vmem:[%s3230_s4 + $0x5b] sm:$0x1] %v2384_v45  ;;  %v2304_v47 = vpop.permute.xlu1 %2303 }
 0x339   : > { %v2306_v40 = vperm.slane %v2304_v47, 0 }
 0x33a   : > { %v2414_v3 = vpop.permute.xlu2 %2413 }
 0x33b   : > { %2622 = vperm.xlu2 %2988, %v4260_v14   ;;  %2617 = vperm.xlu1 %2990, %v4263_v32   ;;  %v2314_v58 = vmul.f32 %v2306_v40, %v2266_v11  ;;  %v2416_v56 = vperm.slane %v2414_v3, 0  ;;  %v2465_v11 = vld [vmem:[%s3203_s28 + $0x59] sm:$0x1] }
 0x33c   : > { %v4369_v54 = vpop.permute.xlu0 %2538 }
 0x33d   : > { %v2452_v16 = vmul.f32 %v2416_v56, %v2404_v22  ;;  %v2541_v47 = vperm.slane %v4369_v54, 0 }
 0x33f   : > { %v2573_v36 = vmul.f32 %v2541_v47, %v2525_v12 }
 0x341   : > { %v2343_v61 = vpop.permute.xlu1 %2342 }
 0x342   : > { %v2345_v53 = vperm.slane %v2343_v61, 0  ;;  %v4374_v57 = vpop.permute.xlu2 %2428 }
 0x343   : > { %2991 = vset.pattern.permute.xlu2 %v3046_v38  ;;  %2632 = vperm.xlu1 %2990, %v4272_v1   ;;  %v2431_v3 = vperm.slane %v4374_v57, 0  ;;  %v2589_v57 = vld [vmem:[%s3203_s28 + $0x1b] sm:$0x1] }
 0x344   : > { %v2373_v29 = vmul.f32 %v2345_v53, %v2325_v17  ;;  %2661 = vperm.xlu2 %2991, %v4125_v51   ;;  %v4382_v0 = vpop.permute.xlu0 %2563  ;;  %v2202_v51 = vld [vmem:[%s3203_s28 + $0x7a] sm:$0x1]  ;;  %v2466_v17 = vld [vmem:[%s3203_s28 + $0x69] sm:$0x1] }
 0x345   : > { %v2250_v13 = vmul.f32 %v2242_v2, %v2202_v51  ;;  %v2455_v7 = vmul.f32 %v2431_v3, %v2407_v49  ;;  %v2566_v37 = vperm.slane %v4382_v0, 0  ;;  %v2408_v3 = vld [vmem:[%s3203_s28 + $0x48] sm:$0x1]  ;;  %v2464_v49 = vld [vmem:[%s3203_s28 + $0x49] sm:$0x1] }
 0x346   : > { %v2381_v25 = vadd.f32 %v2373_v29, %v2317_v63 }
 0x347   : > { %v2258_v20 = vadd.f32 %v2250_v13, %v4311_v62  ;;  %v2453_v62 = vmul.f32 %v2421_v31, %v2405_v24  ;;  %v2594_v13 = vld [vmem:[%s3203_s28 + $0x6b] sm:$0x1] }
 0x348   : > { %2389 = vst [vmem:[%s3230_s4 + $0x2b] sm:$0x1] %v2381_v25  ;;  %v2530_v25 = vld [vmem:[%s3203_s28 + $0x6a] sm:$0x1] }
 0x349   : > { %v2353_v55 = vpop.permute.xlu1 %2352  ;;  %v2322_v6 = vadd.f32 %v2314_v58, %v2258_v20 }
 0x34a   : > { %v2355_v39 = vperm.slane %v2353_v55, 0  ;;  %v4387_v15 = vpop.permute.xlu2 %2438 }
 0x34b   : > { %2993 = vset.pattern.permute.xlu1 %v3046_v38  ;;  %v2330_v38 = vld [vmem:[%s3203_s28 + $0x7c] sm:$0x1] }
 0x34c   : > { %v2375_v18 = vmul.f32 %v2355_v39, %v2327_v8  ;;  %2676 = vperm.xlu2 %2991, %v4243_v60   ;;  %2671 = vperm.xlu1 %2993, %v4246_v41   ;;  %v2477_v60 = vperm.slane %v4354_v44, 0  ;;  %v2441_v8 = vperm.slane %v4387_v15, 0  ;;  %v2409_v39 = vld [vmem:[%s3203_s28 + $0x58] sm:$0x1] }
 0x34d   : > { %v2603_v50 = vpop.permute.xlu0 %2602 }
 0x34e   : > { %v2383_v33 = vadd.f32 %v2375_v18, %v2319_v34  ;;  %v2509_v46 = vmul.f32 %v2477_v60, %v2461_v23  ;;  %v2605_v54 = vperm.slane %v2603_v50, 0  ;;  %v2457_v56 = vmul.f32 %v2441_v8, %v2409_v39  ;;  %v2658_v60 = vld [vmem:[%s3203_s28 + $0x6c] sm:$0x1] }
 0x350   : > { %2391 = vst [vmem:[%s3230_s4 + $0x4b] sm:$0x1] %v2383_v33  ;;  %v2517_v19 = vadd.f32 %v2509_v46, %v2453_v62  ;;  %v2637_v28 = vmul.f32 %v2605_v54, %v2589_v57  ;;  %v2467_v54 = vld [vmem:[%s3203_s28 + $0x79] sm:$0x1] }
 0x351   : > { %v2368_v21 = vpop.permute.xlu1 %2367 }
 0x352   : > { %v2370_v41 = vperm.slane %v2368_v21, 0  ;;  %v2581_v29 = vadd.f32 %v2573_v36, %v2517_v19  ;;  %v2411_v36 = vld [vmem:[%s3203_s28 + $0x78] sm:$0x1] }
 0x353   : > { %v2470_v59 = vpop.permute.xlu2 %2469 }
 0x354   : > { %v2378_v35 = vmul.f32 %v2370_v41, %v2330_v38  ;;  %v2472_v10 = vperm.slane %v2470_v59, 0  ;;  %2686 = vperm.xlu2 %2991, %v4260_v14   ;;  %2681 = vperm.xlu1 %2993, %v4263_v32   ;;  %v2446_v14 = vperm.slane %v4343_v9, 0  ;;  %v2502_v32 = vperm.slane %v4362_v48, 0 }
 0x355   : > { %v2628_v5 = vpop.permute.xlu0 %2627  ;;  %v2645_v34 = vadd.f32 %v2637_v28, %v2581_v29 }
 0x356   : > { %v2386_v44 = vadd.f32 %v2378_v35, %v2322_v6  ;;  %v2508_v45 = vmul.f32 %v2472_v10, %v2460_v26  ;;  %v2458_v9 = vmul.f32 %v2446_v14, %v2410_v30  ;;  %v2514_v52 = vmul.f32 %v2502_v32, %v2466_v17  ;;  %v2462_v35 = vld [vmem:[%s3203_s28 + $0x29] sm:$0x1] }
 0x357   : > { %v2630_v40 = vperm.slane %v2628_v5, 0 }
 0x358   : > { %2394 = vst [vmem:[%s3230_s4 + $0x7b] sm:$0x1] %v2386_v44  ;;  %v4409_v4 = vadd.f32 %v2508_v45, %v2452_v16  ;;  %v2522_v55 = vadd.f32 %v2514_v52, %v2458_v9  ;;  %v2406_v16 = vld [vmem:[%s3203_s28 + $0x28] sm:$0x1] }
 0x359   : > { %v2642_v31 = vmul.f32 %v2630_v40, %v2594_v13 }
 0x35a   : > { %v2424_v61 = vpop.permute.xlu1 %2423 }
 0x35b   : > { %v2485_v53 = vpop.permute.xlu2 %2484  ;;  %v2426_v6 = vperm.slane %v2424_v61, 0 }
 0x35c   : > { %v2487_v63 = vperm.slane %v2485_v53, 0  ;;  %2696 = vperm.xlu1 %2993, %v4272_v1   ;;  %v2578_v1 = vmul.f32 %v2566_v37, %v2530_v25  ;;  %v2524_v25 = vld [vmem:[%s3203_s28 + $0xa] sm:$0x1] }
 0x35d   : > { %v2454_v44 = vmul.f32 %v2426_v6, %v2406_v16 }
 0x35e   : > { %v2511_v48 = vmul.f32 %v2487_v63, %v2463_v43  ;;  %v2667_v2 = vpop.permute.xlu0 %2666  ;;  %v2586_v15 = vadd.f32 %v2578_v1, %v2522_v55  ;;  %v2588_v55 = vld [vmem:[%s3203_s28 + $0xb] sm:$0x1] }
 0x35f   : > { %v2669_v18 = vperm.slane %v2667_v2, 0 }
 0x360   : > { %v4421_v27 = vadd.f32 %v2511_v48, %v2455_v7  ;;  %v2650_v24 = vadd.f32 %v2642_v31, %v2586_v15 }
 0x361   : > { %v2701_v58 = vmul.f32 %v2669_v18, %v2653_v42 }
 0x362   : > { %v2434_v51 = vpop.permute.xlu1 %2433 }
 0x363   : > { %v2495_v0 = vpop.permute.xlu2 %2494  ;;  %v2709_v38 = vadd.f32 %v2701_v58, %v2645_v34  ;;  %v2436_v12 = vperm.slane %v2434_v51, 0  ;;  %v2652_v51 = vld [vmem:[%s3203_s28 + $0xc] sm:$0x1]  ;;  %v2591_v58 = vld [vmem:[%s3203_s28 + $0x3b] sm:$0x1] }
 0x364   : > { %v2497_v33 = vperm.slane %v2495_v0, 0 }
 0x365   : > { %2717 = vst [vmem:[%s3230_s4 + $0x1c] sm:$0x1] %v2709_v38  ;;  %v2456_v30 = vmul.f32 %v2436_v12, %v2408_v3  ;;  %v2655_v38 = vld [vmem:[%s3203_s28 + $0x3c] sm:$0x1] }
 0x366   : > { %v2513_v22 = vmul.f32 %v2497_v33, %v2465_v11  ;;  %v2692_v50 = vpop.permute.xlu0 %2691  ;;  %v2527_v11 = vld [vmem:[%s3203_s28 + $0x3a] sm:$0x1] }
 0x367   : > { %v2694_v41 = vperm.slane %v2692_v50, 0 }
 0x368   : > { %v4428_v21 = vadd.f32 %v2513_v22, %v2457_v56 }
 0x369   : > { %v2706_v26 = vmul.f32 %v2694_v41, %v2658_v60  ;;  %v2529_v60 = vld [vmem:[%s3203_s28 + $0x5a] sm:$0x1] }
 0x36a   : > { %v2449_v20 = vpop.permute.xlu1 %2448 }
 0x36b   : > { %v2714_v59 = vadd.f32 %v2706_v26, %v2650_v24  ;;  %v2451_v61 = vperm.slane %v2449_v20, 0 }
 0x36c   : > { %v2534_v23 = vpop.permute.xlu2 %2533 }
 0x36d   : > { %2722 = vst [vmem:[%s3230_s4 + $0x6c] sm:$0x1] %v2714_v59  ;;  %v2459_v7 = vmul.f32 %v2451_v61, %v2411_v36  ;;  %v2536_v28 = vperm.slane %v2534_v23, 0  ;;  %v2593_v59 = vld [vmem:[%s3203_s28 + $0x5b] sm:$0x1] }
 0x36e   : > { %v248_v61 = vld [vmem:[%s3203_s28 + $0x40] sm:$0x3] }
 0x36f   : > { %v2572_v42 = vmul.f32 %v2536_v28, %v2524_v25  ;;  %256 = vst [vmem:[%s3230_s4 + $0x40] sm:$0x3] %v248_v61 }
 0x371   : > { %v2580_v34 = vadd.f32 %v2572_v42, %v4409_v4 }
 0x373   : > { %v2480_v10 = vpop.permute.xlu1 %2479 }
 0x374   : > { %v2482_v62 = vperm.slane %v2480_v10, 0  ;;  %v2549_v46 = vpop.permute.xlu2 %2548 }
 0x375   : > { %v2551_v40 = vperm.slane %v2549_v46, 0 }
 0x376   : > { %v2510_v45 = vmul.f32 %v2482_v62, %v2462_v35 }
 0x377   : > { %v2575_v56 = vmul.f32 %v2551_v40, %v2527_v11 }
 0x378   : > { %v4435_v47 = vadd.f32 %v2510_v45, %v2454_v44 }
 0x379   : > { %v2583_v4 = vadd.f32 %v2575_v56, %v4421_v27  ;;  %v2657_v27 = vld [vmem:[%s3203_s28 + $0x5c] sm:$0x1] }
 0x37b   : > { %v2490_v14 = vpop.permute.xlu1 %2489 }
 0x37c   : > { %v2492_v32 = vperm.slane %v2490_v14, 0  ;;  %v2559_v5 = vpop.permute.xlu2 %2558  ;;  %v244_v14 = vld [vmem:[%s3203_s28] sm:$0x3] }
 0x37d   : > { %v2561_v20 = vperm.slane %v2559_v5, 0  ;;  %v246_v5 = vld [vmem:[%s3203_s28 + $0x20] sm:$0x3]  ;;  %252 = vst [vmem:[%s3230_s4] sm:$0x3] %v244_v14 }
 0x37e   : > { %v2512_v19 = vmul.f32 %v2492_v32, %v2464_v49  ;;  %v245_v32 = vld [vmem:[%s3203_s28 + $0x10] sm:$0x3]  ;;  %254 = vst [vmem:[%s3230_s4 + $0x20] sm:$0x3] %v246_v5 }
 0x37f   : > { %v2577_v6 = vmul.f32 %v2561_v20, %v2529_v60  ;;  %253 = vst [vmem:[%s3230_s4 + $0x10] sm:$0x3] %v245_v32 }
 0x380   : > { %v4439_v17 = vadd.f32 %v2512_v19, %v2456_v30  ;;  %v247_v30 = vld [vmem:[%s3203_s28 + $0x30] sm:$0x3]  ;;  %v2526_v19 = vld [vmem:[%s3203_s28 + $0x2a] sm:$0x1] }
 0x381   : > { %v2585_v46 = vadd.f32 %v2577_v6, %v4428_v21  ;;  %255 = vst [vmem:[%s3230_s4 + $0x30] sm:$0x3] %v247_v30 }
 0x383   : > { %v2505_v43 = vpop.permute.xlu1 %2504 }
 0x384   : > { %v2507_v53 = vperm.slane %v2505_v43, 0  ;;  %v2590_v43 = vld [vmem:[%s3203_s28 + $0x2b] sm:$0x1] }
 0x385   : > { %v2598_v57 = vpop.permute.xlu2 %2597 }
 0x386   : > { %v2515_v63 = vmul.f32 %v2507_v53, %v2467_v54  ;;  %v2600_v8 = vperm.slane %v2598_v57, 0  ;;  %v249_v54 = vld [vmem:[%s3203_s28 + $0x50] sm:$0x3]  ;;  %v250_v53 = vld [vmem:[%s3203_s28 + $0x60] sm:$0x3] }
 0x387   : > { %257 = vst [vmem:[%s3230_s4 + $0x50] sm:$0x3] %v249_v54 }
 0x388   : > { %v4443_v9 = vadd.f32 %v2515_v63, %v2459_v7  ;;  %v2636_v39 = vmul.f32 %v2600_v8, %v2588_v55  ;;  %v251_v7 = vld [vmem:[%s3203_s28 + $0x70] sm:$0x3]  ;;  %258 = vst [vmem:[%s3230_s4 + $0x60] sm:$0x3] %v250_v53  ;;  %v2528_v8 = vld [vmem:[%s3203_s28 + $0x4a] sm:$0x1] }
 0x389   : > { %259 = vst [vmem:[%s3230_s4 + $0x70] sm:$0x3] %v251_v7 }
 0x38a   : > { %v2644_v0 = vadd.f32 %v2636_v39, %v2580_v34 }
 0x38c   : > { %v4445_v52 = vpop.permute.xlu1 %2543 }
 0x38d   : > { %v2613_v48 = vpop.permute.xlu2 %2612  ;;  %v2546_v21 = vperm.slane %v4445_v52, 0  ;;  %v2654_v52 = vld [vmem:[%s3203_s28 + $0x2c] sm:$0x1] }
 0x38e   : > { %v2615_v13 = vperm.slane %v2613_v48, 0 }
 0x38f   : > { %v2574_v57 = vmul.f32 %v2546_v21, %v2526_v19 }
 0x390   : > { %v2639_v15 = vmul.f32 %v2615_v13, %v2591_v58  ;;  %v2531_v13 = vld [vmem:[%s3203_s28 + $0x7a] sm:$0x1] }
 0x392   : > { %v2647_v41 = vadd.f32 %v2639_v15, %v2583_v4 }
 0x394   : > { %v4447_v29 = vpop.permute.xlu1 %2553 }
 0x395   : > { %v2623_v37 = vpop.permute.xlu2 %2622  ;;  %v2556_v28 = vperm.slane %v4447_v29, 0 }
 0x396   : > { %v2625_v23 = vperm.slane %v2623_v37, 0  ;;  %v2582_v37 = vadd.f32 %v2574_v57, %v4435_v47 }
 0x398   : > { %v2641_v35 = vmul.f32 %v2625_v23, %v2593_v59 }
 0x39a   : > { %v2649_v45 = vadd.f32 %v2641_v35, %v2585_v46 }
 0x39c   : > { %v4451_v2 = vpop.permute.xlu1 %2568 }
 0x39d   : > { %v2571_v29 = vperm.slane %v4451_v2, 0 }
 0x39e   : > { %v2662_v1 = vpop.permute.xlu2 %2661 }
 0x39f   : > { %v2664_v18 = vperm.slane %v2662_v1, 0  ;;  %v2576_v1 = vmul.f32 %v2556_v28, %v2528_v8  ;;  %v2579_v15 = vmul.f32 %v2571_v29, %v2531_v13 }
 0x3a1   : > { %v2700_v33 = vmul.f32 %v2664_v18, %v2652_v51  ;;  %v2592_v51 = vld [vmem:[%s3203_s28 + $0x4b] sm:$0x1]  ;;  %v2656_v18 = vld [vmem:[%s3203_s28 + $0x4c] sm:$0x1]  ;;  %v2584_v47 = vadd.f32 %v2576_v1, %v4439_v17  ;;  %v2587_v20 = vadd.f32 %v2579_v15, %v4443_v9 }
 0x3a3   : > { %v2708_v22 = vadd.f32 %v2700_v33, %v2644_v0 }
 0x3a5   : > { %2716 = vst [vmem:[%s3230_s4 + $0xc] sm:$0x1] %v2708_v22  ;;  %v2608_v31 = vpop.permute.xlu1 %2607  ;;  %v2595_v22 = vld [vmem:[%s3203_s28 + $0x7b] sm:$0x1] }
 0x3a6   : > { %v2677_v50 = vpop.permute.xlu2 %2676  ;;  %v2610_v36 = vperm.slane %v2608_v31, 0 }
 0x3a7   : > { %v2679_v24 = vperm.slane %v2677_v50, 0  ;;  %v2659_v50 = vld [vmem:[%s3203_s28 + $0x7c] sm:$0x1] }
 0x3a8   : > { %v2638_v63 = vmul.f32 %v2610_v36, %v2590_v43 }
 0x3a9   : > { %v2703_v26 = vmul.f32 %v2679_v24, %v2655_v38 }
 0x3aa   : > { %v2646_v55 = vadd.f32 %v2638_v63, %v2582_v37 }
 0x3ab   : > { %v2711_v16 = vadd.f32 %v2703_v26, %v2647_v41 }
 0x3ad   : > { %2719 = vst [vmem:[%s3230_s4 + $0x3c] sm:$0x1] %v2711_v16  ;;  %v2618_v10 = vpop.permute.xlu1 %2617 }
 0x3ae   : > { %v2687_v62 = vpop.permute.xlu2 %2686  ;;  %v2620_v42 = vperm.slane %v2618_v10, 0 }
 0x3af   : > { %v2689_v44 = vperm.slane %v2687_v62, 0 }
 0x3b0   : > { %v2640_v40 = vmul.f32 %v2620_v42, %v2592_v51 }
 0x3b1   : > { %v2705_v12 = vmul.f32 %v2689_v44, %v2657_v27 }
 0x3b2   : > { %v2648_v33 = vadd.f32 %v2640_v40, %v2584_v47 }
 0x3b3   : > { %v2713_v3 = vadd.f32 %v2705_v12, %v2649_v45 }
 0x3b5   : > { %2721 = vst [vmem:[%s3230_s4 + $0x5c] sm:$0x1] %v2713_v3  ;;  %v2633_v49 = vpop.permute.xlu1 %2632 }
 0x3b6   : > { %v2635_v58 = vperm.slane %v2633_v49, 0 }
 0x3b8   : > { %v2643_v38 = vmul.f32 %v2635_v58, %v2595_v22 }
 0x3ba   : > { %v2651_v60 = vadd.f32 %v2643_v38, %v2587_v20 }
 0x3be   : > { %v2672_v48 = vpop.permute.xlu1 %2671 }
 0x3bf   : > { %v2674_v25 = vperm.slane %v2672_v48, 0 }
 0x3c1   : > { %v2702_v39 = vmul.f32 %v2674_v25, %v2654_v52 }
 0x3c3   : > { %v2710_v34 = vadd.f32 %v2702_v39, %v2646_v55 }
 0x3c5   : > { %2718 = vst [vmem:[%s3230_s4 + $0x2c] sm:$0x1] %v2710_v34 }
 0x3c6   : > { %v2682_v11 = vpop.permute.xlu1 %2681 }
 0x3c7   : > { %v2684_v0 = vperm.slane %v2682_v11, 0 }
 0x3c9   : > { %v2704_v56 = vmul.f32 %v2684_v0, %v2656_v18 }
 0x3cb   : > { %v2712_v31 = vadd.f32 %v2704_v56, %v2648_v33 }
 0x3cd   : > { %2720 = vst [vmem:[%s3230_s4 + $0x4c] sm:$0x1] %v2712_v31 }
 0x3ce   : > { %v2697_v4 = vpop.permute.xlu1 %2696 }
 0x3cf   : > { %v2699_v24 = vperm.slane %v2697_v4, 0 }
 0x3d1   : > { %v2707_v17 = vmul.f32 %v2699_v24, %v2659_v50 }
 0x3d3   : > { %v2715_v41 = vadd.f32 %v2707_v17, %v2651_v60 }
 0x3d5   : > { %2723 = vst [vmem:[%s3230_s4 + $0x7c] sm:$0x1] %v2715_v41 }
 0x3d6 PF: > { %s13_s14 = sadd.s32 1, %s3020_s14   ;;  %s4513_s12 = smov %s3016_s13 }
 0x3d7   : > { %p10_p6 = scmp.ge.s32.totalorder %s13_s14, 4   ;;  %s4514_s13 = smov %s4516_s15 }
 0x3d9   :  { %12 = sbr.rel (!%p10_p6) target bundleno = 2 (0x2), region = 68 }

</bundles_post_ra>
